<compile_context>
chip_gen: v7x
topology: tpu7x:2x2x1
jax: 0.10.0
libtpu: 0.0.40
codegen_flags: <defaults>
</compile_context>

<pallas_src>
import math
import functools

import jax
import jax.numpy as jnp
from jax.experimental import pallas as pl
from jax.experimental.pallas import tpu as pltpu  # noqa: F401  (TPU backend assumed)

# ---------------- small config consistent with GPT_Model.__init__ ----------------
VOCAB = 64          # config.vocab_size
BLOCK_SIZE = 8      # config.block_size
N_EMBD = 32         # config.n_embd
N_HEAD = 4          # config.n_head
N_LAYER = 2         # config.n_layer
BNN_HIDDEN = (200, 200)   # bayesian_model(4*C, 5*C, [200, 200])


def _round_up(x, m):
    return ((x + m - 1) // m) * m


# lane-padded (multiple-of-128) widths; zero-padding keeps numerics exact.
H1P = _round_up(BNN_HIDDEN[0], 128)   # 200 -> 256
H2P = _round_up(BNN_HIDDEN[1], 128)   # 200 -> 256
F5P = _round_up(5 * N_EMBD, 128)      # 160 -> 256
VPAD = _round_up(VOCAB, 128)          # 64  -> 128 (lane-dense logits store)


# ---------------- in-kernel math helpers ----------------
def _erf(x):
    # Abramowitz & Stegun 7.1.26 rational approximation (|err| < 1.5e-7):
    # reproduces torch.nn.GELU's erf-GELU to f32 precision with Mosaic-friendly ops.
    p = 0.3275911
    a1, a2, a3, a4, a5 = 0.254829592, -0.284496736, 1.421413741, -1.453152027, 1.061405429
    s = jnp.where(x >= 0.0, 1.0, -1.0)
    ax = jnp.abs(x)
    t = 1.0 / (1.0 + p * ax)
    poly = ((((a5 * t + a4) * t + a3) * t + a2) * t + a1) * t
    return s * (1.0 - poly * jnp.exp(-ax * ax))


def _gelu(x):
    return 0.5 * x * (1.0 + _erf(x * (1.0 / math.sqrt(2.0))))


# ---------------- the single fused kernel ----------------
def _gpt_kernel(idx_ref, posx_ref, mask_ref, tok_ref,
                ln1g_ref, ln1b_ref,
                wq_ref, bq_ref, wk_ref, bk_ref, wv_ref, bv_ref, wo_ref, bo_ref,
                ln2g_ref, ln2b_ref, w1_ref, b1_ref,
                bw1_ref, bb1_ref, bw2_ref, bb2_ref, bw3_ref, bb3_ref,
                w2_ref, b2_ref, lnfg_ref, lnfb_ref, headw_ref,
                o_ref, *, batch, seq, n_head):
    V, C = tok_ref.shape
    BT = batch * seq
    Dh = C // n_head
    n_layer = ln1g_ref.shape[0]

    def bdot(a_f32, w_bf16):
        # feed the MXU bf16 operands, accumulate f32
        return jnp.dot(a_f32.astype(jnp.bfloat16), w_bf16,
                       preferred_element_type=jnp.float32)

    def layer_norm(z, g, b):
        mu = jnp.mean(z, axis=-1, keepdims=True)
        var = jnp.mean(jnp.square(z - mu), axis=-1, keepdims=True)   # biased var, eps=1e-5
        return (z - mu) * jax.lax.rsqrt(var + 1e-5) * g + b

    # ---- token embedding as a one-hot MXU matmul + (pre-tiled) positional embedding ----
    idx = idx_ref[...]                                               # (BT, 1) int32
    col = jax.lax.broadcasted_iota(jnp.int32, (BT, V), 1)
    onehot = (col == idx).astype(jnp.bfloat16)                       # exact 0/1 in bf16
    x = jnp.dot(onehot, tok_ref[...], preferred_element_type=jnp.float32)   # (BT, C)
    x = x + posx_ref[...]                                            # drop1/drop2: identity (eval)

    # ---- hoisted masks ----
    attn_ok = mask_ref[...] > 0.5                                    # block-diag(batch) & causal
    lane = jax.lax.broadcasted_iota(jnp.int32, (1, C), 1)
    head_masks = [((lane >= h * Dh) & (lane < (h + 1) * Dh)).astype(jnp.float32)
                  for h in range(n_head)]                            # per-head column masks
    scale = jnp.float32(1.0 / math.sqrt(Dh))
    neg_big = jnp.float32(-1e30)     # large finite negative: exp() underflows to exactly 0

    for l in range(n_layer):                                         # unrolled (N_LAYER = 2)
        # ---------------- x = x + attn(ln1(x)) ----------------
        u = layer_norm(x, ln1g_ref[l], ln1b_ref[l])
        q = (bdot(u, wq_ref[l]) + bq_ref[l]) * scale                 # scale folded into q
        k = bdot(u, wk_ref[l]) + bk_ref[l]
        v = bdot(u, wv_ref[l]) + bv_ref[l]
        kb = k.astype(jnp.bfloat16)

        # full-width per-head attention: no slices, no concats, no batch loop
        y = jnp.zeros((BT, C), jnp.float32)
        for hm in head_masks:
            qh = (q * hm).astype(jnp.bfloat16)                       # only head-h columns survive
            s = jax.lax.dot_general(qh, kb, (((1,), (1,)), ((), ())),
                                    preferred_element_type=jnp.float32)   # (BT, BT)
            s = jnp.where(attn_ok, s, neg_big)
            s = s - jnp.max(s, axis=-1, keepdims=True)
            p = jnp.exp(s)
            p = p * pl.reciprocal(jnp.sum(p, axis=-1, keepdims=True), approx=True)
            vh = (v * hm).astype(jnp.bfloat16)                       # head-h columns of v
            y = y + jnp.dot(p.astype(jnp.bfloat16), vh,
                            preferred_element_type=jnp.float32)      # contributes head-h cols only
        y = bdot(y, wo_ref[l]) + bo_ref[l]                           # output projection
        x = x + y                                                    # resid_drop identity

        # ---------------- x = x + mlp(ln2(x)) ----------------
        m = layer_norm(x, ln2g_ref[l], ln2b_ref[l])
        m = _gelu(bdot(m, w1_ref[l]) + b1_ref[l])
        # TODO(synk): bayesian_model is not defined in the provided source; implemented as its
        # deterministic mean MLP (4C -> 200 -> 200 -> 5C, ReLU hidden), zero-padded to 256 lanes.
        m = jnp.maximum(bdot(m, bw1_ref[l]) + bb1_ref[l], 0.0)
        m = jnp.maximum(bdot(m, bw2_ref[l]) + bb2_ref[l], 0.0)
        m = bdot(m, bw3_ref[l]) + bb3_ref[l]
        m = bdot(m, w2_ref[l]) + b2_ref[l]
        x = x + m                                                    # mlp Dropout identity

    # ---------------- final LayerNorm + LM head (bias-free, lane-dense padded to 128) ----
    xf = layer_norm(x, lnfg_ref[...], lnfb_ref[...])
    o_ref[...] = bdot(xf, headw_ref[...]).astype(o_ref.dtype)        # (BT, 128) unmasked store


# ---------------- deterministic parameter init (matches _init_weights) ----------------
def init_params(key):
    C, V, L = N_EMBD, VOCAB, N_LAYER
    H1, H2 = BNN_HIDDEN
    F5 = 5 * C

    def nrm(k, shape):
        return 0.02 * jax.random.normal(k, shape, jnp.float32)       # normal_(0, 0.02)

    def nrm_bf16(k, shape):
        return nrm(k, shape).astype(jnp.bfloat16)

    def nrm_pad_bf16(k, shape, padded):
        # zero-pad to lane-dense width; padded rows/cols are exactly zero -> numerics unchanged
        w = jnp.zeros(padded, jnp.float32).at[:shape[0], :shape[1]].set(nrm(k, shape))
        return w.astype(jnp.bfloat16)

    keys = jax.random.split(key, 2 + L)
    params = {
        "tok_emb": nrm_bf16(keys[0], (V, C)),                        # nn.Embedding weight
        "pos_emb": jnp.zeros((BLOCK_SIZE, C), jnp.float32),          # nn.Parameter(torch.zeros)
        "lnf_g": jnp.ones((1, C), jnp.float32),
        "lnf_b": jnp.zeros((1, C), jnp.float32),
        "head_w": nrm_pad_bf16(keys[1], (C, V), (C, VPAD)),          # Linear(C, V, bias=False)
    }

    names = ("ln1_g", "ln1_b", "wq", "bq", "wk", "bk", "wv", "bv", "wo", "bo",
             "ln2_g", "ln2_b", "w1", "b1", "bw1", "bb1", "bw2", "bb2", "bw3", "bb3",
             "w2", "b2")
    per_layer = {n: [] for n in names}
    for l in range(L):
        lk = jax.random.split(keys[2 + l], 9)
        per_layer["ln1_g"].append(jnp.ones((1, C), jnp.float32))
        per_layer["ln1_b"].append(jnp.zeros((1, C), jnp.float32))
        per_layer["ln2_g"].append(jnp.ones((1, C), jnp.float32))
        per_layer["ln2_b"].append(jnp.zeros((1, C), jnp.float32))
        # separate query/key/value projections (stored (in, out)), matching the module
        per_layer["wq"].append(nrm_bf16(lk[0], (C, C)))
        per_layer["bq"].append(jnp.zeros((1, C), jnp.float32))
        per_layer["wk"].append(nrm_bf16(lk[1], (C, C)))
        per_layer["bk"].append(jnp.zeros((1, C), jnp.float32))
        per_layer["wv"].append(nrm_bf16(lk[2], (C, C)))
        per_layer["bv"].append(jnp.zeros((1, C), jnp.float32))
        per_layer["wo"].append(nrm_bf16(lk[3], (C, C)))
        per_layer["bo"].append(jnp.zeros((1, C), jnp.float32))
        per_layer["w1"].append(nrm_bf16(lk[4], (C, 4 * C)))
        per_layer["b1"].append(jnp.zeros((1, 4 * C), jnp.float32))
        per_layer["bw1"].append(nrm_pad_bf16(lk[5], (4 * C, H1), (4 * C, H1P)))
        per_layer["bb1"].append(jnp.zeros((1, H1P), jnp.float32))
        per_layer["bw2"].append(nrm_pad_bf16(lk[6], (H1, H2), (H1P, H2P)))
        per_layer["bb2"].append(jnp.zeros((1, H2P), jnp.float32))
        per_layer["bw3"].append(nrm_pad_bf16(lk[7], (H2, F5), (H2P, F5P)))
        per_layer["bb3"].append(jnp.zeros((1, F5P), jnp.float32))
        per_layer["w2"].append(nrm_pad_bf16(lk[8], (F5, C), (F5P, C)))
        per_layer["b2"].append(jnp.zeros((1, C), jnp.float32))
    for n, lst in per_layer.items():
        params[n] = jnp.stack(lst, axis=0)                           # leading layer axis
    return params


# ---------------- forward pass: ONE pallas_call for the whole model ----------------
def gpt_forward(params, idx):
    B, T = idx.shape
    assert T <= BLOCK_SIZE, "Cannot forward, model block size is exhausted."
    BT = B * T

    # wrapper-side layout plumbing (free relative to the kernel):
    posx = jnp.tile(params["pos_emb"][:T], (B, 1))                   # (BT, C) pre-tiled pos emb
    r = jnp.arange(BT, dtype=jnp.int32)
    same_seq = (r[:, None] // T) == (r[None, :] // T)                # block-diagonal over batch
    causal = (r[None, :] % T) <= (r[:, None] % T)                    # causal within a sequence
    attn_mask = (same_seq & causal).astype(jnp.float32)              # (BT, BT)

    kern = functools.partial(_gpt_kernel, batch=B, seq=T, n_head=N_HEAD)
    logits_pad = pl.pallas_call(
        kern,
        out_shape=jax.ShapeDtypeStruct((BT, VPAD), jnp.float32),
        # no grid / no BlockSpecs: every (tiny, ~0.75 MB bf16) array is placed whole in VMEM
        # for the single invocation -> one launch, no HBM round trips for intermediates.
    )(
        idx.reshape(BT, 1).astype(jnp.int32), posx, attn_mask,
        params["tok_emb"],
        params["ln1_g"], params["ln1_b"],
        params["wq"], params["bq"], params["wk"], params["bk"],
        params["wv"], params["bv"], params["wo"], params["bo"],
        params["ln2_g"], params["ln2_b"], params["w1"], params["b1"],
        params["bw1"], params["bb1"], params["bw2"], params["bb2"],
        params["bw3"], params["bb3"], params["w2"], params["b2"],
        params["lnf_g"], params["lnf_b"], params["head_w"],
    )
    logits = logits_pad[:, :VOCAB].reshape(B, T, VOCAB)              # drop lane padding
    return logits, None                                              # targets=None -> loss=None


if __name__ == "__main__":
    key = jax.random.PRNGKey(0)
    pkey, ikey = jax.random.split(key)
    params = init_params(pkey)

    B, T = 2, BLOCK_SIZE
    idx = jax.random.randint(ikey, (B, T), 0, VOCAB, dtype=jnp.int32)

    logits, loss = jax.jit(gpt_forward)(params, idx)
    jax.block_until_ready(logits)

    assert logits.shape == (B, T, VOCAB)
    assert loss is None
    assert bool(jnp.all(jnp.isfinite(logits)))
    print("KERNEL_OK")
</pallas_src>

<mosaic_0001>
module attributes {stable_mosaic.version = 11 : i64} {
  func.func @_gpt_kernel(%arg0: memref<16x1xi32, #tpu.memory_space<vmem>>, %arg1: memref<16x32xf32, #tpu.memory_space<vmem>>, %arg2: memref<16x16xf32, #tpu.memory_space<vmem>>, %arg3: memref<64x32xbf16, #tpu.memory_space<vmem>>, %arg4: memref<2x1x32xf32, #tpu.memory_space<vmem>>, %arg5: memref<2x1x32xf32, #tpu.memory_space<vmem>>, %arg6: memref<2x32x32xbf16, #tpu.memory_space<vmem>>, %arg7: memref<2x1x32xf32, #tpu.memory_space<vmem>>, %arg8: memref<2x32x32xbf16, #tpu.memory_space<vmem>>, %arg9: memref<2x1x32xf32, #tpu.memory_space<vmem>>, %arg10: memref<2x32x32xbf16, #tpu.memory_space<vmem>>, %arg11: memref<2x1x32xf32, #tpu.memory_space<vmem>>, %arg12: memref<2x32x32xbf16, #tpu.memory_space<vmem>>, %arg13: memref<2x1x32xf32, #tpu.memory_space<vmem>>, %arg14: memref<2x1x32xf32, #tpu.memory_space<vmem>>, %arg15: memref<2x1x32xf32, #tpu.memory_space<vmem>>, %arg16: memref<2x32x128xbf16, #tpu.memory_space<vmem>>, %arg17: memref<2x1x128xf32, #tpu.memory_space<vmem>>, %arg18: memref<2x128x256xbf16, #tpu.memory_space<vmem>>, %arg19: memref<2x1x256xf32, #tpu.memory_space<vmem>>, %arg20: memref<2x256x256xbf16, #tpu.memory_space<vmem>>, %arg21: memref<2x1x256xf32, #tpu.memory_space<vmem>>, %arg22: memref<2x256x256xbf16, #tpu.memory_space<vmem>>, %arg23: memref<2x1x256xf32, #tpu.memory_space<vmem>>, %arg24: memref<2x256x32xbf16, #tpu.memory_space<vmem>>, %arg25: memref<2x1x32xf32, #tpu.memory_space<vmem>>, %arg26: memref<1x32xf32, #tpu.memory_space<vmem>>, %arg27: memref<1x32xf32, #tpu.memory_space<vmem>>, %arg28: memref<32x128xbf16, #tpu.memory_space<vmem>>, %arg29: memref<16x128xf32, #tpu.memory_space<vmem>>) attributes {dimension_semantics = [], scalar_prefetch = 0 : i64, scratch_operands = 0 : i64, tpu.core_type = #tpu.core_type<tc>} {
    %c0 = arith.constant 0 : index
    %c0_0 = arith.constant 0 : index
    %0 = vector.load %arg0[%c0, %c0_0] : memref<16x1xi32, #tpu.memory_space<vmem>>, vector<16x1xi32>
    %1 = tpu.iota {dimensions = array<i32: 1>} : vector<16x64xi32>
    %2 = vector.broadcast %0 : vector<16x1xi32> to vector<16x64xi32>
    %3 = arith.cmpi eq, %1, %2 : vector<16x64xi32>
    %4 = arith.extui %3 : vector<16x64xi1> to vector<16x64xi32>
    %5 = arith.sitofp %4 : vector<16x64xi32> to vector<16x64xf32>
    %6 = arith.truncf %5 : vector<16x64xf32> to vector<16x64xbf16>
    %c0_1 = arith.constant 0 : index
    %c0_2 = arith.constant 0 : index
    %7 = vector.load %arg3[%c0_1, %c0_2] : memref<64x32xbf16, #tpu.memory_space<vmem>>, vector<64x32xbf16>
    %cst = arith.constant dense<0.000000e+00> : vector<16x32xf32>
    %8 = tpu.matmul %6, %7, %cst {dimension_numbers = #tpu.dot_dimension_numbers<[1], [0], [0], [1], [0, 0, 1, 1], [], []>} : vector<16x64xbf16>, vector<64x32xbf16>, vector<16x32xf32> -> vector<16x32xf32>
    %c0_3 = arith.constant 0 : index
    %c0_4 = arith.constant 0 : index
    %9 = vector.load %arg1[%c0_3, %c0_4] : memref<16x32xf32, #tpu.memory_space<vmem>>, vector<16x32xf32>
    %10 = arith.addf %8, %9 : vector<16x32xf32>
    %c0_5 = arith.constant 0 : index
    %c0_6 = arith.constant 0 : index
    %11 = vector.load %arg2[%c0_5, %c0_6] : memref<16x16xf32, #tpu.memory_space<vmem>>, vector<16x16xf32>
    %cst_7 = arith.constant 5.000000e-01 : f32
    %12 = vector.broadcast %cst_7 : f32 to vector<16x16xf32>
    %13 = arith.cmpf ogt, %11, %12 : vector<16x16xf32>
    %14 = tpu.iota {dimensions = array<i32: 1>} : vector<1x32xi32>
    %c0_i32 = arith.constant 0 : i32
    %15 = vector.broadcast %c0_i32 : i32 to vector<1x32xi32>
    %16 = arith.cmpi sge, %14, %15 : vector<1x32xi32>
    %c8_i32 = arith.constant 8 : i32
    %17 = vector.broadcast %c8_i32 : i32 to vector<1x32xi32>
    %18 = arith.cmpi slt, %14, %17 : vector<1x32xi32>
    %19 = arith.andi %16, %18 : vector<1x32xi1>
    %20 = arith.extui %19 : vector<1x32xi1> to vector<1x32xi32>
    %21 = arith.sitofp %20 : vector<1x32xi32> to vector<1x32xf32>
    %c8_i32_8 = arith.constant 8 : i32
    %22 = vector.broadcast %c8_i32_8 : i32 to vector<1x32xi32>
    %23 = arith.cmpi sge, %14, %22 : vector<1x32xi32>
    %c16_i32 = arith.constant 16 : i32
    %24 = vector.broadcast %c16_i32 : i32 to vector<1x32xi32>
    %25 = arith.cmpi slt, %14, %24 : vector<1x32xi32>
    %26 = arith.andi %23, %25 : vector<1x32xi1>
    %27 = arith.extui %26 : vector<1x32xi1> to vector<1x32xi32>
    %28 = arith.sitofp %27 : vector<1x32xi32> to vector<1x32xf32>
    %c16_i32_9 = arith.constant 16 : i32
    %29 = vector.broadcast %c16_i32_9 : i32 to vector<1x32xi32>
    %30 = arith.cmpi sge, %14, %29 : vector<1x32xi32>
    %c24_i32 = arith.constant 24 : i32
    %31 = vector.broadcast %c24_i32 : i32 to vector<1x32xi32>
    %32 = arith.cmpi slt, %14, %31 : vector<1x32xi32>
    %33 = arith.andi %30, %32 : vector<1x32xi1>
    %34 = arith.extui %33 : vector<1x32xi1> to vector<1x32xi32>
    %35 = arith.sitofp %34 : vector<1x32xi32> to vector<1x32xf32>
    %c24_i32_10 = arith.constant 24 : i32
    %36 = vector.broadcast %c24_i32_10 : i32 to vector<1x32xi32>
    %37 = arith.cmpi sge, %14, %36 : vector<1x32xi32>
    %c32_i32 = arith.constant 32 : i32
    %38 = vector.broadcast %c32_i32 : i32 to vector<1x32xi32>
    %39 = arith.cmpi slt, %14, %38 : vector<1x32xi32>
    %40 = arith.andi %37, %39 : vector<1x32xi1>
    %41 = arith.extui %40 : vector<1x32xi1> to vector<1x32xi32>
    %42 = arith.sitofp %41 : vector<1x32xi32> to vector<1x32xf32>
    %c0_11 = arith.constant 0 : index
    %c0_12 = arith.constant 0 : index
    %c0_13 = arith.constant 0 : index
    %43 = vector.load %arg4[%c0_11, %c0_12, %c0_13] : memref<2x1x32xf32, #tpu.memory_space<vmem>>, vector<1x1x32xf32>
    %44 = vector.shape_cast %43 : vector<1x1x32xf32> to vector<1x32xf32>
    %c0_14 = arith.constant 0 : index
    %c0_15 = arith.constant 0 : index
    %c0_16 = arith.constant 0 : index
    %45 = vector.load %arg5[%c0_14, %c0_15, %c0_16] : memref<2x1x32xf32, #tpu.memory_space<vmem>>, vector<1x1x32xf32>
    %46 = vector.shape_cast %45 : vector<1x1x32xf32> to vector<1x32xf32>
    %cst_17 = arith.constant dense<0.000000e+00> : vector<16xf32>
    %47 = vector.multi_reduction <add>, %10, %cst_17 [1] : vector<16x32xf32> to vector<16xf32>
    %48 = vector.shape_cast %47 : vector<16xf32> to vector<16x1xf32>
    %cst_18 = arith.constant 3.200000e+01 : f32
    %49 = vector.broadcast %cst_18 : f32 to vector<16x1xf32>
    %50 = arith.divf %48, %49 : vector<16x1xf32>
    %51 = vector.broadcast %50 : vector<16x1xf32> to vector<16x32xf32>
    %52 = arith.subf %10, %51 : vector<16x32xf32>
    %53 = arith.mulf %52, %52 : vector<16x32xf32>
    %cst_19 = arith.constant dense<0.000000e+00> : vector<16xf32>
    %54 = vector.multi_reduction <add>, %53, %cst_19 [1] : vector<16x32xf32> to vector<16xf32>
    %55 = vector.shape_cast %54 : vector<16xf32> to vector<16x1xf32>
    %cst_20 = arith.constant 3.200000e+01 : f32
    %56 = vector.broadcast %cst_20 : f32 to vector<16x1xf32>
    %57 = arith.divf %55, %56 : vector<16x1xf32>
    %58 = vector.broadcast %50 : vector<16x1xf32> to vector<16x32xf32>
    %59 = arith.subf %10, %58 : vector<16x32xf32>
    %cst_21 = arith.constant 9.99999974E-6 : f32
    %60 = vector.broadcast %cst_21 : f32 to vector<16x1xf32>
    %61 = arith.addf %57, %60 : vector<16x1xf32>
    %62 = math.rsqrt %61 : vector<16x1xf32>
    %63 = vector.broadcast %62 : vector<16x1xf32> to vector<16x32xf32>
    %64 = arith.mulf %59, %63 : vector<16x32xf32>
    %65 = vector.broadcast %44 : vector<1x32xf32> to vector<16x32xf32>
    %66 = arith.mulf %64, %65 : vector<16x32xf32>
    %67 = vector.broadcast %46 : vector<1x32xf32> to vector<16x32xf32>
    %68 = arith.addf %66, %67 : vector<16x32xf32>
    %c0_22 = arith.constant 0 : index
    %c0_23 = arith.constant 0 : index
    %c0_24 = arith.constant 0 : index
    %69 = vector.load %arg6[%c0_22, %c0_23, %c0_24] : memref<2x32x32xbf16, #tpu.memory_space<vmem>>, vector<1x32x32xbf16>
    %70 = vector.shape_cast %69 : vector<1x32x32xbf16> to vector<32x32xbf16>
    %71 = arith.truncf %68 : vector<16x32xf32> to vector<16x32xbf16>
    %cst_25 = arith.constant dense<0.000000e+00> : vector<16x32xf32>
    %72 = tpu.matmul %71, %70, %cst_25 {dimension_numbers = #tpu.dot_dimension_numbers<[1], [0], [0], [1], [0, 0, 1, 1], [], []>} : vector<16x32xbf16>, vector<32x32xbf16>, vector<16x32xf32> -> vector<16x32xf32>
    %c0_26 = arith.constant 0 : index
    %c0_27 = arith.constant 0 : index
    %c0_28 = arith.constant 0 : index
    %73 = vector.load %arg7[%c0_26, %c0_27, %c0_28] : memref<2x1x32xf32, #tpu.memory_space<vmem>>, vector<1x1x32xf32>
    %74 = vector.shape_cast %73 : vector<1x1x32xf32> to vector<1x32xf32>
    %75 = vector.broadcast %74 : vector<1x32xf32> to vector<16x32xf32>
    %76 = arith.addf %72, %75 : vector<16x32xf32>
    %cst_29 = arith.constant 0.353553385 : f32
    %77 = vector.broadcast %cst_29 : f32 to vector<16x32xf32>
    %78 = arith.mulf %76, %77 : vector<16x32xf32>
    %c0_30 = arith.constant 0 : index
    %c0_31 = arith.constant 0 : index
    %c0_32 = arith.constant 0 : index
    %79 = vector.load %arg8[%c0_30, %c0_31, %c0_32] : memref<2x32x32xbf16, #tpu.memory_space<vmem>>, vector<1x32x32xbf16>
    %80 = vector.shape_cast %79 : vector<1x32x32xbf16> to vector<32x32xbf16>
    %81 = arith.truncf %68 : vector<16x32xf32> to vector<16x32xbf16>
    %cst_33 = arith.constant dense<0.000000e+00> : vector<16x32xf32>
    %82 = tpu.matmul %81, %80, %cst_33 {dimension_numbers = #tpu.dot_dimension_numbers<[1], [0], [0], [1], [0, 0, 1, 1], [], []>} : vector<16x32xbf16>, vector<32x32xbf16>, vector<16x32xf32> -> vector<16x32xf32>
    %c0_34 = arith.constant 0 : index
    %c0_35 = arith.constant 0 : index
    %c0_36 = arith.constant 0 : index
    %83 = vector.load %arg9[%c0_34, %c0_35, %c0_36] : memref<2x1x32xf32, #tpu.memory_space<vmem>>, vector<1x1x32xf32>
    %84 = vector.shape_cast %83 : vector<1x1x32xf32> to vector<1x32xf32>
    %85 = vector.broadcast %84 : vector<1x32xf32> to vector<16x32xf32>
    %86 = arith.addf %82, %85 : vector<16x32xf32>
    %c0_37 = arith.constant 0 : index
    %c0_38 = arith.constant 0 : index
    %c0_39 = arith.constant 0 : index
    %87 = vector.load %arg10[%c0_37, %c0_38, %c0_39] : memref<2x32x32xbf16, #tpu.memory_space<vmem>>, vector<1x32x32xbf16>
    %88 = vector.shape_cast %87 : vector<1x32x32xbf16> to vector<32x32xbf16>
    %89 = arith.truncf %68 : vector<16x32xf32> to vector<16x32xbf16>
    %cst_40 = arith.constant dense<0.000000e+00> : vector<16x32xf32>
    %90 = tpu.matmul %89, %88, %cst_40 {dimension_numbers = #tpu.dot_dimension_numbers<[1], [0], [0], [1], [0, 0, 1, 1], [], []>} : vector<16x32xbf16>, vector<32x32xbf16>, vector<16x32xf32> -> vector<16x32xf32>
    %c0_41 = arith.constant 0 : index
    %c0_42 = arith.constant 0 : index
    %c0_43 = arith.constant 0 : index
    %91 = vector.load %arg11[%c0_41, %c0_42, %c0_43] : memref<2x1x32xf32, #tpu.memory_space<vmem>>, vector<1x1x32xf32>
    %92 = vector.shape_cast %91 : vector<1x1x32xf32> to vector<1x32xf32>
    %93 = vector.broadcast %92 : vector<1x32xf32> to vector<16x32xf32>
    %94 = arith.addf %90, %93 : vector<16x32xf32>
    %95 = arith.truncf %86 : vector<16x32xf32> to vector<16x32xbf16>
    %cst_44 = arith.constant 0.000000e+00 : f32
    %96 = vector.broadcast %cst_44 : f32 to vector<16x32xf32>
    %97 = vector.broadcast %21 : vector<1x32xf32> to vector<16x32xf32>
    %98 = arith.mulf %78, %97 : vector<16x32xf32>
    %99 = arith.truncf %98 : vector<16x32xf32> to vector<16x32xbf16>
    %cst_45 = arith.constant dense<0.000000e+00> : vector<16x16xf32>
    %100 = tpu.matmul %99, %95, %cst_45 {dimension_numbers = #tpu.dot_dimension_numbers<[1], [1], [0], [0], [0, 0, 1, 0], [], []>} : vector<16x32xbf16>, vector<16x32xbf16>, vector<16x16xf32> -> vector<16x16xf32>
    %cst_46 = arith.constant -1.000000e+30 : f32
    %101 = vector.broadcast %cst_46 : f32 to vector<16x16xf32>
    %102 = arith.select %13, %100, %101 : vector<16x16xi1>, vector<16x16xf32>
    %cst_47 = arith.constant dense<0xFF800000> : vector<16xf32>
    %103 = vector.multi_reduction <maximumf>, %102, %cst_47 [1] : vector<16x16xf32> to vector<16xf32>
    %104 = vector.shape_cast %103 : vector<16xf32> to vector<16x1xf32>
    %105 = vector.broadcast %104 : vector<16x1xf32> to vector<16x16xf32>
    %106 = arith.subf %102, %105 : vector<16x16xf32>
    %107 = math.exp %106 : vector<16x16xf32>
    %cst_48 = arith.constant dense<0.000000e+00> : vector<16xf32>
    %108 = vector.multi_reduction <add>, %107, %cst_48 [1] : vector<16x16xf32> to vector<16xf32>
    %109 = vector.shape_cast %108 : vector<16xf32> to vector<16x1xf32>
    %110 = tpu.reciprocal %109 {approx = true} : vector<16x1xf32> -> vector<16x1xf32>
    %111 = vector.broadcast %110 : vector<16x1xf32> to vector<16x16xf32>
    %112 = arith.mulf %107, %111 : vector<16x16xf32>
    %113 = vector.broadcast %21 : vector<1x32xf32> to vector<16x32xf32>
    %114 = arith.mulf %94, %113 : vector<16x32xf32>
    %115 = arith.truncf %114 : vector<16x32xf32> to vector<16x32xbf16>
    %116 = arith.truncf %112 : vector<16x16xf32> to vector<16x16xbf16>
    %cst_49 = arith.constant dense<0.000000e+00> : vector<16x32xf32>
    %117 = tpu.matmul %116, %115, %cst_49 {dimension_numbers = #tpu.dot_dimension_numbers<[1], [0], [0], [1], [0, 0, 1, 1], [], []>} : vector<16x16xbf16>, vector<16x32xbf16>, vector<16x32xf32> -> vector<16x32xf32>
    %118 = arith.addf %96, %117 : vector<16x32xf32>
    %119 = vector.broadcast %28 : vector<1x32xf32> to vector<16x32xf32>
    %120 = arith.mulf %78, %119 : vector<16x32xf32>
    %121 = arith.truncf %120 : vector<16x32xf32> to vector<16x32xbf16>
    %cst_50 = arith.constant dense<0.000000e+00> : vector<16x16xf32>
    %122 = tpu.matmul %121, %95, %cst_50 {dimension_numbers = #tpu.dot_dimension_numbers<[1], [1], [0], [0], [0, 0, 1, 0], [], []>} : vector<16x32xbf16>, vector<16x32xbf16>, vector<16x16xf32> -> vector<16x16xf32>
    %cst_51 = arith.constant -1.000000e+30 : f32
    %123 = vector.broadcast %cst_51 : f32 to vector<16x16xf32>
    %124 = arith.select %13, %122, %123 : vector<16x16xi1>, vector<16x16xf32>
    %cst_52 = arith.constant dense<0xFF800000> : vector<16xf32>
    %125 = vector.multi_reduction <maximumf>, %124, %cst_52 [1] : vector<16x16xf32> to vector<16xf32>
    %126 = vector.shape_cast %125 : vector<16xf32> to vector<16x1xf32>
    %127 = vector.broadcast %126 : vector<16x1xf32> to vector<16x16xf32>
    %128 = arith.subf %124, %127 : vector<16x16xf32>
    %129 = math.exp %128 : vector<16x16xf32>
    %cst_53 = arith.constant dense<0.000000e+00> : vector<16xf32>
    %130 = vector.multi_reduction <add>, %129, %cst_53 [1] : vector<16x16xf32> to vector<16xf32>
    %131 = vector.shape_cast %130 : vector<16xf32> to vector<16x1xf32>
    %132 = tpu.reciprocal %131 {approx = true} : vector<16x1xf32> -> vector<16x1xf32>
    %133 = vector.broadcast %132 : vector<16x1xf32> to vector<16x16xf32>
    %134 = arith.mulf %129, %133 : vector<16x16xf32>
    %135 = vector.broadcast %28 : vector<1x32xf32> to vector<16x32xf32>
    %136 = arith.mulf %94, %135 : vector<16x32xf32>
    %137 = arith.truncf %136 : vector<16x32xf32> to vector<16x32xbf16>
    %138 = arith.truncf %134 : vector<16x16xf32> to vector<16x16xbf16>
    %cst_54 = arith.constant dense<0.000000e+00> : vector<16x32xf32>
    %139 = tpu.matmul %138, %137, %cst_54 {dimension_numbers = #tpu.dot_dimension_numbers<[1], [0], [0], [1], [0, 0, 1, 1], [], []>} : vector<16x16xbf16>, vector<16x32xbf16>, vector<16x32xf32> -> vector<16x32xf32>
    %140 = arith.addf %118, %139 : vector<16x32xf32>
    %141 = vector.broadcast %35 : vector<1x32xf32> to vector<16x32xf32>
    %142 = arith.mulf %78, %141 : vector<16x32xf32>
    %143 = arith.truncf %142 : vector<16x32xf32> to vector<16x32xbf16>
    %cst_55 = arith.constant dense<0.000000e+00> : vector<16x16xf32>
    %144 = tpu.matmul %143, %95, %cst_55 {dimension_numbers = #tpu.dot_dimension_numbers<[1], [1], [0], [0], [0, 0, 1, 0], [], []>} : vector<16x32xbf16>, vector<16x32xbf16>, vector<16x16xf32> -> vector<16x16xf32>
    %cst_56 = arith.constant -1.000000e+30 : f32
    %145 = vector.broadcast %cst_56 : f32 to vector<16x16xf32>
    %146 = arith.select %13, %144, %145 : vector<16x16xi1>, vector<16x16xf32>
    %cst_57 = arith.constant dense<0xFF800000> : vector<16xf32>
    %147 = vector.multi_reduction <maximumf>, %146, %cst_57 [1] : vector<16x16xf32> to vector<16xf32>
    %148 = vector.shape_cast %147 : vector<16xf32> to vector<16x1xf32>
    %149 = vector.broadcast %148 : vector<16x1xf32> to vector<16x16xf32>
    %150 = arith.subf %146, %149 : vector<16x16xf32>
    %151 = math.exp %150 : vector<16x16xf32>
    %cst_58 = arith.constant dense<0.000000e+00> : vector<16xf32>
    %152 = vector.multi_reduction <add>, %151, %cst_58 [1] : vector<16x16xf32> to vector<16xf32>
    %153 = vector.shape_cast %152 : vector<16xf32> to vector<16x1xf32>
    %154 = tpu.reciprocal %153 {approx = true} : vector<16x1xf32> -> vector<16x1xf32>
    %155 = vector.broadcast %154 : vector<16x1xf32> to vector<16x16xf32>
    %156 = arith.mulf %151, %155 : vector<16x16xf32>
    %157 = vector.broadcast %35 : vector<1x32xf32> to vector<16x32xf32>
    %158 = arith.mulf %94, %157 : vector<16x32xf32>
    %159 = arith.truncf %158 : vector<16x32xf32> to vector<16x32xbf16>
    %160 = arith.truncf %156 : vector<16x16xf32> to vector<16x16xbf16>
    %cst_59 = arith.constant dense<0.000000e+00> : vector<16x32xf32>
    %161 = tpu.matmul %160, %159, %cst_59 {dimension_numbers = #tpu.dot_dimension_numbers<[1], [0], [0], [1], [0, 0, 1, 1], [], []>} : vector<16x16xbf16>, vector<16x32xbf16>, vector<16x32xf32> -> vector<16x32xf32>
    %162 = arith.addf %140, %161 : vector<16x32xf32>
    %163 = vector.broadcast %42 : vector<1x32xf32> to vector<16x32xf32>
    %164 = arith.mulf %78, %163 : vector<16x32xf32>
    %165 = arith.truncf %164 : vector<16x32xf32> to vector<16x32xbf16>
    %cst_60 = arith.constant dense<0.000000e+00> : vector<16x16xf32>
    %166 = tpu.matmul %165, %95, %cst_60 {dimension_numbers = #tpu.dot_dimension_numbers<[1], [1], [0], [0], [0, 0, 1, 0], [], []>} : vector<16x32xbf16>, vector<16x32xbf16>, vector<16x16xf32> -> vector<16x16xf32>
    %cst_61 = arith.constant -1.000000e+30 : f32
    %167 = vector.broadcast %cst_61 : f32 to vector<16x16xf32>
    %168 = arith.select %13, %166, %167 : vector<16x16xi1>, vector<16x16xf32>
    %cst_62 = arith.constant dense<0xFF800000> : vector<16xf32>
    %169 = vector.multi_reduction <maximumf>, %168, %cst_62 [1] : vector<16x16xf32> to vector<16xf32>
    %170 = vector.shape_cast %169 : vector<16xf32> to vector<16x1xf32>
    %171 = vector.broadcast %170 : vector<16x1xf32> to vector<16x16xf32>
    %172 = arith.subf %168, %171 : vector<16x16xf32>
    %173 = math.exp %172 : vector<16x16xf32>
    %cst_63 = arith.constant dense<0.000000e+00> : vector<16xf32>
    %174 = vector.multi_reduction <add>, %173, %cst_63 [1] : vector<16x16xf32> to vector<16xf32>
    %175 = vector.shape_cast %174 : vector<16xf32> to vector<16x1xf32>
    %176 = tpu.reciprocal %175 {approx = true} : vector<16x1xf32> -> vector<16x1xf32>
    %177 = vector.broadcast %176 : vector<16x1xf32> to vector<16x16xf32>
    %178 = arith.mulf %173, %177 : vector<16x16xf32>
    %179 = vector.broadcast %42 : vector<1x32xf32> to vector<16x32xf32>
    %180 = arith.mulf %94, %179 : vector<16x32xf32>
    %181 = arith.truncf %180 : vector<16x32xf32> to vector<16x32xbf16>
    %182 = arith.truncf %178 : vector<16x16xf32> to vector<16x16xbf16>
    %cst_64 = arith.constant dense<0.000000e+00> : vector<16x32xf32>
    %183 = tpu.matmul %182, %181, %cst_64 {dimension_numbers = #tpu.dot_dimension_numbers<[1], [0], [0], [1], [0, 0, 1, 1], [], []>} : vector<16x16xbf16>, vector<16x32xbf16>, vector<16x32xf32> -> vector<16x32xf32>
    %184 = arith.addf %162, %183 : vector<16x32xf32>
    %c0_65 = arith.constant 0 : index
    %c0_66 = arith.constant 0 : index
    %c0_67 = arith.constant 0 : index
    %185 = vector.load %arg12[%c0_65, %c0_66, %c0_67] : memref<2x32x32xbf16, #tpu.memory_space<vmem>>, vector<1x32x32xbf16>
    %186 = vector.shape_cast %185 : vector<1x32x32xbf16> to vector<32x32xbf16>
    %187 = arith.truncf %184 : vector<16x32xf32> to vector<16x32xbf16>
    %cst_68 = arith.constant dense<0.000000e+00> : vector<16x32xf32>
    %188 = tpu.matmul %187, %186, %cst_68 {dimension_numbers = #tpu.dot_dimension_numbers<[1], [0], [0], [1], [0, 0, 1, 1], [], []>} : vector<16x32xbf16>, vector<32x32xbf16>, vector<16x32xf32> -> vector<16x32xf32>
    %c0_69 = arith.constant 0 : index
    %c0_70 = arith.constant 0 : index
    %c0_71 = arith.constant 0 : index
    %189 = vector.load %arg13[%c0_69, %c0_70, %c0_71] : memref<2x1x32xf32, #tpu.memory_space<vmem>>, vector<1x1x32xf32>
    %190 = vector.shape_cast %189 : vector<1x1x32xf32> to vector<1x32xf32>
    %191 = vector.broadcast %190 : vector<1x32xf32> to vector<16x32xf32>
    %192 = arith.addf %188, %191 : vector<16x32xf32>
    %193 = arith.addf %10, %192 : vector<16x32xf32>
    %c0_72 = arith.constant 0 : index
    %c0_73 = arith.constant 0 : index
    %c0_74 = arith.constant 0 : index
    %194 = vector.load %arg14[%c0_72, %c0_73, %c0_74] : memref<2x1x32xf32, #tpu.memory_space<vmem>>, vector<1x1x32xf32>
    %195 = vector.shape_cast %194 : vector<1x1x32xf32> to vector<1x32xf32>
    %c0_75 = arith.constant 0 : index
    %c0_76 = arith.constant 0 : index
    %c0_77 = arith.constant 0 : index
    %196 = vector.load %arg15[%c0_75, %c0_76, %c0_77] : memref<2x1x32xf32, #tpu.memory_space<vmem>>, vector<1x1x32xf32>
    %197 = vector.shape_cast %196 : vector<1x1x32xf32> to vector<1x32xf32>
    %cst_78 = arith.constant dense<0.000000e+00> : vector<16xf32>
    %198 = vector.multi_reduction <add>, %193, %cst_78 [1] : vector<16x32xf32> to vector<16xf32>
    %199 = vector.shape_cast %198 : vector<16xf32> to vector<16x1xf32>
    %cst_79 = arith.constant 3.200000e+01 : f32
    %200 = vector.broadcast %cst_79 : f32 to vector<16x1xf32>
    %201 = arith.divf %199, %200 : vector<16x1xf32>
    %202 = vector.broadcast %201 : vector<16x1xf32> to vector<16x32xf32>
    %203 = arith.subf %193, %202 : vector<16x32xf32>
    %204 = arith.mulf %203, %203 : vector<16x32xf32>
    %cst_80 = arith.constant dense<0.000000e+00> : vector<16xf32>
    %205 = vector.multi_reduction <add>, %204, %cst_80 [1] : vector<16x32xf32> to vector<16xf32>
    %206 = vector.shape_cast %205 : vector<16xf32> to vector<16x1xf32>
    %cst_81 = arith.constant 3.200000e+01 : f32
    %207 = vector.broadcast %cst_81 : f32 to vector<16x1xf32>
    %208 = arith.divf %206, %207 : vector<16x1xf32>
    %209 = vector.broadcast %201 : vector<16x1xf32> to vector<16x32xf32>
    %210 = arith.subf %193, %209 : vector<16x32xf32>
    %cst_82 = arith.constant 9.99999974E-6 : f32
    %211 = vector.broadcast %cst_82 : f32 to vector<16x1xf32>
    %212 = arith.addf %208, %211 : vector<16x1xf32>
    %213 = math.rsqrt %212 : vector<16x1xf32>
    %214 = vector.broadcast %213 : vector<16x1xf32> to vector<16x32xf32>
    %215 = arith.mulf %210, %214 : vector<16x32xf32>
    %216 = vector.broadcast %195 : vector<1x32xf32> to vector<16x32xf32>
    %217 = arith.mulf %215, %216 : vector<16x32xf32>
    %218 = vector.broadcast %197 : vector<1x32xf32> to vector<16x32xf32>
    %219 = arith.addf %217, %218 : vector<16x32xf32>
    %c0_83 = arith.constant 0 : index
    %c0_84 = arith.constant 0 : index
    %c0_85 = arith.constant 0 : index
    %220 = vector.load %arg16[%c0_83, %c0_84, %c0_85] : memref<2x32x128xbf16, #tpu.memory_space<vmem>>, vector<1x32x128xbf16>
    %221 = vector.shape_cast %220 : vector<1x32x128xbf16> to vector<32x128xbf16>
    %222 = arith.truncf %219 : vector<16x32xf32> to vector<16x32xbf16>
    %cst_86 = arith.constant dense<0.000000e+00> : vector<16x128xf32>
    %223 = tpu.matmul %222, %221, %cst_86 {dimension_numbers = #tpu.dot_dimension_numbers<[1], [0], [0], [1], [0, 0, 1, 1], [], []>} : vector<16x32xbf16>, vector<32x128xbf16>, vector<16x128xf32> -> vector<16x128xf32>
    %c0_87 = arith.constant 0 : index
    %c0_88 = arith.constant 0 : index
    %c0_89 = arith.constant 0 : index
    %224 = vector.load %arg17[%c0_87, %c0_88, %c0_89] : memref<2x1x128xf32, #tpu.memory_space<vmem>>, vector<1x1x128xf32>
    %225 = vector.shape_cast %224 : vector<1x1x128xf32> to vector<1x128xf32>
    %226 = vector.broadcast %225 : vector<1x128xf32> to vector<16x128xf32>
    %227 = arith.addf %223, %226 : vector<16x128xf32>
    %cst_90 = arith.constant 5.000000e-01 : f32
    %228 = vector.broadcast %cst_90 : f32 to vector<16x128xf32>
    %229 = arith.mulf %228, %227 : vector<16x128xf32>
    %cst_91 = arith.constant 0.707106769 : f32
    %230 = vector.broadcast %cst_91 : f32 to vector<16x128xf32>
    %231 = arith.mulf %227, %230 : vector<16x128xf32>
    %cst_92 = arith.constant 0.000000e+00 : f32
    %232 = vector.broadcast %cst_92 : f32 to vector<16x128xf32>
    %233 = arith.cmpf oge, %231, %232 : vector<16x128xf32>
    %cst_93 = arith.constant 1.000000e+00 : f32
    %cst_94 = arith.constant -1.000000e+00 : f32
    %234 = vector.broadcast %cst_93 : f32 to vector<16x128xf32>
    %235 = vector.broadcast %cst_94 : f32 to vector<16x128xf32>
    %236 = arith.select %233, %234, %235 : vector<16x128xi1>, vector<16x128xf32>
    %237 = math.absf %231 : vector<16x128xf32>
    %cst_95 = arith.constant 0.327591091 : f32
    %238 = vector.broadcast %cst_95 : f32 to vector<16x128xf32>
    %239 = arith.mulf %238, %237 : vector<16x128xf32>
    %cst_96 = arith.constant 1.000000e+00 : f32
    %240 = vector.broadcast %cst_96 : f32 to vector<16x128xf32>
    %241 = arith.addf %240, %239 : vector<16x128xf32>
    %cst_97 = arith.constant 1.000000e+00 : f32
    %242 = vector.broadcast %cst_97 : f32 to vector<16x128xf32>
    %243 = arith.divf %242, %241 : vector<16x128xf32>
    %cst_98 = arith.constant 1.06140542 : f32
    %244 = vector.broadcast %cst_98 : f32 to vector<16x128xf32>
    %245 = arith.mulf %244, %243 : vector<16x128xf32>
    %cst_99 = arith.constant -1.45315206 : f32
    %246 = vector.broadcast %cst_99 : f32 to vector<16x128xf32>
    %247 = arith.addf %245, %246 : vector<16x128xf32>
    %248 = arith.mulf %247, %243 : vector<16x128xf32>
    %cst_100 = arith.constant 1.42141378 : f32
    %249 = vector.broadcast %cst_100 : f32 to vector<16x128xf32>
    %250 = arith.addf %248, %249 : vector<16x128xf32>
    %251 = arith.mulf %250, %243 : vector<16x128xf32>
    %cst_101 = arith.constant -0.284496725 : f32
    %252 = vector.broadcast %cst_101 : f32 to vector<16x128xf32>
    %253 = arith.addf %251, %252 : vector<16x128xf32>
    %254 = arith.mulf %253, %243 : vector<16x128xf32>
    %cst_102 = arith.constant 0.254829586 : f32
    %255 = vector.broadcast %cst_102 : f32 to vector<16x128xf32>
    %256 = arith.addf %254, %255 : vector<16x128xf32>
    %257 = arith.mulf %256, %243 : vector<16x128xf32>
    %cst_103 = arith.constant 0.000000e+00 : f32
    %258 = vector.broadcast %cst_103 : f32 to vector<16x128xf32>
    %259 = arith.subf %258, %237 : vector<16x128xf32>
    %260 = arith.mulf %259, %237 : vector<16x128xf32>
    %261 = math.exp %260 : vector<16x128xf32>
    %262 = arith.mulf %257, %261 : vector<16x128xf32>
    %cst_104 = arith.constant 1.000000e+00 : f32
    %263 = vector.broadcast %cst_104 : f32 to vector<16x128xf32>
    %264 = arith.subf %263, %262 : vector<16x128xf32>
    %265 = arith.mulf %236, %264 : vector<16x128xf32>
    %cst_105 = arith.constant 1.000000e+00 : f32
    %266 = vector.broadcast %cst_105 : f32 to vector<16x128xf32>
    %267 = arith.addf %266, %265 : vector<16x128xf32>
    %268 = arith.mulf %229, %267 : vector<16x128xf32>
    %c0_106 = arith.constant 0 : index
    %c0_107 = arith.constant 0 : index
    %c0_108 = arith.constant 0 : index
    %269 = vector.load %arg18[%c0_106, %c0_107, %c0_108] : memref<2x128x256xbf16, #tpu.memory_space<vmem>>, vector<1x128x256xbf16>
    %270 = vector.shape_cast %269 : vector<1x128x256xbf16> to vector<128x256xbf16>
    %271 = arith.truncf %268 : vector<16x128xf32> to vector<16x128xbf16>
    %cst_109 = arith.constant dense<0.000000e+00> : vector<16x256xf32>
    %272 = tpu.matmul %271, %270, %cst_109 {dimension_numbers = #tpu.dot_dimension_numbers<[1], [0], [0], [1], [0, 0, 1, 1], [], []>} : vector<16x128xbf16>, vector<128x256xbf16>, vector<16x256xf32> -> vector<16x256xf32>
    %c0_110 = arith.constant 0 : index
    %c0_111 = arith.constant 0 : index
    %c0_112 = arith.constant 0 : index
    %273 = vector.load %arg19[%c0_110, %c0_111, %c0_112] : memref<2x1x256xf32, #tpu.memory_space<vmem>>, vector<1x1x256xf32>
    %274 = vector.shape_cast %273 : vector<1x1x256xf32> to vector<1x256xf32>
    %275 = vector.broadcast %274 : vector<1x256xf32> to vector<16x256xf32>
    %276 = arith.addf %272, %275 : vector<16x256xf32>
    %cst_113 = arith.constant 0.000000e+00 : f32
    %277 = vector.broadcast %cst_113 : f32 to vector<16x256xf32>
    %278 = arith.maximumf %276, %277 : vector<16x256xf32>
    %c0_114 = arith.constant 0 : index
    %c0_115 = arith.constant 0 : index
    %c0_116 = arith.constant 0 : index
    %279 = vector.load %arg20[%c0_114, %c0_115, %c0_116] : memref<2x256x256xbf16, #tpu.memory_space<vmem>>, vector<1x256x256xbf16>
    %280 = vector.shape_cast %279 : vector<1x256x256xbf16> to vector<256x256xbf16>
    %281 = arith.truncf %278 : vector<16x256xf32> to vector<16x256xbf16>
    %cst_117 = arith.constant dense<0.000000e+00> : vector<16x256xf32>
    %282 = tpu.matmul %281, %280, %cst_117 {dimension_numbers = #tpu.dot_dimension_numbers<[1], [0], [0], [1], [0, 0, 1, 1], [], []>} : vector<16x256xbf16>, vector<256x256xbf16>, vector<16x256xf32> -> vector<16x256xf32>
    %c0_118 = arith.constant 0 : index
    %c0_119 = arith.constant 0 : index
    %c0_120 = arith.constant 0 : index
    %283 = vector.load %arg21[%c0_118, %c0_119, %c0_120] : memref<2x1x256xf32, #tpu.memory_space<vmem>>, vector<1x1x256xf32>
    %284 = vector.shape_cast %283 : vector<1x1x256xf32> to vector<1x256xf32>
    %285 = vector.broadcast %284 : vector<1x256xf32> to vector<16x256xf32>
    %286 = arith.addf %282, %285 : vector<16x256xf32>
    %cst_121 = arith.constant 0.000000e+00 : f32
    %287 = vector.broadcast %cst_121 : f32 to vector<16x256xf32>
    %288 = arith.maximumf %286, %287 : vector<16x256xf32>
    %c0_122 = arith.constant 0 : index
    %c0_123 = arith.constant 0 : index
    %c0_124 = arith.constant 0 : index
    %289 = vector.load %arg22[%c0_122, %c0_123, %c0_124] : memref<2x256x256xbf16, #tpu.memory_space<vmem>>, vector<1x256x256xbf16>
    %290 = vector.shape_cast %289 : vector<1x256x256xbf16> to vector<256x256xbf16>
    %291 = arith.truncf %288 : vector<16x256xf32> to vector<16x256xbf16>
    %cst_125 = arith.constant dense<0.000000e+00> : vector<16x256xf32>
    %292 = tpu.matmul %291, %290, %cst_125 {dimension_numbers = #tpu.dot_dimension_numbers<[1], [0], [0], [1], [0, 0, 1, 1], [], []>} : vector<16x256xbf16>, vector<256x256xbf16>, vector<16x256xf32> -> vector<16x256xf32>
    %c0_126 = arith.constant 0 : index
    %c0_127 = arith.constant 0 : index
    %c0_128 = arith.constant 0 : index
    %293 = vector.load %arg23[%c0_126, %c0_127, %c0_128] : memref<2x1x256xf32, #tpu.memory_space<vmem>>, vector<1x1x256xf32>
    %294 = vector.shape_cast %293 : vector<1x1x256xf32> to vector<1x256xf32>
    %295 = vector.broadcast %294 : vector<1x256xf32> to vector<16x256xf32>
    %296 = arith.addf %292, %295 : vector<16x256xf32>
    %c0_129 = arith.constant 0 : index
    %c0_130 = arith.constant 0 : index
    %c0_131 = arith.constant 0 : index
    %297 = vector.load %arg24[%c0_129, %c0_130, %c0_131] : memref<2x256x32xbf16, #tpu.memory_space<vmem>>, vector<1x256x32xbf16>
    %298 = vector.shape_cast %297 : vector<1x256x32xbf16> to vector<256x32xbf16>
    %299 = arith.truncf %296 : vector<16x256xf32> to vector<16x256xbf16>
    %cst_132 = arith.constant dense<0.000000e+00> : vector<16x32xf32>
    %300 = tpu.matmul %299, %298, %cst_132 {dimension_numbers = #tpu.dot_dimension_numbers<[1], [0], [0], [1], [0, 0, 1, 1], [], []>} : vector<16x256xbf16>, vector<256x32xbf16>, vector<16x32xf32> -> vector<16x32xf32>
    %c0_133 = arith.constant 0 : index
    %c0_134 = arith.constant 0 : index
    %c0_135 = arith.constant 0 : index
    %301 = vector.load %arg25[%c0_133, %c0_134, %c0_135] : memref<2x1x32xf32, #tpu.memory_space<vmem>>, vector<1x1x32xf32>
    %302 = vector.shape_cast %301 : vector<1x1x32xf32> to vector<1x32xf32>
    %303 = vector.broadcast %302 : vector<1x32xf32> to vector<16x32xf32>
    %304 = arith.addf %300, %303 : vector<16x32xf32>
    %305 = arith.addf %193, %304 : vector<16x32xf32>
    %c1 = arith.constant 1 : index
    %c0_136 = arith.constant 0 : index
    %c0_137 = arith.constant 0 : index
    %306 = vector.load %arg4[%c1, %c0_136, %c0_137] : memref<2x1x32xf32, #tpu.memory_space<vmem>>, vector<1x1x32xf32>
    %307 = vector.shape_cast %306 : vector<1x1x32xf32> to vector<1x32xf32>
    %c1_138 = arith.constant 1 : index
    %c0_139 = arith.constant 0 : index
    %c0_140 = arith.constant 0 : index
    %308 = vector.load %arg5[%c1_138, %c0_139, %c0_140] : memref<2x1x32xf32, #tpu.memory_space<vmem>>, vector<1x1x32xf32>
    %309 = vector.shape_cast %308 : vector<1x1x32xf32> to vector<1x32xf32>
    %cst_141 = arith.constant dense<0.000000e+00> : vector<16xf32>
    %310 = vector.multi_reduction <add>, %305, %cst_141 [1] : vector<16x32xf32> to vector<16xf32>
    %311 = vector.shape_cast %310 : vector<16xf32> to vector<16x1xf32>
    %cst_142 = arith.constant 3.200000e+01 : f32
    %312 = vector.broadcast %cst_142 : f32 to vector<16x1xf32>
    %313 = arith.divf %311, %312 : vector<16x1xf32>
    %314 = vector.broadcast %313 : vector<16x1xf32> to vector<16x32xf32>
    %315 = arith.subf %305, %314 : vector<16x32xf32>
    %316 = arith.mulf %315, %315 : vector<16x32xf32>
    %cst_143 = arith.constant dense<0.000000e+00> : vector<16xf32>
    %317 = vector.multi_reduction <add>, %316, %cst_143 [1] : vector<16x32xf32> to vector<16xf32>
    %318 = vector.shape_cast %317 : vector<16xf32> to vector<16x1xf32>
    %cst_144 = arith.constant 3.200000e+01 : f32
    %319 = vector.broadcast %cst_144 : f32 to vector<16x1xf32>
    %320 = arith.divf %318, %319 : vector<16x1xf32>
    %321 = vector.broadcast %313 : vector<16x1xf32> to vector<16x32xf32>
    %322 = arith.subf %305, %321 : vector<16x32xf32>
    %cst_145 = arith.constant 9.99999974E-6 : f32
    %323 = vector.broadcast %cst_145 : f32 to vector<16x1xf32>
    %324 = arith.addf %320, %323 : vector<16x1xf32>
    %325 = math.rsqrt %324 : vector<16x1xf32>
    %326 = vector.broadcast %325 : vector<16x1xf32> to vector<16x32xf32>
    %327 = arith.mulf %322, %326 : vector<16x32xf32>
    %328 = vector.broadcast %307 : vector<1x32xf32> to vector<16x32xf32>
    %329 = arith.mulf %327, %328 : vector<16x32xf32>
    %330 = vector.broadcast %309 : vector<1x32xf32> to vector<16x32xf32>
    %331 = arith.addf %329, %330 : vector<16x32xf32>
    %c1_146 = arith.constant 1 : index
    %c0_147 = arith.constant 0 : index
    %c0_148 = arith.constant 0 : index
    %332 = vector.load %arg6[%c1_146, %c0_147, %c0_148] : memref<2x32x32xbf16, #tpu.memory_space<vmem>>, vector<1x32x32xbf16>
    %333 = vector.shape_cast %332 : vector<1x32x32xbf16> to vector<32x32xbf16>
    %334 = arith.truncf %331 : vector<16x32xf32> to vector<16x32xbf16>
    %cst_149 = arith.constant dense<0.000000e+00> : vector<16x32xf32>
    %335 = tpu.matmul %334, %333, %cst_149 {dimension_numbers = #tpu.dot_dimension_numbers<[1], [0], [0], [1], [0, 0, 1, 1], [], []>} : vector<16x32xbf16>, vector<32x32xbf16>, vector<16x32xf32> -> vector<16x32xf32>
    %c1_150 = arith.constant 1 : index
    %c0_151 = arith.constant 0 : index
    %c0_152 = arith.constant 0 : index
    %336 = vector.load %arg7[%c1_150, %c0_151, %c0_152] : memref<2x1x32xf32, #tpu.memory_space<vmem>>, vector<1x1x32xf32>
    %337 = vector.shape_cast %336 : vector<1x1x32xf32> to vector<1x32xf32>
    %338 = vector.broadcast %337 : vector<1x32xf32> to vector<16x32xf32>
    %339 = arith.addf %335, %338 : vector<16x32xf32>
    %cst_153 = arith.constant 0.353553385 : f32
    %340 = vector.broadcast %cst_153 : f32 to vector<16x32xf32>
    %341 = arith.mulf %339, %340 : vector<16x32xf32>
    %c1_154 = arith.constant 1 : index
    %c0_155 = arith.constant 0 : index
    %c0_156 = arith.constant 0 : index
    %342 = vector.load %arg8[%c1_154, %c0_155, %c0_156] : memref<2x32x32xbf16, #tpu.memory_space<vmem>>, vector<1x32x32xbf16>
    %343 = vector.shape_cast %342 : vector<1x32x32xbf16> to vector<32x32xbf16>
    %344 = arith.truncf %331 : vector<16x32xf32> to vector<16x32xbf16>
    %cst_157 = arith.constant dense<0.000000e+00> : vector<16x32xf32>
    %345 = tpu.matmul %344, %343, %cst_157 {dimension_numbers = #tpu.dot_dimension_numbers<[1], [0], [0], [1], [0, 0, 1, 1], [], []>} : vector<16x32xbf16>, vector<32x32xbf16>, vector<16x32xf32> -> vector<16x32xf32>
    %c1_158 = arith.constant 1 : index
    %c0_159 = arith.constant 0 : index
    %c0_160 = arith.constant 0 : index
    %346 = vector.load %arg9[%c1_158, %c0_159, %c0_160] : memref<2x1x32xf32, #tpu.memory_space<vmem>>, vector<1x1x32xf32>
    %347 = vector.shape_cast %346 : vector<1x1x32xf32> to vector<1x32xf32>
    %348 = vector.broadcast %347 : vector<1x32xf32> to vector<16x32xf32>
    %349 = arith.addf %345, %348 : vector<16x32xf32>
    %c1_161 = arith.constant 1 : index
    %c0_162 = arith.constant 0 : index
    %c0_163 = arith.constant 0 : index
    %350 = vector.load %arg10[%c1_161, %c0_162, %c0_163] : memref<2x32x32xbf16, #tpu.memory_space<vmem>>, vector<1x32x32xbf16>
    %351 = vector.shape_cast %350 : vector<1x32x32xbf16> to vector<32x32xbf16>
    %352 = arith.truncf %331 : vector<16x32xf32> to vector<16x32xbf16>
    %cst_164 = arith.constant dense<0.000000e+00> : vector<16x32xf32>
    %353 = tpu.matmul %352, %351, %cst_164 {dimension_numbers = #tpu.dot_dimension_numbers<[1], [0], [0], [1], [0, 0, 1, 1], [], []>} : vector<16x32xbf16>, vector<32x32xbf16>, vector<16x32xf32> -> vector<16x32xf32>
    %c1_165 = arith.constant 1 : index
    %c0_166 = arith.constant 0 : index
    %c0_167 = arith.constant 0 : index
    %354 = vector.load %arg11[%c1_165, %c0_166, %c0_167] : memref<2x1x32xf32, #tpu.memory_space<vmem>>, vector<1x1x32xf32>
    %355 = vector.shape_cast %354 : vector<1x1x32xf32> to vector<1x32xf32>
    %356 = vector.broadcast %355 : vector<1x32xf32> to vector<16x32xf32>
    %357 = arith.addf %353, %356 : vector<16x32xf32>
    %358 = arith.truncf %349 : vector<16x32xf32> to vector<16x32xbf16>
    %cst_168 = arith.constant 0.000000e+00 : f32
    %359 = vector.broadcast %cst_168 : f32 to vector<16x32xf32>
    %360 = vector.broadcast %21 : vector<1x32xf32> to vector<16x32xf32>
    %361 = arith.mulf %341, %360 : vector<16x32xf32>
    %362 = arith.truncf %361 : vector<16x32xf32> to vector<16x32xbf16>
    %cst_169 = arith.constant dense<0.000000e+00> : vector<16x16xf32>
    %363 = tpu.matmul %362, %358, %cst_169 {dimension_numbers = #tpu.dot_dimension_numbers<[1], [1], [0], [0], [0, 0, 1, 0], [], []>} : vector<16x32xbf16>, vector<16x32xbf16>, vector<16x16xf32> -> vector<16x16xf32>
    %cst_170 = arith.constant -1.000000e+30 : f32
    %364 = vector.broadcast %cst_170 : f32 to vector<16x16xf32>
    %365 = arith.select %13, %363, %364 : vector<16x16xi1>, vector<16x16xf32>
    %cst_171 = arith.constant dense<0xFF800000> : vector<16xf32>
    %366 = vector.multi_reduction <maximumf>, %365, %cst_171 [1] : vector<16x16xf32> to vector<16xf32>
    %367 = vector.shape_cast %366 : vector<16xf32> to vector<16x1xf32>
    %368 = vector.broadcast %367 : vector<16x1xf32> to vector<16x16xf32>
    %369 = arith.subf %365, %368 : vector<16x16xf32>
    %370 = math.exp %369 : vector<16x16xf32>
    %cst_172 = arith.constant dense<0.000000e+00> : vector<16xf32>
    %371 = vector.multi_reduction <add>, %370, %cst_172 [1] : vector<16x16xf32> to vector<16xf32>
    %372 = vector.shape_cast %371 : vector<16xf32> to vector<16x1xf32>
    %373 = tpu.reciprocal %372 {approx = true} : vector<16x1xf32> -> vector<16x1xf32>
    %374 = vector.broadcast %373 : vector<16x1xf32> to vector<16x16xf32>
    %375 = arith.mulf %370, %374 : vector<16x16xf32>
    %376 = vector.broadcast %21 : vector<1x32xf32> to vector<16x32xf32>
    %377 = arith.mulf %357, %376 : vector<16x32xf32>
    %378 = arith.truncf %377 : vector<16x32xf32> to vector<16x32xbf16>
    %379 = arith.truncf %375 : vector<16x16xf32> to vector<16x16xbf16>
    %cst_173 = arith.constant dense<0.000000e+00> : vector<16x32xf32>
    %380 = tpu.matmul %379, %378, %cst_173 {dimension_numbers = #tpu.dot_dimension_numbers<[1], [0], [0], [1], [0, 0, 1, 1], [], []>} : vector<16x16xbf16>, vector<16x32xbf16>, vector<16x32xf32> -> vector<16x32xf32>
    %381 = arith.addf %359, %380 : vector<16x32xf32>
    %382 = vector.broadcast %28 : vector<1x32xf32> to vector<16x32xf32>
    %383 = arith.mulf %341, %382 : vector<16x32xf32>
    %384 = arith.truncf %383 : vector<16x32xf32> to vector<16x32xbf16>
    %cst_174 = arith.constant dense<0.000000e+00> : vector<16x16xf32>
    %385 = tpu.matmul %384, %358, %cst_174 {dimension_numbers = #tpu.dot_dimension_numbers<[1], [1], [0], [0], [0, 0, 1, 0], [], []>} : vector<16x32xbf16>, vector<16x32xbf16>, vector<16x16xf32> -> vector<16x16xf32>
    %cst_175 = arith.constant -1.000000e+30 : f32
    %386 = vector.broadcast %cst_175 : f32 to vector<16x16xf32>
    %387 = arith.select %13, %385, %386 : vector<16x16xi1>, vector<16x16xf32>
    %cst_176 = arith.constant dense<0xFF800000> : vector<16xf32>
    %388 = vector.multi_reduction <maximumf>, %387, %cst_176 [1] : vector<16x16xf32> to vector<16xf32>
    %389 = vector.shape_cast %388 : vector<16xf32> to vector<16x1xf32>
    %390 = vector.broadcast %389 : vector<16x1xf32> to vector<16x16xf32>
    %391 = arith.subf %387, %390 : vector<16x16xf32>
    %392 = math.exp %391 : vector<16x16xf32>
    %cst_177 = arith.constant dense<0.000000e+00> : vector<16xf32>
    %393 = vector.multi_reduction <add>, %392, %cst_177 [1] : vector<16x16xf32> to vector<16xf32>
    %394 = vector.shape_cast %393 : vector<16xf32> to vector<16x1xf32>
    %395 = tpu.reciprocal %394 {approx = true} : vector<16x1xf32> -> vector<16x1xf32>
    %396 = vector.broadcast %395 : vector<16x1xf32> to vector<16x16xf32>
    %397 = arith.mulf %392, %396 : vector<16x16xf32>
    %398 = vector.broadcast %28 : vector<1x32xf32> to vector<16x32xf32>
    %399 = arith.mulf %357, %398 : vector<16x32xf32>
    %400 = arith.truncf %399 : vector<16x32xf32> to vector<16x32xbf16>
    %401 = arith.truncf %397 : vector<16x16xf32> to vector<16x16xbf16>
    %cst_178 = arith.constant dense<0.000000e+00> : vector<16x32xf32>
    %402 = tpu.matmul %401, %400, %cst_178 {dimension_numbers = #tpu.dot_dimension_numbers<[1], [0], [0], [1], [0, 0, 1, 1], [], []>} : vector<16x16xbf16>, vector<16x32xbf16>, vector<16x32xf32> -> vector<16x32xf32>
    %403 = arith.addf %381, %402 : vector<16x32xf32>
    %404 = vector.broadcast %35 : vector<1x32xf32> to vector<16x32xf32>
    %405 = arith.mulf %341, %404 : vector<16x32xf32>
    %406 = arith.truncf %405 : vector<16x32xf32> to vector<16x32xbf16>
    %cst_179 = arith.constant dense<0.000000e+00> : vector<16x16xf32>
    %407 = tpu.matmul %406, %358, %cst_179 {dimension_numbers = #tpu.dot_dimension_numbers<[1], [1], [0], [0], [0, 0, 1, 0], [], []>} : vector<16x32xbf16>, vector<16x32xbf16>, vector<16x16xf32> -> vector<16x16xf32>
    %cst_180 = arith.constant -1.000000e+30 : f32
    %408 = vector.broadcast %cst_180 : f32 to vector<16x16xf32>
    %409 = arith.select %13, %407, %408 : vector<16x16xi1>, vector<16x16xf32>
    %cst_181 = arith.constant dense<0xFF800000> : vector<16xf32>
    %410 = vector.multi_reduction <maximumf>, %409, %cst_181 [1] : vector<16x16xf32> to vector<16xf32>
    %411 = vector.shape_cast %410 : vector<16xf32> to vector<16x1xf32>
    %412 = vector.broadcast %411 : vector<16x1xf32> to vector<16x16xf32>
    %413 = arith.subf %409, %412 : vector<16x16xf32>
    %414 = math.exp %413 : vector<16x16xf32>
    %cst_182 = arith.constant dense<0.000000e+00> : vector<16xf32>
    %415 = vector.multi_reduction <add>, %414, %cst_182 [1] : vector<16x16xf32> to vector<16xf32>
    %416 = vector.shape_cast %415 : vector<16xf32> to vector<16x1xf32>
    %417 = tpu.reciprocal %416 {approx = true} : vector<16x1xf32> -> vector<16x1xf32>
    %418 = vector.broadcast %417 : vector<16x1xf32> to vector<16x16xf32>
    %419 = arith.mulf %414, %418 : vector<16x16xf32>
    %420 = vector.broadcast %35 : vector<1x32xf32> to vector<16x32xf32>
    %421 = arith.mulf %357, %420 : vector<16x32xf32>
    %422 = arith.truncf %421 : vector<16x32xf32> to vector<16x32xbf16>
    %423 = arith.truncf %419 : vector<16x16xf32> to vector<16x16xbf16>
    %cst_183 = arith.constant dense<0.000000e+00> : vector<16x32xf32>
    %424 = tpu.matmul %423, %422, %cst_183 {dimension_numbers = #tpu.dot_dimension_numbers<[1], [0], [0], [1], [0, 0, 1, 1], [], []>} : vector<16x16xbf16>, vector<16x32xbf16>, vector<16x32xf32> -> vector<16x32xf32>
    %425 = arith.addf %403, %424 : vector<16x32xf32>
    %426 = vector.broadcast %42 : vector<1x32xf32> to vector<16x32xf32>
    %427 = arith.mulf %341, %426 : vector<16x32xf32>
    %428 = arith.truncf %427 : vector<16x32xf32> to vector<16x32xbf16>
    %cst_184 = arith.constant dense<0.000000e+00> : vector<16x16xf32>
    %429 = tpu.matmul %428, %358, %cst_184 {dimension_numbers = #tpu.dot_dimension_numbers<[1], [1], [0], [0], [0, 0, 1, 0], [], []>} : vector<16x32xbf16>, vector<16x32xbf16>, vector<16x16xf32> -> vector<16x16xf32>
    %cst_185 = arith.constant -1.000000e+30 : f32
    %430 = vector.broadcast %cst_185 : f32 to vector<16x16xf32>
    %431 = arith.select %13, %429, %430 : vector<16x16xi1>, vector<16x16xf32>
    %cst_186 = arith.constant dense<0xFF800000> : vector<16xf32>
    %432 = vector.multi_reduction <maximumf>, %431, %cst_186 [1] : vector<16x16xf32> to vector<16xf32>
    %433 = vector.shape_cast %432 : vector<16xf32> to vector<16x1xf32>
    %434 = vector.broadcast %433 : vector<16x1xf32> to vector<16x16xf32>
    %435 = arith.subf %431, %434 : vector<16x16xf32>
    %436 = math.exp %435 : vector<16x16xf32>
    %cst_187 = arith.constant dense<0.000000e+00> : vector<16xf32>
    %437 = vector.multi_reduction <add>, %436, %cst_187 [1] : vector<16x16xf32> to vector<16xf32>
    %438 = vector.shape_cast %437 : vector<16xf32> to vector<16x1xf32>
    %439 = tpu.reciprocal %438 {approx = true} : vector<16x1xf32> -> vector<16x1xf32>
    %440 = vector.broadcast %439 : vector<16x1xf32> to vector<16x16xf32>
    %441 = arith.mulf %436, %440 : vector<16x16xf32>
    %442 = vector.broadcast %42 : vector<1x32xf32> to vector<16x32xf32>
    %443 = arith.mulf %357, %442 : vector<16x32xf32>
    %444 = arith.truncf %443 : vector<16x32xf32> to vector<16x32xbf16>
    %445 = arith.truncf %441 : vector<16x16xf32> to vector<16x16xbf16>
    %cst_188 = arith.constant dense<0.000000e+00> : vector<16x32xf32>
    %446 = tpu.matmul %445, %444, %cst_188 {dimension_numbers = #tpu.dot_dimension_numbers<[1], [0], [0], [1], [0, 0, 1, 1], [], []>} : vector<16x16xbf16>, vector<16x32xbf16>, vector<16x32xf32> -> vector<16x32xf32>
    %447 = arith.addf %425, %446 : vector<16x32xf32>
    %c1_189 = arith.constant 1 : index
    %c0_190 = arith.constant 0 : index
    %c0_191 = arith.constant 0 : index
    %448 = vector.load %arg12[%c1_189, %c0_190, %c0_191] : memref<2x32x32xbf16, #tpu.memory_space<vmem>>, vector<1x32x32xbf16>
    %449 = vector.shape_cast %448 : vector<1x32x32xbf16> to vector<32x32xbf16>
    %450 = arith.truncf %447 : vector<16x32xf32> to vector<16x32xbf16>
    %cst_192 = arith.constant dense<0.000000e+00> : vector<16x32xf32>
    %451 = tpu.matmul %450, %449, %cst_192 {dimension_numbers = #tpu.dot_dimension_numbers<[1], [0], [0], [1], [0, 0, 1, 1], [], []>} : vector<16x32xbf16>, vector<32x32xbf16>, vector<16x32xf32> -> vector<16x32xf32>
    %c1_193 = arith.constant 1 : index
    %c0_194 = arith.constant 0 : index
    %c0_195 = arith.constant 0 : index
    %452 = vector.load %arg13[%c1_193, %c0_194, %c0_195] : memref<2x1x32xf32, #tpu.memory_space<vmem>>, vector<1x1x32xf32>
    %453 = vector.shape_cast %452 : vector<1x1x32xf32> to vector<1x32xf32>
    %454 = vector.broadcast %453 : vector<1x32xf32> to vector<16x32xf32>
    %455 = arith.addf %451, %454 : vector<16x32xf32>
    %456 = arith.addf %305, %455 : vector<16x32xf32>
    %c1_196 = arith.constant 1 : index
    %c0_197 = arith.constant 0 : index
    %c0_198 = arith.constant 0 : index
    %457 = vector.load %arg14[%c1_196, %c0_197, %c0_198] : memref<2x1x32xf32, #tpu.memory_space<vmem>>, vector<1x1x32xf32>
    %458 = vector.shape_cast %457 : vector<1x1x32xf32> to vector<1x32xf32>
    %c1_199 = arith.constant 1 : index
    %c0_200 = arith.constant 0 : index
    %c0_201 = arith.constant 0 : index
    %459 = vector.load %arg15[%c1_199, %c0_200, %c0_201] : memref<2x1x32xf32, #tpu.memory_space<vmem>>, vector<1x1x32xf32>
    %460 = vector.shape_cast %459 : vector<1x1x32xf32> to vector<1x32xf32>
    %cst_202 = arith.constant dense<0.000000e+00> : vector<16xf32>
    %461 = vector.multi_reduction <add>, %456, %cst_202 [1] : vector<16x32xf32> to vector<16xf32>
    %462 = vector.shape_cast %461 : vector<16xf32> to vector<16x1xf32>
    %cst_203 = arith.constant 3.200000e+01 : f32
    %463 = vector.broadcast %cst_203 : f32 to vector<16x1xf32>
    %464 = arith.divf %462, %463 : vector<16x1xf32>
    %465 = vector.broadcast %464 : vector<16x1xf32> to vector<16x32xf32>
    %466 = arith.subf %456, %465 : vector<16x32xf32>
    %467 = arith.mulf %466, %466 : vector<16x32xf32>
    %cst_204 = arith.constant dense<0.000000e+00> : vector<16xf32>
    %468 = vector.multi_reduction <add>, %467, %cst_204 [1] : vector<16x32xf32> to vector<16xf32>
    %469 = vector.shape_cast %468 : vector<16xf32> to vector<16x1xf32>
    %cst_205 = arith.constant 3.200000e+01 : f32
    %470 = vector.broadcast %cst_205 : f32 to vector<16x1xf32>
    %471 = arith.divf %469, %470 : vector<16x1xf32>
    %472 = vector.broadcast %464 : vector<16x1xf32> to vector<16x32xf32>
    %473 = arith.subf %456, %472 : vector<16x32xf32>
    %cst_206 = arith.constant 9.99999974E-6 : f32
    %474 = vector.broadcast %cst_206 : f32 to vector<16x1xf32>
    %475 = arith.addf %471, %474 : vector<16x1xf32>
    %476 = math.rsqrt %475 : vector<16x1xf32>
    %477 = vector.broadcast %476 : vector<16x1xf32> to vector<16x32xf32>
    %478 = arith.mulf %473, %477 : vector<16x32xf32>
    %479 = vector.broadcast %458 : vector<1x32xf32> to vector<16x32xf32>
    %480 = arith.mulf %478, %479 : vector<16x32xf32>
    %481 = vector.broadcast %460 : vector<1x32xf32> to vector<16x32xf32>
    %482 = arith.addf %480, %481 : vector<16x32xf32>
    %c1_207 = arith.constant 1 : index
    %c0_208 = arith.constant 0 : index
    %c0_209 = arith.constant 0 : index
    %483 = vector.load %arg16[%c1_207, %c0_208, %c0_209] : memref<2x32x128xbf16, #tpu.memory_space<vmem>>, vector<1x32x128xbf16>
    %484 = vector.shape_cast %483 : vector<1x32x128xbf16> to vector<32x128xbf16>
    %485 = arith.truncf %482 : vector<16x32xf32> to vector<16x32xbf16>
    %cst_210 = arith.constant dense<0.000000e+00> : vector<16x128xf32>
    %486 = tpu.matmul %485, %484, %cst_210 {dimension_numbers = #tpu.dot_dimension_numbers<[1], [0], [0], [1], [0, 0, 1, 1], [], []>} : vector<16x32xbf16>, vector<32x128xbf16>, vector<16x128xf32> -> vector<16x128xf32>
    %c1_211 = arith.constant 1 : index
    %c0_212 = arith.constant 0 : index
    %c0_213 = arith.constant 0 : index
    %487 = vector.load %arg17[%c1_211, %c0_212, %c0_213] : memref<2x1x128xf32, #tpu.memory_space<vmem>>, vector<1x1x128xf32>
    %488 = vector.shape_cast %487 : vector<1x1x128xf32> to vector<1x128xf32>
    %489 = vector.broadcast %488 : vector<1x128xf32> to vector<16x128xf32>
    %490 = arith.addf %486, %489 : vector<16x128xf32>
    %cst_214 = arith.constant 5.000000e-01 : f32
    %491 = vector.broadcast %cst_214 : f32 to vector<16x128xf32>
    %492 = arith.mulf %491, %490 : vector<16x128xf32>
    %cst_215 = arith.constant 0.707106769 : f32
    %493 = vector.broadcast %cst_215 : f32 to vector<16x128xf32>
    %494 = arith.mulf %490, %493 : vector<16x128xf32>
    %cst_216 = arith.constant 0.000000e+00 : f32
    %495 = vector.broadcast %cst_216 : f32 to vector<16x128xf32>
    %496 = arith.cmpf oge, %494, %495 : vector<16x128xf32>
    %cst_217 = arith.constant 1.000000e+00 : f32
    %cst_218 = arith.constant -1.000000e+00 : f32
    %497 = vector.broadcast %cst_217 : f32 to vector<16x128xf32>
    %498 = vector.broadcast %cst_218 : f32 to vector<16x128xf32>
    %499 = arith.select %496, %497, %498 : vector<16x128xi1>, vector<16x128xf32>
    %500 = math.absf %494 : vector<16x128xf32>
    %cst_219 = arith.constant 0.327591091 : f32
    %501 = vector.broadcast %cst_219 : f32 to vector<16x128xf32>
    %502 = arith.mulf %501, %500 : vector<16x128xf32>
    %cst_220 = arith.constant 1.000000e+00 : f32
    %503 = vector.broadcast %cst_220 : f32 to vector<16x128xf32>
    %504 = arith.addf %503, %502 : vector<16x128xf32>
    %cst_221 = arith.constant 1.000000e+00 : f32
    %505 = vector.broadcast %cst_221 : f32 to vector<16x128xf32>
    %506 = arith.divf %505, %504 : vector<16x128xf32>
    %cst_222 = arith.constant 1.06140542 : f32
    %507 = vector.broadcast %cst_222 : f32 to vector<16x128xf32>
    %508 = arith.mulf %507, %506 : vector<16x128xf32>
    %cst_223 = arith.constant -1.45315206 : f32
    %509 = vector.broadcast %cst_223 : f32 to vector<16x128xf32>
    %510 = arith.addf %508, %509 : vector<16x128xf32>
    %511 = arith.mulf %510, %506 : vector<16x128xf32>
    %cst_224 = arith.constant 1.42141378 : f32
    %512 = vector.broadcast %cst_224 : f32 to vector<16x128xf32>
    %513 = arith.addf %511, %512 : vector<16x128xf32>
    %514 = arith.mulf %513, %506 : vector<16x128xf32>
    %cst_225 = arith.constant -0.284496725 : f32
    %515 = vector.broadcast %cst_225 : f32 to vector<16x128xf32>
    %516 = arith.addf %514, %515 : vector<16x128xf32>
    %517 = arith.mulf %516, %506 : vector<16x128xf32>
    %cst_226 = arith.constant 0.254829586 : f32
    %518 = vector.broadcast %cst_226 : f32 to vector<16x128xf32>
    %519 = arith.addf %517, %518 : vector<16x128xf32>
    %520 = arith.mulf %519, %506 : vector<16x128xf32>
    %cst_227 = arith.constant 0.000000e+00 : f32
    %521 = vector.broadcast %cst_227 : f32 to vector<16x128xf32>
    %522 = arith.subf %521, %500 : vector<16x128xf32>
    %523 = arith.mulf %522, %500 : vector<16x128xf32>
    %524 = math.exp %523 : vector<16x128xf32>
    %525 = arith.mulf %520, %524 : vector<16x128xf32>
    %cst_228 = arith.constant 1.000000e+00 : f32
    %526 = vector.broadcast %cst_228 : f32 to vector<16x128xf32>
    %527 = arith.subf %526, %525 : vector<16x128xf32>
    %528 = arith.mulf %499, %527 : vector<16x128xf32>
    %cst_229 = arith.constant 1.000000e+00 : f32
    %529 = vector.broadcast %cst_229 : f32 to vector<16x128xf32>
    %530 = arith.addf %529, %528 : vector<16x128xf32>
    %531 = arith.mulf %492, %530 : vector<16x128xf32>
    %c1_230 = arith.constant 1 : index
    %c0_231 = arith.constant 0 : index
    %c0_232 = arith.constant 0 : index
    %532 = vector.load %arg18[%c1_230, %c0_231, %c0_232] : memref<2x128x256xbf16, #tpu.memory_space<vmem>>, vector<1x128x256xbf16>
    %533 = vector.shape_cast %532 : vector<1x128x256xbf16> to vector<128x256xbf16>
    %534 = arith.truncf %531 : vector<16x128xf32> to vector<16x128xbf16>
    %cst_233 = arith.constant dense<0.000000e+00> : vector<16x256xf32>
    %535 = tpu.matmul %534, %533, %cst_233 {dimension_numbers = #tpu.dot_dimension_numbers<[1], [0], [0], [1], [0, 0, 1, 1], [], []>} : vector<16x128xbf16>, vector<128x256xbf16>, vector<16x256xf32> -> vector<16x256xf32>
    %c1_234 = arith.constant 1 : index
    %c0_235 = arith.constant 0 : index
    %c0_236 = arith.constant 0 : index
    %536 = vector.load %arg19[%c1_234, %c0_235, %c0_236] : memref<2x1x256xf32, #tpu.memory_space<vmem>>, vector<1x1x256xf32>
    %537 = vector.shape_cast %536 : vector<1x1x256xf32> to vector<1x256xf32>
    %538 = vector.broadcast %537 : vector<1x256xf32> to vector<16x256xf32>
    %539 = arith.addf %535, %538 : vector<16x256xf32>
    %cst_237 = arith.constant 0.000000e+00 : f32
    %540 = vector.broadcast %cst_237 : f32 to vector<16x256xf32>
    %541 = arith.maximumf %539, %540 : vector<16x256xf32>
    %c1_238 = arith.constant 1 : index
    %c0_239 = arith.constant 0 : index
    %c0_240 = arith.constant 0 : index
    %542 = vector.load %arg20[%c1_238, %c0_239, %c0_240] : memref<2x256x256xbf16, #tpu.memory_space<vmem>>, vector<1x256x256xbf16>
    %543 = vector.shape_cast %542 : vector<1x256x256xbf16> to vector<256x256xbf16>
    %544 = arith.truncf %541 : vector<16x256xf32> to vector<16x256xbf16>
    %cst_241 = arith.constant dense<0.000000e+00> : vector<16x256xf32>
    %545 = tpu.matmul %544, %543, %cst_241 {dimension_numbers = #tpu.dot_dimension_numbers<[1], [0], [0], [1], [0, 0, 1, 1], [], []>} : vector<16x256xbf16>, vector<256x256xbf16>, vector<16x256xf32> -> vector<16x256xf32>
    %c1_242 = arith.constant 1 : index
    %c0_243 = arith.constant 0 : index
    %c0_244 = arith.constant 0 : index
    %546 = vector.load %arg21[%c1_242, %c0_243, %c0_244] : memref<2x1x256xf32, #tpu.memory_space<vmem>>, vector<1x1x256xf32>
    %547 = vector.shape_cast %546 : vector<1x1x256xf32> to vector<1x256xf32>
    %548 = vector.broadcast %547 : vector<1x256xf32> to vector<16x256xf32>
    %549 = arith.addf %545, %548 : vector<16x256xf32>
    %cst_245 = arith.constant 0.000000e+00 : f32
    %550 = vector.broadcast %cst_245 : f32 to vector<16x256xf32>
    %551 = arith.maximumf %549, %550 : vector<16x256xf32>
    %c1_246 = arith.constant 1 : index
    %c0_247 = arith.constant 0 : index
    %c0_248 = arith.constant 0 : index
    %552 = vector.load %arg22[%c1_246, %c0_247, %c0_248] : memref<2x256x256xbf16, #tpu.memory_space<vmem>>, vector<1x256x256xbf16>
    %553 = vector.shape_cast %552 : vector<1x256x256xbf16> to vector<256x256xbf16>
    %554 = arith.truncf %551 : vector<16x256xf32> to vector<16x256xbf16>
    %cst_249 = arith.constant dense<0.000000e+00> : vector<16x256xf32>
    %555 = tpu.matmul %554, %553, %cst_249 {dimension_numbers = #tpu.dot_dimension_numbers<[1], [0], [0], [1], [0, 0, 1, 1], [], []>} : vector<16x256xbf16>, vector<256x256xbf16>, vector<16x256xf32> -> vector<16x256xf32>
    %c1_250 = arith.constant 1 : index
    %c0_251 = arith.constant 0 : index
    %c0_252 = arith.constant 0 : index
    %556 = vector.load %arg23[%c1_250, %c0_251, %c0_252] : memref<2x1x256xf32, #tpu.memory_space<vmem>>, vector<1x1x256xf32>
    %557 = vector.shape_cast %556 : vector<1x1x256xf32> to vector<1x256xf32>
    %558 = vector.broadcast %557 : vector<1x256xf32> to vector<16x256xf32>
    %559 = arith.addf %555, %558 : vector<16x256xf32>
    %c1_253 = arith.constant 1 : index
    %c0_254 = arith.constant 0 : index
    %c0_255 = arith.constant 0 : index
    %560 = vector.load %arg24[%c1_253, %c0_254, %c0_255] : memref<2x256x32xbf16, #tpu.memory_space<vmem>>, vector<1x256x32xbf16>
    %561 = vector.shape_cast %560 : vector<1x256x32xbf16> to vector<256x32xbf16>
    %562 = arith.truncf %559 : vector<16x256xf32> to vector<16x256xbf16>
    %cst_256 = arith.constant dense<0.000000e+00> : vector<16x32xf32>
    %563 = tpu.matmul %562, %561, %cst_256 {dimension_numbers = #tpu.dot_dimension_numbers<[1], [0], [0], [1], [0, 0, 1, 1], [], []>} : vector<16x256xbf16>, vector<256x32xbf16>, vector<16x32xf32> -> vector<16x32xf32>
    %c1_257 = arith.constant 1 : index
    %c0_258 = arith.constant 0 : index
    %c0_259 = arith.constant 0 : index
    %564 = vector.load %arg25[%c1_257, %c0_258, %c0_259] : memref<2x1x32xf32, #tpu.memory_space<vmem>>, vector<1x1x32xf32>
    %565 = vector.shape_cast %564 : vector<1x1x32xf32> to vector<1x32xf32>
    %566 = vector.broadcast %565 : vector<1x32xf32> to vector<16x32xf32>
    %567 = arith.addf %563, %566 : vector<16x32xf32>
    %568 = arith.addf %456, %567 : vector<16x32xf32>
    %c0_260 = arith.constant 0 : index
    %c0_261 = arith.constant 0 : index
    %569 = vector.load %arg26[%c0_260, %c0_261] : memref<1x32xf32, #tpu.memory_space<vmem>>, vector<1x32xf32>
    %c0_262 = arith.constant 0 : index
    %c0_263 = arith.constant 0 : index
    %570 = vector.load %arg27[%c0_262, %c0_263] : memref<1x32xf32, #tpu.memory_space<vmem>>, vector<1x32xf32>
    %cst_264 = arith.constant dense<0.000000e+00> : vector<16xf32>
    %571 = vector.multi_reduction <add>, %568, %cst_264 [1] : vector<16x32xf32> to vector<16xf32>
    %572 = vector.shape_cast %571 : vector<16xf32> to vector<16x1xf32>
    %cst_265 = arith.constant 3.200000e+01 : f32
    %573 = vector.broadcast %cst_265 : f32 to vector<16x1xf32>
    %574 = arith.divf %572, %573 : vector<16x1xf32>
    %575 = vector.broadcast %574 : vector<16x1xf32> to vector<16x32xf32>
    %576 = arith.subf %568, %575 : vector<16x32xf32>
    %577 = arith.mulf %576, %576 : vector<16x32xf32>
    %cst_266 = arith.constant dense<0.000000e+00> : vector<16xf32>
    %578 = vector.multi_reduction <add>, %577, %cst_266 [1] : vector<16x32xf32> to vector<16xf32>
    %579 = vector.shape_cast %578 : vector<16xf32> to vector<16x1xf32>
    %cst_267 = arith.constant 3.200000e+01 : f32
    %580 = vector.broadcast %cst_267 : f32 to vector<16x1xf32>
    %581 = arith.divf %579, %580 : vector<16x1xf32>
    %582 = vector.broadcast %574 : vector<16x1xf32> to vector<16x32xf32>
    %583 = arith.subf %568, %582 : vector<16x32xf32>
    %cst_268 = arith.constant 9.99999974E-6 : f32
    %584 = vector.broadcast %cst_268 : f32 to vector<16x1xf32>
    %585 = arith.addf %581, %584 : vector<16x1xf32>
    %586 = math.rsqrt %585 : vector<16x1xf32>
    %587 = vector.broadcast %586 : vector<16x1xf32> to vector<16x32xf32>
    %588 = arith.mulf %583, %587 : vector<16x32xf32>
    %589 = vector.broadcast %569 : vector<1x32xf32> to vector<16x32xf32>
    %590 = arith.mulf %588, %589 : vector<16x32xf32>
    %591 = vector.broadcast %570 : vector<1x32xf32> to vector<16x32xf32>
    %592 = arith.addf %590, %591 : vector<16x32xf32>
    %c0_269 = arith.constant 0 : index
    %c0_270 = arith.constant 0 : index
    %593 = vector.load %arg28[%c0_269, %c0_270] : memref<32x128xbf16, #tpu.memory_space<vmem>>, vector<32x128xbf16>
    %594 = arith.truncf %592 : vector<16x32xf32> to vector<16x32xbf16>
    %cst_271 = arith.constant dense<0.000000e+00> : vector<16x128xf32>
    %595 = tpu.matmul %594, %593, %cst_271 {dimension_numbers = #tpu.dot_dimension_numbers<[1], [0], [0], [1], [0, 0, 1, 1], [], []>} : vector<16x32xbf16>, vector<32x128xbf16>, vector<16x128xf32> -> vector<16x128xf32>
    %c0_272 = arith.constant 0 : index
    %c0_273 = arith.constant 0 : index
    %596 = vector.load %arg29[%c0_272, %c0_273] : memref<16x128xf32, #tpu.memory_space<vmem>>, vector<16x128xf32>
    tpu.vector_store %arg29[%c0_272, %c0_273], %595 {strides = array<i32>} : memref<16x128xf32, #tpu.memory_space<vmem>>, vector<16x128xf32>,
    return
  }
}

</mosaic_0001>

<bundles_post_ra>
// kernel: gpt_forward.1
= control target key start
LH: loop header
LB: loop body
LE: loop exit
PB: predicated region body
PF: predicated region fallthrough
CT: control target
= control target key end

     0   :  { %s5736_s6 = smov 1   ;;  %s5737_s10 = smov 2   ;;  %s6556_s0 = inlined_call_operand.smem [shape: u32[30], index: -1, kind: input, shape index: {}] }
   0x1   :  { %s5801_s5 = sld [smem:[%s6556_s0]]   ;;  %s5738_s14 = smov 3  }
   0x2   :  { %s5806_s9 = sld [smem:[%s6556_s0 + %s5736_s6]]   ;;  %s5739_s18 = smov 4  }
   0x3   :  { %s5811_s13 = sld [smem:[%s6556_s0 + %s5737_s10]]   ;;  %s5740_s22 = smov 5  }
   0x4   :  { %s5816_s17 = sld [smem:[%s6556_s0 + %s5738_s14]]   ;;  %s5741_s26 = smov 6  }
   0x5   :  { %s5821_s21 = sld [smem:[%s6556_s0 + %s5739_s18]]   ;;  %s5742_s30 = smov 7  }
   0x6   :  { %s5826_s25 = sld [smem:[%s6556_s0 + %s5740_s22]]   ;;  %s5743_s4 = smov 8  }
   0x7   :  { %6569 = sst [smem:[#allocation36_spill]] %s5801_s5  ;;  %s5744_s10 = smov 9  }
   0x8   :  { %6570 = sst [smem:[#allocation37_spill]] %s5806_s9  ;;  %s5745_s15 = smov 10  }
   0x9   :  { %6571 = sst [smem:[#allocation38_spill]] %s5811_s13  ;;  %s5746_s20 = smov 11  }
   0xa   :  { %6572 = sst [smem:[#allocation39_spill]] %s5816_s17  ;;  %s5748_s1 = smov 13  }
   0xb   :  { %s5831_s29 = sld [smem:[%s6556_s0 + %s5741_s26]]   ;;  %s5747_s26 = smov 12  }
   0xc   :  { %s5836_s3 = sld [smem:[%s6556_s0 + %s5742_s30]]   ;;  %s5749_s7 = smov 14  }
   0xd   :  { %s5841_s8 = sld [smem:[%s6556_s0 + %s5743_s4]]   ;;  %s5751_s22 = smov 16  }
   0xe   :  { %s5846_s14 = sld [smem:[%s6556_s0 + %s5744_s10]]   ;;  %s5752_s28 = smov 17  }
   0xf   :  { %s5851_s19 = sld [smem:[%s6556_s0 + %s5745_s15]]   ;;  %s5750_s15 = smov 15  }
  0x10   :  { %s5856_s24 = sld [smem:[%s6556_s0 + %s5746_s20]]  }
  0x11   :  { %6573 = sst [smem:[#allocation40_spill]] %s5831_s29 }
  0x12   :  { %s5861_s30 = sld [smem:[%s6556_s0 + %s5747_s26]]  }
  0x13   :  { %6574 = sst [smem:[#allocation41_spill]] %s5841_s8 }
  0x14   :  { %s5866_s6 = sld [smem:[%s6556_s0 + %s5748_s1]]  }
  0x15   :  { %6575 = sst [smem:[#allocation42_spill]] %s5851_s19 }
  0x16   :  { %s5871_s12 = sld [smem:[%s6556_s0 + %s5749_s7]]   ;;  %s5753_s7 = smov 18  }
  0x17   :  { %s5876_s20 = sld [smem:[%s6556_s0 + %s5750_s15]]   ;;  %s5754_s15 = smov 19  }
  0x18   :  { %6576 = sst [smem:[#allocation43_spill]] %s5861_s30 }
  0x19   :  { %s5881_s27 = sld [smem:[%s6556_s0 + %s5751_s22]]   ;;  %s5755_s22 = smov 20  }
  0x1a   :  { %s5886_s4 = sld [smem:[%s6556_s0 + %s5752_s28]]   ;;  %s5756_s28 = smov 21  }
  0x1b   :  { %s5891_s30 = sld [smem:[%s6556_s0 + %s5753_s7]]   ;;  %s5757_s7 = smov 22  }
  0x1c   :  { %s5896_s13 = sld [smem:[%s6556_s0 + %s5754_s15]]   ;;  %s5758_s15 = smov 23  }
  0x1d   :  { %s5906_s8 = sld [smem:[%s6556_s0 + %s5756_s28]]   ;;  %s5760_s28 = smov 25  }
  0x1e   :  { %s5916_s19 = sld [smem:[%s6556_s0 + %s5758_s15]]   ;;  %s5762_s15 = smov 27  }
  0x1f   :  { %6577 = sst [smem:[#allocation44_spill]] %s5881_s27 }
  0x20   :  { %s5901_s27 = sld [smem:[%s6556_s0 + %s5755_s22]]   ;;  %s5759_s22 = smov 24  }
  0x21   :  { %6578 = sst [smem:[#allocation45_spill]] %s5891_s30 }
  0x22   :  { %s5911_s30 = sld [smem:[%s6556_s0 + %s5757_s7]]   ;;  %s5761_s7 = smov 26  }
  0x23   :  { %s5921_s29 = sld [smem:[%s6556_s0 + %s5759_s22]]   ;;  %s5763_s22 = smov 28  }
  0x24   :  { %s5926_s9 = sld [smem:[%s6556_s0 + %s5760_s28]]   ;;  %s5764_s28 = smov 29  }
  0x25   :  { %s5931_s17 = sld [smem:[%s6556_s0 + %s5761_s7]]  }
  0x26   :  { %s5936_s5 = sld [smem:[%s6556_s0 + %s5762_s15]]  }
  0x29   :  { %6579 = sst [smem:[#allocation46_spill]] %s5921_s29 }
  0x2a   :  { %6580 = sst [smem:[#allocation47_spill]] %s5926_s9 }
  0x2b   :  { %s5941_s29 = sld [smem:[%s6556_s0 + %s5763_s22]]  }
  0x2c   :  { %s5946_s9 = sld [smem:[%s6556_s0 + %s5764_s28]]  }
  0x2d   :  { %64 = vsyncpa [#allocation3], 0 }
  0x2e   :  { %65 = vsyncpa [#allocation5], 0 }
  0x2f   :  { %66 = vsyncpa [#allocation8], 0 }
  0x30   :  { %67 = vsyncpa [#allocation11], 0 }
  0x31   :  { %68 = vsyncpa [#allocation14], 0 }
  0x32   :  { %69 = vsyncpa [#allocation17], 0 }
  0x33   :  { %70 = vsyncpa [#allocation20], 0 }
  0x34   :  { %71 = vsyncpa [#allocation23], 0 }
  0x35   :  { %72 = vsyncpa [#allocation26], 0  ;;  %s5765_s7 = smov [#allocation4]   ;;  %s5766_s11 = smov [#allocation7]  }
  0x36   :  { %s98_s10 = sshll.u32 %s5765_s7, 4  ;;  %s126_s15 = sshll.u32 %s5766_s11, 4  ;;  %s99_s10 = int_to_ptr.vmem [resolvable:$true] %s98_s10  ;;  %s5948_s15 = int_to_ptr.vmem [resolvable:$true] %s126_s15 }
  0x37   :  { %s5366_s0 = scalar_lea.hbm %s5826_s25, 32 }
  0x38   :  { %p5367_p0 = scmp.ne.s32.totalorder %s5826_s25, %s5366_s0  ;;  %p5370_p1 = scmp.lt.u32.totalorder %s5366_s0, %s5826_s25 }
  0x3a   :  { %p5372_p2 = pnand %p5370_p1, %p5367_p0 }
  0x3c   :  { %5375 = shalt.err (!%p5372_p2)
}
  0x3d   :  { %s5376_s16 = scalar_lea.vmem %s99_s10, 32  ;;  %p5381_p4 = scmp.lt.s32.totalorder %s99_s10, %s99_s10 }
  0x3e   :  { %p5377_p3 = scmp.ne.s32.totalorder %s99_s10, %s5376_s16  ;;  %p5382_p5 = scmp.lt.s32.totalorder %s5376_s16, %s5376_s16 }
  0x40   :  { %p5383_p6 = por %p5382_p5, %p5381_p4 }
  0x42   :  { %p5384_p7 = pnand %p5383_p6, %p5377_p3 }
  0x44   :  { %5387 = shalt.err (!%p5384_p7)
}
  0x45   :  { %s5767_s18 = smov 16   ;;  %s5768_s22 = smov 1  }
  0x46   :  { %104 = dma.hbm_to_vmem [thread:$0]  %s5826_s25, 32, %s99_s10, [#allocation5], %s5767_s18, %s5767_s18, %s5768_s22  }
  0x47   :  { %s5388_s23 = scalar_lea.hbm %s5846_s14, 32 }
  0x48   :  { %p5389_p8 = scmp.ne.s32.totalorder %s5846_s14, %s5388_s23  ;;  %p5392_p9 = scmp.lt.u32.totalorder %s5388_s23, %s5846_s14 }
  0x4a   :  { %p5394_p10 = pnand %p5392_p9, %p5389_p8 }
  0x4c   :  { %5397 = shalt.err (!%p5394_p10)
}
  0x4d   :  { %s5398_s26 = scalar_lea.vmem %s5948_s15, 32  ;;  %p5403_p12 = scmp.lt.s32.totalorder %s5948_s15, %s5948_s15 }
  0x4e   :  { %p5399_p11 = scmp.ne.s32.totalorder %s5948_s15, %s5398_s26  ;;  %p5404_p13 = scmp.lt.s32.totalorder %s5398_s26, %s5398_s26 }
  0x50   :  { %p5405_p0 = por %p5404_p13, %p5403_p12 }
  0x52   :  { %p5406_p1 = pnand %p5405_p0, %p5399_p11 }
  0x54   :  { %5409 = shalt.err (!%p5406_p1)
}
  0x55   :  { %132 = dma.hbm_to_vmem [thread:$0]  %s5846_s14, 32, %s5948_s15, [#allocation8], %s5767_s18, %s5767_s18, %s5768_s22  }
  0x56   :  { %s5769_s25 = smov [#allocation10]   ;;  %s5770_s1 = smov [#allocation13]  }
  0x57   :  { %s154_s28 = sshll.u32 %s5769_s25, 4  ;;  %s178_s2 = sshll.u32 %s5770_s1, 4  ;;  %s155_s28 = int_to_ptr.vmem [resolvable:$true] %s154_s28  ;;  %s5969_s2 = int_to_ptr.vmem [resolvable:$true] %s178_s2 }
  0x58   :  { %s5410_s7 = scalar_lea.hbm %s5866_s6, 32 }
  0x59   :  { %p5411_p2 = scmp.ne.s32.totalorder %s5866_s6, %s5410_s7  ;;  %p5414_p3 = scmp.lt.u32.totalorder %s5410_s7, %s5866_s6 }
  0x5b   :  { %p5416_p4 = pnand %p5414_p3, %p5411_p2 }
  0x5d   :  { %5419 = shalt.err (!%p5416_p4)
}
  0x5e   :  { %s5420_s10 = scalar_lea.vmem %s155_s28, 32  ;;  %p5425_p6 = scmp.lt.s32.totalorder %s155_s28, %s155_s28 }
  0x5f   :  { %p5421_p5 = scmp.ne.s32.totalorder %s155_s28, %s5420_s10  ;;  %p5426_p7 = scmp.lt.s32.totalorder %s5420_s10, %s5420_s10 }
  0x61   :  { %p5427_p8 = por %p5426_p7, %p5425_p6 }
  0x63   :  { %p5428_p9 = pnand %p5427_p8, %p5421_p5 }
  0x65   :  { %5431 = shalt.err (!%p5428_p9)
}
  0x66   :  { %160 = dma.hbm_to_vmem [thread:$0]  %s5866_s6, 32, %s155_s28, [#allocation11], %s5767_s18, %s5767_s18, %s5768_s22  }
  0x67   :  { %s5432_s14 = scalar_lea.hbm %s5876_s20, 32 }
  0x68   :  { %p5433_p10 = scmp.ne.s32.totalorder %s5876_s20, %s5432_s14  ;;  %p5436_p11 = scmp.lt.u32.totalorder %s5432_s14, %s5876_s20 }
  0x6a   :  { %p5438_p12 = pnand %p5436_p11, %p5433_p10 }
  0x6c   :  { %5441 = shalt.err (!%p5438_p12)
}
  0x6d   :  { %s5442_s11 = scalar_lea.vmem %s5969_s2, 32  ;;  %p5447_p0 = scmp.lt.s32.totalorder %s5969_s2, %s5969_s2 }
  0x6e   :  { %p5443_p13 = scmp.ne.s32.totalorder %s5969_s2, %s5442_s11  ;;  %p5448_p1 = scmp.lt.s32.totalorder %s5442_s11, %s5442_s11 }
  0x70   :  { %p5449_p2 = por %p5448_p1, %p5447_p0 }
  0x72   :  { %p5450_p3 = pnand %p5449_p2, %p5443_p13 }
  0x74   :  { %5453 = shalt.err (!%p5450_p3)
}
  0x75   :  { %184 = dma.hbm_to_vmem [thread:$0]  %s5876_s20, 32, %s5969_s2, [#allocation14], %s5767_s18, %s5767_s18, %s5768_s22  }
  0x76   :  { %s5771_s6 = smov [#allocation16]   ;;  %s5454_s0 = scalar_lea.hbm %s5896_s13, 64 }
  0x77   :  { %s206_s15 = sshll.u32 %s5771_s6, 4  ;;  %p5455_p4 = scmp.ne.s32.totalorder %s5896_s13, %s5454_s0  ;;  %s207_s15 = int_to_ptr.vmem [resolvable:$true] %s206_s15 }
  0x78   :  { %p5458_p5 = scmp.lt.u32.totalorder %s5454_s0, %s5896_s13 }
  0x7a   :  { %p5460_p6 = pnand %p5458_p5, %p5455_p4 }
  0x7c   :  { %5463 = shalt.err (!%p5460_p6)
}
  0x7d   :  { %s5464_s16 = scalar_lea.vmem %s207_s15, 64  ;;  %p5469_p8 = scmp.lt.s32.totalorder %s207_s15, %s207_s15 }
  0x7e   :  { %p5465_p7 = scmp.ne.s32.totalorder %s207_s15, %s5464_s16  ;;  %p5470_p9 = scmp.lt.s32.totalorder %s5464_s16, %s5464_s16 }
  0x80   :  { %p5471_p10 = por %p5470_p9, %p5469_p8 }
  0x82   :  { %p5472_p11 = pnand %p5471_p10, %p5465_p7 }
  0x84   :  { %5475 = shalt.err (!%p5472_p11)
}
  0x85   :  { %s5772_s23 = smov 32   ;;  %s5773_s20 = smov 2  }
  0x86   :  { %212 = dma.hbm_to_vmem [thread:$0]  %s5896_s13, 64, %s207_s15, [#allocation17], %s5772_s23, %s5772_s23, %s5773_s20  }
  0x87   :  { %s5774_s26 = smov [#allocation19]   ;;  %s5775_s28 = smov [#allocation22]  }
  0x88   :  { %s230_s25 = sshll.u32 %s5774_s26, 4  ;;  %s254_s1 = sshll.u32 %s5775_s28, 4  ;;  %s231_s25 = int_to_ptr.vmem [resolvable:$true] %s230_s25  ;;  %s255_s1 = int_to_ptr.vmem [resolvable:$true] %s254_s1 }
  0x89   :  { %s5476_s2 = scalar_lea.hbm %s5906_s8, 64 }
  0x8a   :  { %p5477_p12 = scmp.ne.s32.totalorder %s5906_s8, %s5476_s2  ;;  %p5480_p13 = scmp.lt.u32.totalorder %s5476_s2, %s5906_s8 }
  0x8c   :  { %p5482_p0 = pnand %p5480_p13, %p5477_p12 }
  0x8e   :  { %5485 = shalt.err (!%p5482_p0)
}
  0x8f   :  { %s5486_s7 = scalar_lea.vmem %s231_s25, 64  ;;  %p5491_p2 = scmp.lt.s32.totalorder %s231_s25, %s231_s25 }
  0x90   :  { %p5487_p1 = scmp.ne.s32.totalorder %s231_s25, %s5486_s7  ;;  %p5492_p3 = scmp.lt.s32.totalorder %s5486_s7, %s5486_s7 }
  0x92   :  { %p5493_p4 = por %p5492_p3, %p5491_p2 }
  0x94   :  { %p5494_p5 = pnand %p5493_p4, %p5487_p1 }
  0x96   :  { %5497 = shalt.err (!%p5494_p5)
}
  0x97   :  { %236 = dma.hbm_to_vmem [thread:$0]  %s5906_s8, 64, %s231_s25, [#allocation20], %s5772_s23, %s5772_s23, %s5773_s20  }
  0x98   :  { %s5498_s13 = scalar_lea.hbm %s5916_s19, 64 }
  0x99   :  { %p5499_p6 = scmp.ne.s32.totalorder %s5916_s19, %s5498_s13  ;;  %p5502_p7 = scmp.lt.u32.totalorder %s5498_s13, %s5916_s19 }
  0x9b   :  { %p5504_p8 = pnand %p5502_p7, %p5499_p6 }
  0x9d   :  { %5507 = shalt.err (!%p5504_p8)
}
  0x9e   :  { %s5508_s10 = scalar_lea.vmem %s255_s1, 64  ;;  %p5513_p10 = scmp.lt.s32.totalorder %s255_s1, %s255_s1 }
  0x9f   :  { %p5509_p9 = scmp.ne.s32.totalorder %s255_s1, %s5508_s10  ;;  %p5514_p11 = scmp.lt.s32.totalorder %s5508_s10, %s5508_s10 }
  0xa1   :  { %p5515_p12 = por %p5514_p11, %p5513_p10 }
  0xa3   :  { %p5516_p13 = pnand %p5515_p12, %p5509_p9 }
  0xa5   :  { %5519 = shalt.err (!%p5516_p13)
}
  0xa6   :  { %260 = dma.hbm_to_vmem [thread:$0]  %s5916_s19, 64, %s255_s1, [#allocation23], %s5772_s23, %s5772_s23, %s5773_s20  }
  0xa7   :  { %s5776_s8 = smov [#allocation2]   ;;  %s5777_s11 = smov [#allocation6]  }
  0xa8   :  { %s86_s14 = sshll.u32 %s5776_s8, 4  ;;  %s112_s6 = sshll.u32 %s5777_s11, 4  ;;  %s87_s14 = int_to_ptr.vmem [resolvable:$true] %s86_s14  ;;  %s113_s6 = int_to_ptr.vmem [resolvable:$true] %s112_s6 }
  0xa9   :  { %s5520_s15 = scalar_lea.hbm %s5821_s21, 32 }
  0xaa   :  { %p5521_p0 = scmp.ne.s32.totalorder %s5821_s21, %s5520_s15  ;;  %p5524_p1 = scmp.lt.u32.totalorder %s5520_s15, %s5821_s21 }
  0xac   :  { %p5526_p2 = pnand %p5524_p1, %p5521_p0 }
  0xae   :  { %5529 = shalt.err (!%p5526_p2)
}
  0xaf   :  { %s5530_s0 = scalar_lea.vmem %s87_s14, 32  ;;  %p5535_p4 = scmp.lt.s32.totalorder %s87_s14, %s87_s14 }
  0xb0   :  { %p5531_p3 = scmp.ne.s32.totalorder %s87_s14, %s5530_s0  ;;  %p5536_p5 = scmp.lt.s32.totalorder %s5530_s0, %s5530_s0 }
  0xb2   :  { %p5537_p6 = por %p5536_p5, %p5535_p4 }
  0xb4   :  { %p5538_p7 = pnand %p5537_p6, %p5531_p3 }
  0xb6   :  { %5541 = shalt.err (!%p5538_p7)
}
  0xb7   :  { %92 = dma.hbm_to_vmem [thread:$0]  %s5821_s21, 32, %s87_s14, [#allocation3], %s5767_s18, %s5767_s18, %s5768_s22  }
  0xb8   :  { %s5542_s19 = scalar_lea.hbm %s5836_s3, 32 }
  0xb9   :  { %p5543_p8 = scmp.ne.s32.totalorder %s5836_s3, %s5542_s19  ;;  %p5546_p9 = scmp.lt.u32.totalorder %s5542_s19, %s5836_s3 }
  0xbb   :  { %p5548_p10 = pnand %p5546_p9, %p5543_p8 }
  0xbd   :  { %5551 = shalt.err (!%p5548_p10)
}
  0xbe   :  { %s5552_s16 = scalar_lea.vmem %s113_s6, 32  ;;  %p5557_p12 = scmp.lt.s32.totalorder %s113_s6, %s113_s6 }
  0xbf   :  { %p5553_p11 = scmp.ne.s32.totalorder %s113_s6, %s5552_s16  ;;  %p5558_p13 = scmp.lt.s32.totalorder %s5552_s16, %s5552_s16 }
  0xc1   :  { %p5559_p0 = por %p5558_p13, %p5557_p12 }
  0xc3   :  { %p5560_p1 = pnand %p5559_p0, %p5553_p11 }
  0xc5   :  { %5563 = shalt.err (!%p5560_p1)
}
  0xc6   :  { %118 = dma.hbm_to_vmem [thread:$0]  %s5836_s3, 32, %s113_s6, [#allocation5], %s5767_s18, %s5767_s18, %s5768_s22  }
  0xc7   :  { %s5778_s21 = smov [#allocation9]   ;;  %s5779_s20 = smov [#allocation12]  }
  0xc8   :  { %s140_s23 = sshll.u32 %s5778_s21, 4  ;;  %s166_s26 = sshll.u32 %s5779_s20, 4  ;;  %s141_s23 = int_to_ptr.vmem [resolvable:$true] %s140_s23  ;;  %s167_s26 = int_to_ptr.vmem [resolvable:$true] %s166_s26 }
  0xc9   :  { %s5564_s25 = scalar_lea.hbm %s5856_s24, 32 }
  0xca   :  { %p5565_p2 = scmp.ne.s32.totalorder %s5856_s24, %s5564_s25  ;;  %p5568_p3 = scmp.lt.u32.totalorder %s5564_s25, %s5856_s24 }
  0xcc   :  { %p5570_p4 = pnand %p5568_p3, %p5565_p2 }
  0xce   :  { %5573 = shalt.err (!%p5570_p4)
}
  0xcf   :  { %s5574_s28 = scalar_lea.vmem %s141_s23, 32  ;;  %p5579_p6 = scmp.lt.s32.totalorder %s141_s23, %s141_s23 }
  0xd0   :  { %p5575_p5 = scmp.ne.s32.totalorder %s141_s23, %s5574_s28  ;;  %p5580_p7 = scmp.lt.s32.totalorder %s5574_s28, %s5574_s28 }
  0xd2   :  { %p5581_p8 = por %p5580_p7, %p5579_p6 }
  0xd4   :  { %p5582_p9 = pnand %p5581_p8, %p5575_p5 }
  0xd6   :  { %5585 = shalt.err (!%p5582_p9)
}
  0xd7   :  { %146 = dma.hbm_to_vmem [thread:$0]  %s5856_s24, 32, %s141_s23, [#allocation8], %s5767_s18, %s5767_s18, %s5768_s22  }
  0xd8   :  { %s5586_s3 = scalar_lea.hbm %s5871_s12, 32 }
  0xd9   :  { %p5587_p10 = scmp.ne.s32.totalorder %s5871_s12, %s5586_s3  ;;  %p5590_p11 = scmp.lt.u32.totalorder %s5586_s3, %s5871_s12 }
  0xdb   :  { %p5592_p12 = pnand %p5590_p11, %p5587_p10 }
  0xdd   :  { %5595 = shalt.err (!%p5592_p12)
}
  0xde   :  { %s5596_s1 = scalar_lea.vmem %s167_s26, 32  ;;  %p5601_p0 = scmp.lt.s32.totalorder %s167_s26, %s167_s26 }
  0xdf   :  { %p5597_p13 = scmp.ne.s32.totalorder %s167_s26, %s5596_s1  ;;  %p5602_p1 = scmp.lt.s32.totalorder %s5596_s1, %s5596_s1 }
  0xe1   :  { %p5603_p2 = por %p5602_p1, %p5601_p0 }
  0xe3   :  { %p5604_p3 = pnand %p5603_p2, %p5597_p13 }
  0xe5   :  { %5607 = shalt.err (!%p5604_p3)
}
  0xe6   :  { %172 = dma.hbm_to_vmem [thread:$0]  %s5871_s12, 32, %s167_s26, [#allocation11], %s5767_s18, %s5767_s18, %s5768_s22  }
  0xe7   :  { %s5780_s24 = smov [#allocation15]   ;;  %s5781_s7 = smov [#allocation18]  }
  0xe8   :  { %s192_s2 = sshll.u32 %s5780_s24, 4  ;;  %s218_s13 = sshll.u32 %s5781_s7, 4  ;;  %s193_s2 = int_to_ptr.vmem [resolvable:$true] %s192_s2  ;;  %s219_s13 = int_to_ptr.vmem [resolvable:$true] %s218_s13 }
  0xe9   :  { %s5608_s10 = scalar_lea.hbm %s5886_s4, 32 }
  0xea   :  { %p5609_p4 = scmp.ne.s32.totalorder %s5886_s4, %s5608_s10  ;;  %p5612_p5 = scmp.lt.u32.totalorder %s5608_s10, %s5886_s4 }
  0xec   :  { %p5614_p6 = pnand %p5612_p5, %p5609_p4 }
  0xee   :  { %5617 = shalt.err (!%p5614_p6)
}
  0xef   :  { %s5618_s8 = scalar_lea.vmem %s193_s2, 32  ;;  %p5623_p8 = scmp.lt.s32.totalorder %s193_s2, %s193_s2 }
  0xf0   :  { %p5619_p7 = scmp.ne.s32.totalorder %s193_s2, %s5618_s8  ;;  %p5624_p9 = scmp.lt.s32.totalorder %s5618_s8, %s5618_s8 }
  0xf2   :  { %p5625_p10 = por %p5624_p9, %p5623_p8 }
  0xf4   :  { %p5626_p11 = pnand %p5625_p10, %p5619_p7 }
  0xf6   :  { %5629 = shalt.err (!%p5626_p11)
}
  0xf7   :  { %198 = dma.hbm_to_vmem [thread:$0]  %s5886_s4, 32, %s193_s2, [#allocation14], %s5767_s18, %s5767_s18, %s5768_s22  }
  0xf8   :  { %s5630_s12 = scalar_lea.hbm %s5901_s27, 8192 }
  0xf9   :  { %p5631_p12 = scmp.ne.s32.totalorder %s5901_s27, %s5630_s12  ;;  %p5634_p13 = scmp.lt.u32.totalorder %s5630_s12, %s5901_s27 }
  0xfb   :  { %p5636_p0 = pnand %p5634_p13, %p5631_p12 }
  0xfd   :  { %5639 = shalt.err (!%p5636_p0)
}
  0xfe   :  { %s5640_s14 = scalar_lea.vmem %s219_s13, 8192  ;;  %p5645_p2 = scmp.lt.s32.totalorder %s219_s13, %s219_s13 }
  0xff   :  { %p5641_p1 = scmp.ne.s32.totalorder %s219_s13, %s5640_s14  ;;  %p5646_p3 = scmp.lt.s32.totalorder %s5640_s14, %s5640_s14 }
 0x101   :  { %p5647_p4 = por %p5646_p3, %p5645_p2 }
 0x103   :  { %p5648_p5 = pnand %p5647_p4, %p5641_p1 }
 0x105   :  { %5651 = shalt.err (!%p5648_p5)
}
 0x106   :  { %s5782_s11 = smov 128   ;;  %s5783_s6 = smov 8  }
 0x107   :  { %224 = dma.hbm_to_vmem [thread:$0]  %s5901_s27, 8192, %s219_s13, [#allocation17], %s5782_s11, %s5782_s11, %s5783_s6  }
 0x108   :  { %s5784_s4 = smov [#allocation21]   ;;  %s5785_s0 = smov [#allocation24]  }
 0x109   :  { %s242_s15 = sshll.u32 %s5784_s4, 4  ;;  %s268_s19 = sshll.u32 %s5785_s0, 4  ;;  %s243_s15 = int_to_ptr.vmem [resolvable:$true] %s242_s15  ;;  %s269_s19 = int_to_ptr.vmem [resolvable:$true] %s268_s19 }
 0x10a   :  { %s5652_s16 = scalar_lea.hbm %s5911_s30, 8192 }
 0x10b   :  { %p5653_p6 = scmp.ne.s32.totalorder %s5911_s30, %s5652_s16  ;;  %p5656_p7 = scmp.lt.u32.totalorder %s5652_s16, %s5911_s30 }
 0x10d   :  { %p5658_p8 = pnand %p5656_p7, %p5653_p6 }
 0x10f   :  { %5661 = shalt.err (!%p5658_p8)
}
 0x110   :  { %s5662_s21 = scalar_lea.vmem %s243_s15, 8192  ;;  %p5667_p10 = scmp.lt.s32.totalorder %s243_s15, %s243_s15 }
 0x111   :  { %p5663_p9 = scmp.ne.s32.totalorder %s243_s15, %s5662_s21  ;;  %p5668_p11 = scmp.lt.s32.totalorder %s5662_s21, %s5662_s21 }
 0x113   :  { %p5669_p12 = por %p5668_p11, %p5667_p10 }
 0x115   :  { %p5670_p13 = pnand %p5669_p12, %p5663_p9 }
 0x117   :  { %5673 = shalt.err (!%p5670_p13)
}
 0x118   :  { %s6581_s23 = sld [smem:[#allocation47_spill]] }
 0x119   :  { %248 = dma.hbm_to_vmem [thread:$0]  %s5911_s30, 8192, %s243_s15, [#allocation20], %s5782_s11, %s5782_s11, %s5783_s6  }
 0x11e   :  { %s5674_s27 = scalar_lea.hbm %s6581_s23, 32 }
 0x11f   :  { %p5675_p0 = scmp.ne.s32.totalorder %s6581_s23, %s5674_s27  ;;  %p5678_p1 = scmp.lt.u32.totalorder %s5674_s27, %s6581_s23 }
 0x121   :  { %p5680_p2 = pnand %p5678_p1, %p5675_p0 }
 0x123   :  { %5683 = shalt.err (!%p5680_p2)
}
 0x124   :  { %s5684_s20 = scalar_lea.vmem %s269_s19, 32  ;;  %p5689_p4 = scmp.lt.s32.totalorder %s269_s19, %s269_s19 }
 0x125   :  { %p5685_p3 = scmp.ne.s32.totalorder %s269_s19, %s5684_s20  ;;  %p5690_p5 = scmp.lt.s32.totalorder %s5684_s20, %s5684_s20 }
 0x127   :  { %p5691_p6 = por %p5690_p5, %p5689_p4 }
 0x129   :  { %p5692_p7 = pnand %p5691_p6, %p5685_p3 }
 0x12b   :  { %5695 = shalt.err (!%p5692_p7)
}
 0x12c   :  { %274 = dma.hbm_to_vmem [thread:$0]  %s6581_s23, 32, %s269_s19, [#allocation23], %s5767_s18, %s5767_s18, %s5768_s22  }
 0x12d   :  { %s5786_s30 = smov [#allocation25]   ;;  %s5696_s25 = scalar_lea.hbm %s5941_s29, 256 }
 0x12e   :  { %s284_s26 = sshll.u32 %s5786_s30, 4  ;;  %p5697_p8 = scmp.ne.s32.totalorder %s5941_s29, %s5696_s25  ;;  %s285_s26 = int_to_ptr.vmem [resolvable:$true] %s284_s26 }
 0x12f   :  { %p5700_p9 = scmp.lt.u32.totalorder %s5696_s25, %s5941_s29 }
 0x131   :  { %p5702_p10 = pnand %p5700_p9, %p5697_p8 }
 0x133   :  { %5705 = shalt.err (!%p5702_p10)
}
 0x134   :  { %s5706_s28 = scalar_lea.vmem %s285_s26, 256  ;;  %p5711_p12 = scmp.lt.s32.totalorder %s285_s26, %s285_s26 }
 0x135   :  { %p5707_p11 = scmp.ne.s32.totalorder %s285_s26, %s5706_s28  ;;  %p5712_p13 = scmp.lt.s32.totalorder %s5706_s28, %s5706_s28 }
 0x137   :  { %p5713_p0 = por %p5712_p13, %p5711_p12 }
 0x139   :  { %p5714_p1 = pnand %p5713_p0, %p5707_p11 }
 0x13b   :  { %5717 = shalt.err (!%p5714_p1)
}
 0x13c   :  { %s5787_s3 = smov 64   ;;  %s5788_s1 = smov 4  }
 0x13d   :  { %290 = dma.hbm_to_vmem [thread:$0]  %s5941_s29, 256, %s285_s26, [#allocation26], %s5787_s3, %s5787_s3, %s5788_s1  }
 0x13e   :  { %5718 = dma.done.wait [#allocation3], 32  }
 0x13f   :  { %5719 = vsyncadd [#allocation3], 4294967264 }
 0x140   :  { %5720 = dma.done.wait [#allocation5], 64  }
 0x141   :  { %5721 = vsyncadd [#allocation5], 4294967232 }
 0x142   :  { %5722 = dma.done.wait [#allocation8], 64  }
 0x143   :  { %5723 = vsyncadd [#allocation8], 4294967232 }
 0x144   :  { %5724 = dma.done.wait [#allocation11], 64  }
 0x145   :  { %5725 = vsyncadd [#allocation11], 4294967232 }
 0x146   :  { %5726 = dma.done.wait [#allocation14], 64  }
 0x147   :  { %5727 = vsyncadd [#allocation14], 4294967232 }
 0x148   :  { %5728 = dma.done.wait [#allocation17], 8256  }
 0x149   :  { %5729 = vsyncadd [#allocation17], 4294959040 }
 0x14a   :  { %5730 = dma.done.wait [#allocation20], 8256  }
 0x14b   :  { %5731 = vsyncadd [#allocation20], 4294959040 }
 0x14c   :  { %5732 = dma.done.wait [#allocation23], 96  }
 0x14d   :  { %5733 = vsyncadd [#allocation23], 4294967200 }
 0x14e   :  { %5734 = dma.done.wait [#allocation26], 256  }
 0x14f   :  { %5735 = vsyncadd [#allocation26], 4294967040  ;;  %s6582_s18 = sld [smem:[#allocation36_spill]]  ;;  %s6583_s29 = sld [smem:[#allocation39_spill]]  ;;  %v5789_v0 = vmov 0   ;;  %v5790_v1 = vmov 0.0   ;;  %v342_v8 = vlaneseq }
 0x150   :  { %4967 = vset.pattern.permute.xlu0 %v5789_v0  ;;  %4690 = vmatprep.subr.bf16.mxu0 %v5790_v1  ;;  %vm5791_vm0 = vmmov 0   ;;  %s6584_s22 = sld [smem:[#allocation37_spill]]  ;;  %vm391_vm3 = vcmask 523264   ;;  %vm462_vm4 = vcmask 261120   ;;  %s6585_s24 = sld [smem:[#allocation40_spill]] }
 0x151   :  { %4702 = vmatprep.subr.bf16.mxu1 %v5790_v1  ;;  %4698 = vmatprep.mubr.msk.bf16.mxu0 %vm5791_vm0, %v5790_v1  ;;  %v6083_v9 = vand.u32 127, %v342_v8  ;;  %s6586_s2 = sld [smem:[#allocation42_spill]]  ;;  %s6587_s7 = sld [smem:[#allocation41_spill]]  ;;  %v4245_v47 = vld [vmem:[#allocation2] ss:$0 sm:$0xff] }
 0x152   :  { %4706 = vmatprep.mubr.msk.bf16.mxu1 %vm5791_vm0, %v5790_v1  ;;  %v4246_v51 = vld [vmem:[#allocation4] ss:$0 sm:$0xff]  ;;  %v4247_v58 = vld [vmem:[#allocation6] ss:$0 sm:$0xff]  ;;  %v4255_v59 = vld [vmem:[#allocation9] ss:$0 sm:$0xff] }
 0x153   :  { %vm445_vm5 = vcmp.ge.s32.totalorder %v6083_v9, 8  ;;  %vm446_vm6 = vcmp.lt.s32.totalorder %v6083_v9, 16  ;;  %vm450_vm7 = vcmp.ge.s32.totalorder %v6083_v9, 16  ;;  %vm451_vm8 = vcmp.lt.s32.totalorder %v6083_v9, 24  ;;  %s6588_s13 = sld [smem:[#allocation38_spill]]  ;;  %s6589_s10 = sld [smem:[#allocation43_spill]] }
 0x154   :  { %vm447_vm9 = vmand %vm445_vm5, %vm446_vm6  ;;  %vm455_vm10 = vcmp.ge.s32.totalorder %v6083_v9, 24  ;;  %vm456_vm11 = vcmp.lt.s32.totalorder %v6083_v9, 32  ;;  %vm441_vm12 = vcmp.lt.s32.totalorder %v6083_v9, 8  ;;  %s6590_s8 = sld [smem:[#allocation44_spill]]  ;;  %s6591_s12 = sld [smem:[#allocation45_spill]] }
 0x155   :  { %v340_v2 = vld [vmem:[%s6582_s18] sm:$0xff]  ;;  %v341_v4 = vld [vmem:[%s6582_s18 + $0x8] sm:$0xff]  ;;  %v4970_v6 = vld [vmem:[%s6583_s29 + $0x10] sm:$0xff]   ;;  %s6592_s14 = sld [smem:[#allocation46_spill]] }
 0x156   :  { %345 = vperm.xlu0 %4967, %v340_v2   ;;  %v4968_v3 = vld [vmem:[%s6583_s29] sm:$0xff]   ;;  %v4969_v5 = vld [vmem:[%s6583_s29 + $0x8] sm:$0xff]   ;;  %v4971_v7 = vld [vmem:[%s6583_s29 + $0x18] sm:$0xff]  }
 0x157   :  { %4691 = vmatpush3.bf16.msra.mxu0 %v4968_v3  ;;  %v365_v15 = vld [vmem:[%s6584_s22] sm:$0xff]  ;;  %v366_v17 = vld [vmem:[%s6584_s22 + $0x8] sm:$0xff]  ;;  %vm452_vm13 = vmand %vm450_vm7, %vm451_vm8 }
 0x158   :  { %4692 = vmatprep.subr.bf16.mxu0 %v5790_v1  ;;  %v4972_v35 = vld [vmem:[%s6585_s24] sm:$0xff]   ;;  %v4974_v37 = vld [vmem:[%s6585_s24 + $0x8] sm:$0xff]   ;;  %vm457_vm14 = vmand %vm455_vm10, %vm456_vm11 }
 0x159   :  { %v4973_v36 = vld [vmem:[%s6586_s2] sm:$0xff]   ;;  %4703 = vmatpush3.bf16.msra.mxu1 %v4972_v35  ;;  %v4975_v38 = vld [vmem:[%s6586_s2 + $0x8] sm:$0xff]  }
 0x15a   :  { %348 = vperm.xlu0 %4967, %v341_v4   ;;  %4704 = vmatprep.subr.bf16.mxu1 %v5790_v1  ;;  %v4976_v55 = vld [vmem:[%s6587_s7] sm:$0xff]   ;;  %v4977_v57 = vld [vmem:[%s6587_s7 + $0x8] sm:$0xff]   ;;  %v6134_v4 = vsel %vm441_vm12, 1.0, %v5790_v1 }
 0x15b   :  { %4693 = vmatpush3.bf16.msra.mxu0 %v4969_v5  ;;  %v6137_v5 = vsel %vm447_vm9, 1.0, %v5790_v1 }
 0x15c   :  { %4694 = vmatprep.subr.bf16.mxu0 %v5790_v1 }
 0x15d   :  { %4705 = vmatpush3.bf16.msra.mxu1 %v4974_v37 }
 0x15e   :  { %4710 = vmatprep.subr.bf16.mxu1 %v5790_v1 }
 0x15f   :  { %4695 = vmatpush3.bf16.msra.mxu0 %v4970_v6  ;;  %v6140_v6 = vsel %vm452_vm13, 1.0, %v5790_v1 }
 0x160   :  { %4696 = vmatprep.subr.bf16.mxu0 %v5790_v1 }
 0x163   :  { %4697 = vmatpush3.bf16.msra.mxu0 %v4971_v7 }
 0x164   :  { %4718 = vmatprep.subr.bf16.mxu0 %v5790_v1 }
 0x1d5   :  { %v346_v10 = vpop.permute.xlu0 %345 }
 0x1d6   :  { %vm350_vm1 = vcmp.eq.s32.totalorder %v6083_v9, %v346_v10 }
 0x1d7   :  { %v4234_v12 = vsel %vm350_vm1, 1.0, %v5790_v1  ;;  %vm757_vm1 = vcmask 130048  }
 0x1d9   :  { %v349_v11 = vpop.permute.xlu0 %348 }
 0x1da   :  { %vm351_vm2 = vcmp.eq.s32.totalorder %v6083_v9, %v349_v11 }
 0x1db   :  { %v4235_v13 = vsel %vm351_vm2, 1.0, %v5790_v1 }
 0x1dc   :  { %v356_v14 = vpack.c.bf16 %v4235_v13, %v4234_v12  ;;  %v6143_v13 = vsel %vm457_vm14, 1.0, %v5790_v1 }
 0x1de   :  { %4699 = vmatmul.mubr.msk.bf16.vlgmr.msra.gmra.mrb[0].mxu0 %vm391_vm3, %v356_v14 }
 0x1df   :  { %4722 = vmatprep.mubr.msk.bf16.mxu0 %vm5791_vm0, %v5790_v1  ;;  %4719 = vmatpush3.bf16.msra.mxu0 %v4973_v36 }
 0x1e0   :  { %4720 = vmatprep.subr.bf16.mxu0 %v5790_v1 }
 0x1e3   :  { %4721 = vmatpush3.bf16.msra.mxu0 %v4975_v38 }
 0x1e4   :  { %4732 = vmatprep.subr.bf16.mxu0 %v5790_v1 }
 0x2b1   :  { %v429_v16 = vpop.f32.mrb[0].mxu0 }
 0x2b2   :  { %v6093_v18 = vadd.f32 %v429_v16, %v365_v15  ;;  %v4700_v19 = vpop.f32.mrb[1].mxu0 }
 0x2b3   :  { %v432_v20 = vpop.f32.mrb[2].mxu0 }
 0x2b4   :  { %v6095_v21 = vadd.f32 %v432_v20, %v366_v17  ;;  %v4701_v22 = vpop.f32.mrb[3].mxu0  ;;  %v463_v23 = vsel %vm462_vm4, %v6093_v18, 0.0 }
 0x2b5   :  { %464 = vadd.xlane.f32.xlu1 %v463_v23 }
 0x2b6   :  { %v466_v24 = vsel %vm462_vm4, %v6095_v21, 0.0 }
 0x2b9   :  { %467 = vadd.xlane.f32.xlu1 %v466_v24 }
 0x342   :  { %v465_v25 = vpop.xlane.xlu1 %464 }
 0x343   :  { %v470_v26 = vmul.f32 0.03125, %v465_v25 }
 0x345   :  { %v472_v27 = vsub.f32 %v6093_v18, %v470_v26 }
 0x346   :  { %v468_v28 = vpop.xlane.xlu1 %467 }
 0x347   :  { %v471_v29 = vmul.f32 0.03125, %v468_v28  ;;  %v474_v30 = vmul.f32 %v472_v27, %v472_v27 }
 0x349   :  { %v473_v31 = vsub.f32 %v6095_v21, %v471_v29  ;;  %v476_v32 = vsel %vm462_vm4, %v474_v30, 0.0 }
 0x34a   :  { %477 = vadd.xlane.f32.xlu0 %v476_v32 }
 0x34b   :  { %v475_v33 = vmul.f32 %v473_v31, %v473_v31 }
 0x34d   :  { %v479_v34 = vsel %vm462_vm4, %v475_v33, 0.0 }
 0x34e   :  { %480 = vadd.xlane.f32.xlu1 %v479_v34  ;;  %v4251_v34 = vld [vmem:[#allocation7] ss:$0 sm:$0xff] }
 0x3d7   :  { %v478_v39 = vpop.xlane.xlu0 %477 }
 0x3d8   :  { %v482_v40 = vmul.f32 0.03125, %v478_v39 }
 0x3da   :  { %v484_v41 = vadd.f32 1e-05, %v482_v40 }
 0x3db   :  { %v481_v42 = vpop.xlane.xlu1 %480 }
 0x3dc   :  { %5266 = vrsqrt.f32 %v484_v41  ;;  %v483_v43 = vmul.f32 0.03125, %v481_v42 }
 0x3de   :  { %v485_v44 = vadd.f32 1e-05, %v483_v43 }
 0x3e0   :  { %5268 = vrsqrt.f32 %v485_v44 }
 0x3e6   :  { %v5267_v45 = vpop.eup %5266 }
 0x3e7   :  { %v488_v46 = vmul.f32 %v5267_v45, %v472_v27 }
 0x3e9   :  { %v496_v50 = vmul.f32 %v4245_v47, %v488_v46 }
 0x3ea   :  { %v5269_v48 = vpop.eup %5268 }
 0x3eb   :  { %v489_v49 = vmul.f32 %v5269_v48, %v473_v31  ;;  %v504_v53 = vadd.f32 %v4246_v51, %v496_v50 }
 0x3ed   :  { %v497_v52 = vmul.f32 %v4245_v47, %v489_v49 }
 0x3ef   :  { %v505_v54 = vadd.f32 %v4246_v51, %v497_v52  ;;  %v6198_v52 = vld [vmem:[%s6588_s13] sm:$0xff] }
 0x3f0   :  { %vm438_vm15 = vcmp.gt.f32.partialorder %v6198_v52, 0.5 }
 0x3f1   :  { %v510_v56 = vpack.c.bf16 %v505_v54, %v504_v53  ;;  %v6201_v53 = vld [vmem:[%s6588_s13 + $0x8] sm:$0xff] }
 0x3f2   :  { %vm439_vm2 = vcmp.gt.f32.partialorder %v6201_v53, 0.5 }
 0x3f3   :  { %4707 = vmatmul.mubr.msk.bf16.vlgmr.msra.gmra.mrb[0].mxu1 %vm462_vm4, %v510_v56  ;;  %4723 = vmatmul.mubr.msk.bf16.vlgmr.msra.gmra.mrb[4].mxu0 %vm462_vm4, %v510_v56 }
 0x3f4   :  { %4711 = vmatpush3.bf16.msra.mxu1 %v4976_v55  ;;  %4714 = vmatprep.mubr.msk.bf16.mxu1 %vm5791_vm0, %v5790_v1 }
 0x3f5   :  { %4712 = vmatprep.subr.bf16.mxu1 %v5790_v1  ;;  %4734 = vmatprep.mubr.msk.bf16.mxu0 %vm5791_vm0, %v5790_v1 }
 0x3f8   :  { %4713 = vmatpush3.bf16.msra.mxu1 %v4977_v57 }
 0x3f9   :  { %4726 = vmatprep.subr.bf16.mxu1 %v5790_v1 }
 0x3fb   :  { %4715 = vmatmul.mubr.msk.bf16.vlgmr.msra.gmra.mrb[4].mxu1 %vm462_vm4, %v510_v56 }
 0x3fc   :  { %4728 = vmatprep.mubr.msk.bf16.mxu1 %vm5791_vm0, %v5790_v1 }
 0x4c6   :  { %v567_v60 = vpop.f32.mrb[0].mxu1  ;;  %v697_v61 = vpop.f32.mrb[4].mxu0 }
 0x4c7   :  { %v568_v62 = vadd.f32 %v4247_v58, %v567_v60  ;;  %v698_v63 = vadd.f32 %v4255_v59, %v697_v61  ;;  %v4708_v2 = vpop.f32.mrb[1].mxu1  ;;  %v4724_v3 = vpop.f32.mrb[5].mxu0 }
 0x4c8   :  { %v570_v7 = vpop.f32.mrb[2].mxu1  ;;  %v700_v10 = vpop.f32.mrb[6].mxu0 }
 0x4c9   :  { %v574_v9 = vmul.f32 0.35355338, %v568_v62  ;;  %v4709_v11 = vpop.f32.mrb[3].mxu1  ;;  %v4725_v12 = vpop.f32.mrb[7].mxu0  ;;  %v571_v14 = vadd.f32 %v4247_v58, %v570_v7  ;;  %v701_v15 = vadd.f32 %v4255_v59, %v700_v10  ;;  %v6147_v17 = vmul.f32 %v6134_v4, %v698_v63 }
 0x4ca   :  { %v855_v19 = vmul.f32 %v6137_v5, %v698_v63  ;;  %v6151_v20 = vmul.f32 %v6140_v6, %v698_v63  ;;  %v6171_v36 = vmul.f32 %v6143_v13, %v698_v63 }
 0x4cb   :  { %v705_v16 = vmul.f32 %v6134_v4, %v574_v9  ;;  %v575_v22 = vmul.f32 0.35355338, %v571_v14  ;;  %v6154_v23 = vmul.f32 %v6134_v4, %v701_v15  ;;  %v856_v24 = vmul.f32 %v6137_v5, %v701_v15 }
 0x4cc   :  { %v6158_v25 = vmul.f32 %v6140_v6, %v701_v15  ;;  %v784_v26 = vmul.f32 %v6137_v5, %v574_v9  ;;  %v947_v27 = vmul.f32 %v6140_v6, %v574_v9  ;;  %v1068_v28 = vmul.f32 %v6143_v13, %v574_v9 }
 0x4cd   :  { %v6164_v29 = vmul.f32 %v6143_v13, %v701_v15  ;;  %v706_v30 = vmul.f32 %v6134_v4, %v575_v22  ;;  %v785_v31 = vmul.f32 %v6137_v5, %v575_v22  ;;  %v948_v32 = vmul.f32 %v6140_v6, %v575_v22 }
 0x4ce   :  { %v1069_v33 = vmul.f32 %v6143_v13, %v575_v22  ;;  %v633_v35 = vpop.f32.mrb[4].mxu1  ;;  %v857_v38 = vpack.c.bf16 %v856_v24, %v855_v19  ;;  %v782_v39 = vpack.c.bf16 %v6154_v23, %v6147_v17  ;;  %v1020_v40 = vpack.c.bf16 %v6158_v25, %v6151_v20 }
 0x4cf   :  { %v4716_v37 = vpop.f32.mrb[5].mxu1  ;;  %v707_v41 = vpack.c.bf16 %v706_v30, %v705_v16  ;;  %v786_v42 = vpack.c.bf16 %v785_v31, %v784_v26  ;;  %v949_v43 = vpack.c.bf16 %v948_v32, %v947_v27  ;;  %v634_v46 = vadd.f32 %v4251_v34, %v633_v35 }
 0x4d0   :  { %v1070_v44 = vpack.c.bf16 %v1069_v33, %v1068_v28  ;;  %v636_v45 = vpop.f32.mrb[6].mxu1  ;;  %v1141_v49 = vpack.c.bf16 %v6164_v29, %v6171_v36 }
 0x4d1   :  { %v637_v47 = vadd.f32 %v4251_v34, %v636_v45  ;;  %v4717_v48 = vpop.f32.mrb[7].mxu1 }
 0x4d3   :  { %v704_v50 = vpack.c.bf16 %v637_v47, %v634_v46 }
 0x4d5   :  { %v712_v51 = vsel %vm462_vm4, %v704_v50, 0 }
 0x4d6   :  { %4727 = vmatpush3.bf16.xpose.msra.mxu1 %v712_v51  ;;  %4733 = vmatpush3.bf16.xpose.msra.mxu0 %v712_v51 }
 0x4d7   :  { %4738 = vmatprep.subr.bf16.mxu1 %v5790_v1  ;;  %4750 = vmatprep.subr.bf16.mxu0 %v5790_v1 }
 0x4dd   :  { %4729 = vmatmul.mubr.msk.bf16.vlgmr.msra.gmra.mrb[8].mxu1 %vm462_vm4, %v707_v41  ;;  %4735 = vmatmul.mubr.msk.bf16.vlgmr.msra.gmra.mrb[8].mxu0 %vm462_vm4, %v786_v42 }
 0x4de   :  { %4739 = vmatpush3.bf16.msra.mxu1 %v857_v38  ;;  %4751 = vmatpush3.bf16.xpose.msra.mxu0 %v712_v51 }
 0x4df   :  { %4752 = vmatprep.mubr.msk.bf16.mxu0 %vm5791_vm0, %v5790_v1  ;;  %4762 = vmatprep.subr.bf16.mxu0 %v5790_v1 }
 0x4e0   :  { %4740 = vmatprep.mubr.msk.bf16.mxu1 %vm5791_vm0, %v5790_v1  ;;  %4744 = vmatprep.subr.bf16.mxu1 %v5790_v1 }
 0x4e5   :  { %4753 = vmatmul.mubr.msk.bf16.vlgmr.msra.gmra.mrb[12].mxu0 %vm462_vm4, %v949_v43 }
 0x4e6   :  { %4763 = vmatpush3.bf16.xpose.msra.mxu0 %v712_v51  ;;  %4764 = vmatprep.mubr.msk.bf16.mxu0 %vm5791_vm0, %v5790_v1 }
 0x4e7   :  { %4774 = vmatprep.subr.bf16.mxu0 %v5790_v1 }
 0x4ed   :  { %4765 = vmatmul.mubr.msk.bf16.vlgmr.msra.gmra.mrb[16].mxu0 %vm462_vm4, %v1070_v44 }
 0x4ee   :  { %4778 = vmatprep.mubr.msk.bf16.mxu0 %vm5791_vm0, %v5790_v1 }
 0x5b0   :  { %v748_v54 = vpop.f32.mrb[8].mxu1  ;;  %v824_v55 = vpop.f32.mrb[8].mxu0 }
 0x5b1   :  { %v831_v56 = vsel %vm438_vm15, %v824_v55, -1e+30  ;;  %v4730_v57 = vpop.f32.mrb[9].mxu1  ;;  %v4736_v58 = vpop.f32.mrb[9].mxu0  ;;  %v755_v7 = vsel %vm438_vm15, %v748_v54, -1e+30 }
 0x5b2   :  { %v751_v59 = vpop.f32.mrb[10].mxu1  ;;  %v827_v60 = vpop.f32.mrb[10].mxu0  ;;  %v833_v61 = vsel %vm757_vm1, %v831_v56, -inf  ;;  %v758_v12 = vsel %vm757_vm1, %v755_v7, -inf }
 0x5b3   :  { %v832_v62 = vsel %vm439_vm2, %v827_v60, -1e+30  ;;  %v4731_v63 = vpop.f32.mrb[11].mxu1  ;;  %834 = vmax.xlane.f32.xlu1 %v833_v61  ;;  %v4737_v2 = vpop.f32.mrb[11].mxu0  ;;  %v756_v14 = vsel %vm439_vm2, %v751_v59, -1e+30 }
 0x5b4   :  { %v836_v3 = vsel %vm757_vm1, %v832_v62, -inf  ;;  %v761_v16 = vsel %vm757_vm1, %v756_v14, -inf }
 0x5b7   :  { %837 = vmax.xlane.f32.xlu1 %v836_v3 }
 0x5b8   :  { %v987_v10 = vpop.f32.mrb[12].mxu0 }
 0x5b9   :  { %v4754_v9 = vpop.f32.mrb[13].mxu0  ;;  %v994_v19 = vsel %vm438_vm15, %v987_v10, -1e+30 }
 0x5ba   :  { %v990_v11 = vpop.f32.mrb[14].mxu0  ;;  %v996_v27 = vsel %vm757_vm1, %v994_v19, -inf }
 0x5bb   :  { %759 = vmax.xlane.f32.xlu1 %v758_v12  ;;  %v4755_v15 = vpop.f32.mrb[15].mxu0  ;;  %v995_v28 = vsel %vm439_vm2, %v990_v11, -1e+30 }
 0x5bc   :  { %v999_v33 = vsel %vm757_vm1, %v995_v28, -inf }
 0x5bf   :  { %762 = vmax.xlane.f32.xlu1 %v761_v16 }
 0x5c0   :  { %v1108_v22 = vpop.f32.mrb[16].mxu0 }
 0x5c1   :  { %v4766_v24 = vpop.f32.mrb[17].mxu0  ;;  %v1115_v34 = vsel %vm438_vm15, %v1108_v22, -1e+30 }
 0x5c2   :  { %v1111_v26 = vpop.f32.mrb[18].mxu0  ;;  %v1117_v35 = vsel %vm757_vm1, %v1115_v34, -inf }
 0x5c3   :  { %v1116_v30 = vsel %vm439_vm2, %v1111_v26, -1e+30  ;;  %997 = vmax.xlane.f32.xlu1 %v996_v27  ;;  %v4767_v31 = vpop.f32.mrb[19].mxu0 }
 0x5c4   :  { %v1120_v32 = vsel %vm757_vm1, %v1116_v30, -inf }
 0x5c5   :  { %1121 = vmax.xlane.f32.xlu0 %v1120_v32  ;;  %v4978_v32 = vld [vmem:[%s6589_s10] sm:$0xff]  }
 0x5c6   :  { %4775 = vmatpush3.bf16.msra.mxu0 %v4978_v32 }
 0x5c7   :  { %1000 = vmax.xlane.f32.xlu1 %v999_v33  ;;  %4776 = vmatprep.subr.bf16.mxu0 %v5790_v1 }
 0x5cb   :  { %1118 = vmax.xlane.f32.xlu1 %v1117_v35 }
 0x640   :  { %v835_v37 = vpop.xlane.xlu1 %834 }
 0x641   :  { %v839_v38 = vsub.f32 %v831_v56, %v835_v37 }
 0x643   :  { %v841_v41 = vmul.f32 1.442695, %v839_v38 }
 0x644   :  { %v838_v42 = vpop.xlane.xlu1 %837 }
 0x645   :  { %5270 = vpow2.f32 %v841_v41  ;;  %v840_v43 = vsub.f32 %v832_v62, %v838_v42 }
 0x647   :  { %v843_v44 = vmul.f32 1.442695, %v840_v43 }
 0x648   :  { %v760_v45 = vpop.xlane.xlu1 %759 }
 0x649   :  { %5272 = vpow2.f32 %v843_v44  ;;  %v764_v46 = vsub.f32 %v755_v7, %v760_v45 }
 0x64b   :  { %v766_v47 = vmul.f32 1.442695, %v764_v46 }
 0x64c   :  { %v763_v48 = vpop.xlane.xlu1 %762 }
 0x64d   :  { %5274 = vpow2.f32 %v766_v47  ;;  %v765_v50 = vsub.f32 %v756_v14, %v763_v48 }
 0x64f   :  { %v5271_v51 = vpop.eup %5270  ;;  %v768_v54 = vmul.f32 1.442695, %v765_v50 }
 0x650   :  { %v998_v55 = vpop.xlane.xlu1 %997  ;;  %v845_v57 = vsel %vm757_vm1, %v5271_v51, 0.0 }
 0x651   :  { %5276 = vpow2.f32 %v768_v54  ;;  %v1002_v58 = vsub.f32 %v994_v19, %v998_v55  ;;  %846 = vadd.xlane.f32.xlu1 %v845_v57 }
 0x652   :  { %v1122_v56 = vpop.xlane.xlu0 %1121 }
 0x653   :  { %v5273_v59 = vpop.eup %5272  ;;  %v1004_v60 = vmul.f32 1.442695, %v1002_v58  ;;  %v1124_v61 = vsub.f32 %v1116_v30, %v1122_v56 }
 0x654   :  { %v1001_v62 = vpop.xlane.xlu1 %1000  ;;  %v848_v63 = vsel %vm757_vm1, %v5273_v59, 0.0 }
 0x655   :  { %5278 = vpow2.f32 %v1004_v60  ;;  %v1003_v2 = vsub.f32 %v995_v28, %v1001_v62  ;;  %849 = vadd.xlane.f32.xlu0 %v848_v63  ;;  %v1127_v7 = vmul.f32 1.442695, %v1124_v61  ;;  %v4979_v61 = vld [vmem:[%s6589_s10 + $0x8] sm:$0xff]  }
 0x656   :  { %4777 = vmatpush3.bf16.msra.mxu0 %v4979_v61  ;;  %v4994_v61 = vld [vmem:[%s6591_s12 + $0x40] ss:$8 sps:$4 sm:$0xff]  }
 0x657   :  { %v5275_v3 = vpop.eup %5274  ;;  %v1006_v10 = vmul.f32 1.442695, %v1003_v2  ;;  %4782 = vmatprep.subr.bf16.mxu0 %v5790_v1  ;;  %v4267_v2 = vld [vmem:[#allocation10] ss:$0 sm:$0xff] }
 0x658   :  { %v1119_v9 = vpop.xlane.xlu1 %1118  ;;  %v770_v11 = vsel %vm757_vm1, %v5275_v3, 0.0 }
 0x659   :  { %5280 = vpow2.f32 %v1006_v10  ;;  %v1123_v12 = vsub.f32 %v1115_v34, %v1119_v9  ;;  %771 = vadd.xlane.f32.xlu1 %v770_v11 }
 0x65a   :  { %5282 = vpow2.f32 %v1127_v7 }
 0x65b   :  { %v5277_v14 = vpop.eup %5276  ;;  %v1125_v15 = vmul.f32 1.442695, %v1123_v12 }
 0x65c   :  { %v773_v16 = vsel %vm757_vm1, %v5277_v14, 0.0 }
 0x65d   :  { %5284 = vpow2.f32 %v1125_v15  ;;  %774 = vadd.xlane.f32.xlu0 %v773_v16 }
 0x65f   :  { %v5279_v19 = vpop.eup %5278 }
 0x660   :  { %v1008_v22 = vsel %vm757_vm1, %v5279_v19, 0.0 }
 0x661   :  { %1009 = vadd.xlane.f32.xlu1 %v1008_v22 }
 0x663   :  { %v5281_v24 = vpop.eup %5280 }
 0x664   :  { %v1011_v26 = vsel %vm757_vm1, %v5281_v24, 0.0  ;;  %v5283_v27 = vpop.eup %5282 }
 0x665   :  { %1012 = vadd.xlane.f32.xlu0 %v1011_v26  ;;  %v1132_v31 = vsel %vm757_vm1, %v5283_v27, 0.0 }
 0x667   :  { %v5285_v28 = vpop.eup %5284 }
 0x668   :  { %v1129_v30 = vsel %vm757_vm1, %v5285_v28, 0.0 }
 0x669   :  { %1130 = vadd.xlane.f32.xlu1 %v1129_v30  ;;  %1133 = vadd.xlane.f32.xlu0 %v1132_v31 }
 0x6de   :  { %v847_v33 = vpop.xlane.xlu1 %846 }
 0x6df   :  { %5286 = vrcp.f32 %v847_v33  ;;  %v4980_v33 = vld [vmem:[%s6590_s8] sm:$0xff]  }
 0x6e2   :  { %v850_v34 = vpop.xlane.xlu0 %849 }
 0x6e3   :  { %5288 = vrcp.f32 %v850_v34  ;;  %v4981_v34 = vld [vmem:[%s6590_s8 + $0x8] sm:$0xff]  }
 0x6e6   :  { %v772_v35 = vpop.xlane.xlu1 %771 }
 0x6e9   :  { %v5287_v38 = vpop.eup %5286 }
 0x6ea   :  { %v775_v37 = vpop.xlane.xlu0 %774  ;;  %v853_v42 = vmul.f32 %v5287_v38, %v5271_v51 }
 0x6eb   :  { %5290 = vrcp.f32 %v775_v37 }
 0x6ec   :  { %5292 = vrcp.f32 %v772_v35 }
 0x6ed   :  { %v5289_v41 = vpop.eup %5288 }
 0x6ee   :  { %v854_v43 = vmul.f32 %v5289_v41, %v5273_v59  ;;  %v1010_v47 = vpop.xlane.xlu1 %1009 }
 0x6f0   :  { %v858_v44 = vpack.c.bf16 %v854_v43, %v853_v42 }
 0x6f2   :  { %4741 = vmatmul.mubr.msk.bf16.vlgmr.msra.gmra.mrb[12].mxu1 %vm757_vm1, %v858_v44  ;;  %v1013_v45 = vpop.xlane.xlu0 %1012 }
 0x6f3   :  { %4745 = vmatpush3.bf16.msra.mxu1 %v782_v39  ;;  %4746 = vmatprep.mubr.msk.bf16.mxu1 %vm5791_vm0, %v5790_v1  ;;  %5294 = vrcp.f32 %v1013_v45  ;;  %v4271_v45 = vld [vmem:[#allocation12] ss:$0 sm:$0xff] }
 0x6f4   :  { %4756 = vmatprep.subr.bf16.mxu1 %v5790_v1  ;;  %5296 = vrcp.f32 %v1010_v47 }
 0x6f5   :  { %v5291_v46 = vpop.eup %5290 }
 0x6f6   :  { %v5293_v48 = vpop.eup %5292  ;;  %v779_v50 = vmul.f32 %v5291_v46, %v5277_v14  ;;  %v1131_v55 = vpop.xlane.xlu1 %1130 }
 0x6f7   :  { %v778_v51 = vmul.f32 %v5293_v48, %v5275_v3  ;;  %v1134_v17 = vpop.xlane.xlu0 %1133  ;;  %5298 = vrcp.f32 %v1131_v55 }
 0x6f8   :  { %5300 = vrcp.f32 %v1134_v17 }
 0x6f9   :  { %v783_v54 = vpack.c.bf16 %v779_v50, %v778_v51  ;;  %v4272_v51 = vld [vmem:[#allocation13] ss:$0 sm:$0xff] }
 0x6fd   :  { %v5295_v23 = vpop.eup %5294 }
 0x6fe   :  { %4747 = vmatmul.mubr.msk.bf16.vlgmr.msra.gmra.mrb[12].mxu1 %vm757_vm1, %v783_v54  ;;  %v5297_v39 = vpop.eup %5296  ;;  %v1017_v57 = vmul.f32 %v5295_v23, %v5281_v24 }
 0x6ff   :  { %4757 = vmatpush3.bf16.msra.mxu1 %v1020_v40  ;;  %4758 = vmatprep.mubr.msk.bf16.mxu1 %vm5791_vm0, %v5790_v1  ;;  %v1016_v58 = vmul.f32 %v5297_v39, %v5279_v19  ;;  %v4984_v39 = vld [vmem:[%s6591_s12 + $0x4] ss:$8 sps:$4 sm:$0xff]  }
 0x700   :  { %4768 = vmatprep.subr.bf16.mxu1 %v5790_v1 }
 0x701   :  { %v1021_v56 = vpack.c.bf16 %v1017_v57, %v1016_v58  ;;  %v5299_v20 = vpop.eup %5298  ;;  %v4982_v57 = vld [vmem:[%s6591_s12] ss:$8 sps:$4 sm:$0xff]   ;;  %v4987_v58 = vld [vmem:[%s6591_s12 + $0x14] ss:$8 sps:$4 sm:$0xff]  }
 0x702   :  { %v5301_v25 = vpop.eup %5300  ;;  %v1137_v40 = vmul.f32 %v5299_v20, %v5285_v28  ;;  %v4990_v20 = vld [vmem:[%s6591_s12 + $0x24] ss:$8 sps:$4 sm:$0xff]  }
 0x703   :  { %v1138_v59 = vmul.f32 %v5301_v25, %v5283_v27  ;;  %v4988_v25 = vld [vmem:[%s6591_s12 + $0x20] ss:$8 sps:$4 sm:$0xff]  }
 0x705   :  { %v1142_v60 = vpack.c.bf16 %v1138_v59, %v1137_v40  ;;  %v4993_v40 = vld [vmem:[%s6591_s12 + $0x34] ss:$8 sps:$4 sm:$0xff]   ;;  %v4991_v59 = vld [vmem:[%s6591_s12 + $0x30] ss:$8 sps:$4 sm:$0xff]  }
 0x70a   :  { %4759 = vmatmul.mubr.msk.bf16.vlgmr.msra.gmra.mrb[12].mxu1 %vm757_vm1, %v1021_v56  ;;  %v4985_v56 = vld [vmem:[%s6591_s12 + $0x10] ss:$8 sps:$4 sm:$0xff]  }
 0x70b   :  { %4769 = vmatpush3.bf16.msra.mxu1 %v1141_v49  ;;  %4770 = vmatprep.mubr.msk.bf16.mxu1 %vm5791_vm0, %v5790_v1 }
 0x70c   :  { %1534 = vmatprep.subr.bf16.mxu1 %v4984_v39 }
 0x716   :  { %4771 = vmatmul.mubr.msk.bf16.vlgmr.msra.gmra.mrb[12].mxu1 %vm757_vm1, %v1142_v60  ;;  %v4996_v60 = vld [vmem:[%s6591_s12 + $0x44] ss:$8 sps:$4 sm:$0xff]  }
 0x717   :  { %1566 = vmatprep.mubr.bf16.mxu1 %v5789_v0  ;;  %1535 = vmatpush1.bf16.msra.mxu1 %v4982_v57 }
 0x718   :  { %1536 = vmatprep.subr.bf16.mxu1 %v4987_v58 }
 0x71b   :  { %1537 = vmatpush1.bf16.msra.mxu1 %v4985_v56 }
 0x71c   :  { %1538 = vmatprep.subr.bf16.mxu1 %v4990_v20 }
 0x71f   :  { %1539 = vmatpush1.bf16.msra.mxu1 %v4988_v25 }
 0x720   :  { %1540 = vmatprep.subr.bf16.mxu1 %v4993_v40 }
 0x723   :  { %1541 = vmatpush1.bf16.msra.mxu1 %v4991_v59 }
 0x724   :  { %1542 = vmatprep.subr.bf16.mxu1 %v4996_v60 }
 0x727   :  { %1543 = vmatpush1.bf16.msra.mxu1 %v4994_v61 }
 0x7e9   :  { %v1180_v62 = vpop.f32.mrb[12].mxu1 }
 0x7ea   :  { %v4772_v63 = vpop.f32.mrb[13].mxu1 }
 0x7eb   :  { %v1183_v29 = vpop.f32.mrb[14].mxu1  ;;  %v4997_v63 = vld [vmem:[%s6591_s12 + $0x50] ss:$8 sps:$4 sm:$0xff]  }
 0x7ec   :  { %v1193_v36 = vpack.c.bf16 %v1183_v29, %v1180_v62  ;;  %v4773_v49 = vpop.f32.mrb[15].mxu1  ;;  %v4999_v62 = vld [vmem:[%s6591_s12 + $0x54] ss:$8 sps:$4 sm:$0xff]   ;;  %v5002_v29 = vld [vmem:[%s6591_s12 + $0x64] ss:$8 sps:$4 sm:$0xff]  }
 0x7ed   :  { %1544 = vmatprep.subr.bf16.mxu1 %v4999_v62  ;;  %v5005_v49 = vld [vmem:[%s6591_s12 + $0x74] ss:$8 sps:$4 sm:$0xff]  }
 0x7ee   :  { %4779 = vmatmul.mubr.msk.bf16.vlgmr.msra.gmra.mrb[20].mxu0 %vm462_vm4, %v1193_v36  ;;  %1545 = vmatpush1.bf16.msra.mxu1 %v4997_v63  ;;  %v5000_v36 = vld [vmem:[%s6591_s12 + $0x60] ss:$8 sps:$4 sm:$0xff]  }
 0x7ef   :  { %4786 = vmatprep.mubr.msk.bf16.mxu0 %vm5791_vm0, %v5790_v1  ;;  %4783 = vmatpush3.bf16.msra.mxu0 %v4980_v33  ;;  %v5035_v33 = vld [vmem:[#allocation18 + $0x94] ss:$8 sps:$4 sm:$0xff]  }
 0x7f0   :  { %4784 = vmatprep.subr.bf16.mxu0 %v5790_v1  ;;  %1546 = vmatprep.subr.bf16.mxu1 %v5002_v29 }
 0x7f2   :  { %1547 = vmatpush1.bf16.msra.mxu1 %v5000_v36 }
 0x7f3   :  { %4785 = vmatpush3.bf16.msra.mxu0 %v4981_v34  ;;  %1548 = vmatprep.subr.bf16.mxu1 %v5005_v49  ;;  %v5033_v34 = vld [vmem:[#allocation18 + $0x90] ss:$8 sps:$4 sm:$0xff]  }
 0x8c1   :  { %v1250_v3 = vpop.f32.mrb[20].mxu0 }
 0x8c2   :  { %v1251_v7 = vadd.f32 %v4267_v2, %v1250_v3  ;;  %v4780_v10 = vpop.f32.mrb[21].mxu0  ;;  %v5006_v3 = vld [vmem:[#allocation18] ss:$8 sps:$4 sm:$0xff]  }
 0x8c3   :  { %v1253_v9 = vpop.f32.mrb[22].mxu0  ;;  %v5011_v10 = vld [vmem:[#allocation18 + $0x14] ss:$8 sps:$4 sm:$0xff]  }
 0x8c4   :  { %v6267_v11 = vadd.f32 %v1251_v7, %v6093_v18  ;;  %v1254_v12 = vadd.f32 %v4267_v2, %v1253_v9  ;;  %v4781_v14 = vpop.f32.mrb[23].mxu0  ;;  %v5003_v2 = vld [vmem:[%s6591_s12 + $0x70] ss:$8 sps:$4 sm:$0xff]  }
 0x8c5   :  { %1549 = vmatpush1.bf16.msra.mxu1 %v5003_v2  ;;  %v5008_v7 = vld [vmem:[#allocation18 + $0x4] ss:$8 sps:$4 sm:$0xff]   ;;  %v5009_v9 = vld [vmem:[#allocation18 + $0x10] ss:$8 sps:$4 sm:$0xff]   ;;  %v5012_v14 = vld [vmem:[#allocation18 + $0x20] ss:$8 sps:$4 sm:$0xff]  }
 0x8c6   :  { %v6270_v15 = vadd.f32 %v1254_v12, %v6095_v21  ;;  %v1261_v16 = vsel %vm462_vm4, %v6267_v11, 0.0  ;;  %1787 = vmatprep.subr.bf16.mxu0 %v5008_v7  ;;  %v5014_v12 = vld [vmem:[#allocation18 + $0x24] ss:$8 sps:$4 sm:$0xff]  }
 0x8c7   :  { %1262 = vadd.xlane.f32.xlu1 %v1261_v16  ;;  %v5017_v16 = vld [vmem:[#allocation18 + $0x34] ss:$8 sps:$4 sm:$0xff]  }
 0x8c8   :  { %v1264_v19 = vsel %vm462_vm4, %v6270_v15, 0.0 }
 0x8c9   :  { %1265 = vadd.xlane.f32.xlu0 %v1264_v19  ;;  %v5015_v19 = vld [vmem:[#allocation18 + $0x30] ss:$8 sps:$4 sm:$0xff]  }
 0x954   :  { %v1263_v22 = vpop.xlane.xlu1 %1262 }
 0x955   :  { %v1267_v24 = vmul.f32 0.03125, %v1263_v22  ;;  %v5020_v22 = vld [vmem:[#allocation18 + $0x44] ss:$8 sps:$4 sm:$0xff]  }
 0x956   :  { %v1266_v26 = vpop.xlane.xlu0 %1265 }
 0x957   :  { %v1269_v18 = vsub.f32 %v6267_v11, %v1267_v24  ;;  %v1268_v27 = vmul.f32 0.03125, %v1266_v26  ;;  %v5018_v24 = vld [vmem:[#allocation18 + $0x40] ss:$8 sps:$4 sm:$0xff]   ;;  %v5023_v26 = vld [vmem:[#allocation18 + $0x54] ss:$8 sps:$4 sm:$0xff]  }
 0x959   :  { %v1270_v28 = vsub.f32 %v6270_v15, %v1268_v27  ;;  %v1271_v21 = vmul.f32 %v1269_v18, %v1269_v18  ;;  %v5026_v27 = vld [vmem:[#allocation18 + $0x64] ss:$8 sps:$4 sm:$0xff]  }
 0x95b   :  { %v1273_v30 = vsel %vm462_vm4, %v1271_v21, 0.0  ;;  %v1272_v31 = vmul.f32 %v1270_v28, %v1270_v28  ;;  %v5029_v21 = vld [vmem:[#allocation18 + $0x74] ss:$8 sps:$4 sm:$0xff]  }
 0x95c   :  { %1274 = vadd.xlane.f32.xlu1 %v1273_v30  ;;  %v5027_v30 = vld [vmem:[#allocation18 + $0x70] ss:$8 sps:$4 sm:$0xff]  }
 0x95d   :  { %v1276_v32 = vsel %vm462_vm4, %v1272_v31, 0.0  ;;  %v5032_v31 = vld [vmem:[#allocation18 + $0x84] ss:$8 sps:$4 sm:$0xff]  }
 0x95e   :  { %1277 = vadd.xlane.f32.xlu0 %v1276_v32  ;;  %v5030_v32 = vld [vmem:[#allocation18 + $0x80] ss:$8 sps:$4 sm:$0xff]  }
 0x9e9   :  { %v1275_v35 = vpop.xlane.xlu1 %1274 }
 0x9ea   :  { %v1279_v37 = vmul.f32 0.03125, %v1275_v35  ;;  %v5038_v35 = vld [vmem:[#allocation18 + $0xa4] ss:$8 sps:$4 sm:$0xff]  }
 0x9eb   :  { %v1278_v38 = vpop.xlane.xlu0 %1277 }
 0x9ec   :  { %v1281_v41 = vadd.f32 1e-05, %v1279_v37  ;;  %v1280_v42 = vmul.f32 0.03125, %v1278_v38  ;;  %v5036_v37 = vld [vmem:[#allocation18 + $0xa0] ss:$8 sps:$4 sm:$0xff]  }
 0x9ed   :  { %v5041_v38 = vld [vmem:[#allocation18 + $0xb4] ss:$8 sps:$4 sm:$0xff]  }
 0x9ee   :  { %5302 = vrsqrt.f32 %v1281_v41  ;;  %v1282_v43 = vadd.f32 1e-05, %v1280_v42  ;;  %v5039_v41 = vld [vmem:[#allocation18 + $0xb0] ss:$8 sps:$4 sm:$0xff]   ;;  %v5044_v42 = vld [vmem:[#allocation18 + $0xc4] ss:$8 sps:$4 sm:$0xff]  }
 0x9f0   :  { %5304 = vrsqrt.f32 %v1282_v43  ;;  %v5042_v43 = vld [vmem:[#allocation18 + $0xc0] ss:$8 sps:$4 sm:$0xff]  }
 0x9f8   :  { %v5303_v44 = vpop.eup %5302 }
 0x9f9   :  { %v1285_v46 = vmul.f32 %v5303_v44, %v1269_v18  ;;  %v5021_v18 = vld [vmem:[#allocation18 + $0x50] ss:$8 sps:$4 sm:$0xff]   ;;  %v5047_v44 = vld [vmem:[#allocation18 + $0xd4] ss:$8 sps:$4 sm:$0xff]  }
 0x9fa   :  { %v5305_v47 = vpop.eup %5304 }
 0x9fb   :  { %v1293_v48 = vmul.f32 %v4271_v45, %v1285_v46  ;;  %v1286_v50 = vmul.f32 %v5305_v47, %v1270_v28  ;;  %v5024_v28 = vld [vmem:[#allocation18 + $0x60] ss:$8 sps:$4 sm:$0xff]   ;;  %v4273_v46 = vld [vmem:[#allocation15] ss:$0 sm:$0xff] }
 0x9fd   :  { %v1294_v54 = vmul.f32 %v4271_v45, %v1286_v50  ;;  %v1301_v55 = vadd.f32 %v4272_v51, %v1293_v48  ;;  %v5045_v45 = vld [vmem:[#allocation18 + $0xd0] ss:$8 sps:$4 sm:$0xff]  }
 0x9ff   :  { %v1302_v17 = vadd.f32 %v4272_v51, %v1294_v54 }
 0xa01   :  { %v1307_v23 = vpack.c.bf16 %v1302_v17, %v1301_v55 }
 0xa03   :  { %4787 = vmatmul.mubr.msk.bf16.vlgmr.msra.gmra.mrb[24].mxu0 %vm462_vm4, %v1307_v23 }
 0xa04   :  { %1788 = vmatpush1.bf16.msra.mxu0 %v5006_v3 }
 0xa05   :  { %1789 = vmatprep.subr.bf16.mxu0 %v5011_v10 }
 0xa08   :  { %1790 = vmatpush1.bf16.msra.mxu0 %v5009_v9 }
 0xa09   :  { %1791 = vmatprep.subr.bf16.mxu0 %v5014_v12 }
 0xa0c   :  { %1792 = vmatpush1.bf16.msra.mxu0 %v5012_v14 }
 0xa0d   :  { %1793 = vmatprep.subr.bf16.mxu0 %v5017_v16 }
 0xa10   :  { %1794 = vmatpush1.bf16.msra.mxu0 %v5015_v19 }
 0xa11   :  { %1795 = vmatprep.subr.bf16.mxu0 %v5020_v22 }
 0xa14   :  { %1796 = vmatpush1.bf16.msra.mxu0 %v5018_v24 }
 0xa15   :  { %1797 = vmatprep.subr.bf16.mxu0 %v5023_v26 }
 0xa18   :  { %1798 = vmatpush1.bf16.msra.mxu0 %v5021_v18 }
 0xa19   :  { %1799 = vmatprep.subr.bf16.mxu0 %v5026_v27 }
 0xa1c   :  { %1800 = vmatpush1.bf16.msra.mxu0 %v5024_v28 }
 0xa1d   :  { %1801 = vmatprep.subr.bf16.mxu0 %v5029_v21 }
 0xa20   :  { %1802 = vmatpush1.bf16.msra.mxu0 %v5027_v30 }
 0xa21   :  { %1803 = vmatprep.subr.bf16.mxu0 %v5032_v31 }
 0xa24   :  { %1804 = vmatpush1.bf16.msra.mxu0 %v5030_v32 }
 0xa25   :  { %1805 = vmatprep.subr.bf16.mxu0 %v5035_v33 }
 0xa28   :  { %1806 = vmatpush1.bf16.msra.mxu0 %v5033_v34 }
 0xa29   :  { %1807 = vmatprep.subr.bf16.mxu0 %v5038_v35  ;;  %v5792_v35 = vmov -1.0  }
 0xa2c   :  { %1808 = vmatpush1.bf16.msra.mxu0 %v5036_v37 }
 0xa2d   :  { %1809 = vmatprep.subr.bf16.mxu0 %v5041_v38 }
 0xa30   :  { %1810 = vmatpush1.bf16.msra.mxu0 %v5039_v41 }
 0xa31   :  { %1811 = vmatprep.subr.bf16.mxu0 %v5044_v42 }
 0xa34   :  { %1812 = vmatpush1.bf16.msra.mxu0 %v5042_v43 }
 0xa35   :  { %1813 = vmatprep.subr.bf16.mxu0 %v5047_v44 }
 0xa38   :  { %1814 = vmatpush1.bf16.msra.mxu0 %v5045_v45 }
 0xad6   :  { %v1364_v47 = vpop.f32.mrb[24].mxu0 }
 0xad7   :  { %v1365_v48 = vadd.f32 %v4273_v46, %v1364_v47  ;;  %v4788_v50 = vpop.f32.mrb[25].mxu0 }
 0xad8   :  { %v1367_v51 = vpop.f32.mrb[26].mxu0 }
 0xad9   :  { %v1373_v54 = vmul.f32 0.70710677, %v1365_v48  ;;  %v1368_v55 = vadd.f32 %v4273_v46, %v1367_v51  ;;  %v4789_v17 = vpop.f32.mrb[27].mxu0  ;;  %v1371_v46 = vmul.f32 0.5, %v1365_v48  ;;  %v5057_v48 = vld [vmem:[#allocation21 + $0x10] ss:$8 sps:$4 sm:$0xff]  }
 0xadb   :  { %v1379_v23 = vand.u32 2147483647, %v1373_v54  ;;  %v1374_v39 = vmul.f32 0.70710677, %v1368_v55  ;;  %vm1375_vm3 = vcmp.ge.f32.partialorder %v1373_v54, 0.0  ;;  %v1372_v47 = vmul.f32 0.5, %v1368_v55 }
 0xadc   :  { %v1377_v37 = vsel %vm1375_vm3, 1.0, %v5792_v35  ;;  %v5062_v55 = vld [vmem:[#allocation21 + $0x24] ss:$8 sps:$4 sm:$0xff]  }
 0xadd   :  { %v1381_v57 = vmul.f32 0.3275911, %v1379_v23  ;;  %v1380_v58 = vand.u32 2147483647, %v1374_v39  ;;  %v1407_v40 = vsub.f32 0.0, %v1379_v23  ;;  %vm1376_vm5 = vcmp.ge.f32.partialorder %v1374_v39, 0.0 }
 0xade   :  { %v1378_v43 = vsel %vm1376_vm5, 1.0, %v5792_v35  ;;  %v5053_v39 = vld [vmem:[#allocation18 + $0xf4] ss:$8 sps:$4 sm:$0xff]  }
 0xadf   :  { %v1383_v56 = vadd.f32 1.0, %v1381_v57  ;;  %v1382_v20 = vmul.f32 0.3275911, %v1380_v58  ;;  %v1408_v59 = vsub.f32 0.0, %v1380_v58  ;;  %v1409_v61 = vmul.f32 %v1407_v40, %v1379_v23  ;;  %v5050_v23 = vld [vmem:[#allocation18 + $0xe4] ss:$8 sps:$4 sm:$0xff]  }
 0xae0   :  { %v5048_v57 = vld [vmem:[#allocation18 + $0xe0] ss:$8 sps:$4 sm:$0xff]   ;;  %1815 = vmatprep.subr.bf16.mxu0 %v5050_v23  ;;  %v5060_v40 = vld [vmem:[#allocation21 + $0x20] ss:$8 sps:$4 sm:$0xff]  }
 0xae1   :  { %5306 = vrcp.f32 %v1383_v56  ;;  %v1384_v25 = vadd.f32 1.0, %v1382_v20  ;;  %v1410_v36 = vmul.f32 %v1408_v59, %v1380_v58  ;;  %v1411_v49 = vmul.f32 1.442695, %v1409_v61  ;;  %1816 = vmatpush1.bf16.msra.mxu0 %v5048_v57  ;;  %v5051_v58 = vld [vmem:[#allocation18 + $0xf0] ss:$8 sps:$4 sm:$0xff]  }
 0xae2   :  { %1817 = vmatprep.subr.bf16.mxu0 %v5053_v39  ;;  %v5054_v56 = vld [vmem:[#allocation21] ss:$8 sps:$4 sm:$0xff]   ;;  %v5056_v20 = vld [vmem:[#allocation21 + $0x4] ss:$8 sps:$4 sm:$0xff]   ;;  %v5065_v59 = vld [vmem:[#allocation21 + $0x34] ss:$8 sps:$4 sm:$0xff]  }
 0xae3   :  { %5308 = vrcp.f32 %v1384_v25  ;;  %v1413_v9 = vmul.f32 1.442695, %v1410_v36  ;;  %v5059_v25 = vld [vmem:[#allocation21 + $0x14] ss:$8 sps:$4 sm:$0xff]   ;;  %2040 = vmatprep.subr.bf16.mxu1 %v5056_v20  ;;  %v5068_v61 = vld [vmem:[#allocation21 + $0x44] ss:$8 sps:$4 sm:$0xff]  }
 0xae4   :  { %5310 = vpow2.f32 %v1411_v49  ;;  %v5074_v36 = vld [vmem:[#allocation21 + $0x64] ss:$8 sps:$4 sm:$0xff]   ;;  %v5072_v49 = vld [vmem:[#allocation21 + $0x60] ss:$8 sps:$4 sm:$0xff]   ;;  %v5099_v57 = vld [vmem:[#allocation21 + $0xf0] ss:$8 sps:$4 sm:$0xff]  }
 0xae5   :  { %5312 = vpow2.f32 %v1413_v9  ;;  %1818 = vmatpush1.bf16.msra.mxu0 %v5051_v58  ;;  %v5083_v9 = vld [vmem:[#allocation21 + $0x94] ss:$8 sps:$4 sm:$0xff]   ;;  %v5096_v23 = vld [vmem:[#allocation21 + $0xe0] ss:$8 sps:$4 sm:$0xff]  }
 0xae6   :  { %v5101_v58 = vld [vmem:[#allocation21 + $0xf4] ss:$8 sps:$4 sm:$0xff]   ;;  %v5102_v39 = vld [vmem:[%s6592_s14 + $0x40] sm:$0xff]  }
 0xae7   :  { %v5104_v20 = vld [vmem:[%s6592_s14 + $0x48] sm:$0xff]   ;;  %4612 = vmatprep.subr.bf16.mxu0 %v5102_v39 }
 0xaeb   :  { %v5307_v60 = vpop.eup %5306 }
 0xaec   :  { %v1389_v62 = vmul.f32 1.0614054, %v5307_v60 }
 0xaed   :  { %v5309_v63 = vpop.eup %5308 }
 0xaee   :  { %v1391_v29 = vadd.f32 -1.4531521, %v1389_v62  ;;  %v1390_v2 = vmul.f32 1.0614054, %v5309_v63  ;;  %v5311_v21 = vpop.eup %5310  ;;  %v5066_v62 = vld [vmem:[#allocation21 + $0x40] ss:$8 sps:$4 sm:$0xff]  }
 0xaef   :  { %v5313_v33 = vpop.eup %5312 }
 0xaf0   :  { %v1393_v3 = vmul.f32 %v5307_v60, %v1391_v29  ;;  %v1392_v7 = vadd.f32 -1.4531521, %v1390_v2  ;;  %v5069_v29 = vld [vmem:[#allocation21 + $0x50] ss:$8 sps:$4 sm:$0xff]   ;;  %v5077_v2 = vld [vmem:[#allocation21 + $0x74] ss:$8 sps:$4 sm:$0xff]  }
 0xaf2   :  { %v1395_v10 = vadd.f32 1.4214138, %v1393_v3  ;;  %v1394_v12 = vmul.f32 %v5309_v63, %v1392_v7  ;;  %v5075_v3 = vld [vmem:[#allocation21 + $0x70] ss:$8 sps:$4 sm:$0xff]   ;;  %v5080_v7 = vld [vmem:[#allocation21 + $0x84] ss:$8 sps:$4 sm:$0xff]  }
 0xaf4   :  { %v1397_v14 = vmul.f32 %v5307_v60, %v1395_v10  ;;  %v1396_v16 = vadd.f32 1.4214138, %v1394_v12  ;;  %v5078_v10 = vld [vmem:[#allocation21 + $0x80] ss:$8 sps:$4 sm:$0xff]   ;;  %v5081_v12 = vld [vmem:[#allocation21 + $0x90] ss:$8 sps:$4 sm:$0xff]  }
 0xaf6   :  { %v1399_v19 = vadd.f32 -0.28449672, %v1397_v14  ;;  %v1398_v22 = vmul.f32 %v5309_v63, %v1396_v16  ;;  %v5086_v14 = vld [vmem:[#allocation21 + $0xa4] ss:$8 sps:$4 sm:$0xff]   ;;  %v5084_v16 = vld [vmem:[#allocation21 + $0xa0] ss:$8 sps:$4 sm:$0xff]  }
 0xaf8   :  { %v1401_v24 = vmul.f32 %v5307_v60, %v1399_v19  ;;  %v1400_v26 = vadd.f32 -0.28449672, %v1398_v22  ;;  %v5089_v19 = vld [vmem:[#allocation21 + $0xb4] ss:$8 sps:$4 sm:$0xff]   ;;  %v5087_v22 = vld [vmem:[#allocation21 + $0xb0] ss:$8 sps:$4 sm:$0xff]  }
 0xafa   :  { %v1403_v18 = vadd.f32 0.2548296, %v1401_v24  ;;  %v1402_v27 = vmul.f32 %v5309_v63, %v1400_v26  ;;  %v5092_v24 = vld [vmem:[#allocation21 + $0xc4] ss:$8 sps:$4 sm:$0xff]   ;;  %v5090_v26 = vld [vmem:[#allocation21 + $0xc0] ss:$8 sps:$4 sm:$0xff]  }
 0xafc   :  { %v1405_v28 = vmul.f32 %v5307_v60, %v1403_v18  ;;  %v1404_v30 = vadd.f32 0.2548296, %v1402_v27  ;;  %v5063_v60 = vld [vmem:[#allocation21 + $0x30] ss:$8 sps:$4 sm:$0xff]   ;;  %v5095_v18 = vld [vmem:[#allocation21 + $0xd4] ss:$8 sps:$4 sm:$0xff]  }
 0xafd   :  { %v5093_v27 = vld [vmem:[#allocation21 + $0xd0] ss:$8 sps:$4 sm:$0xff]  }
 0xafe   :  { %v1415_v31 = vmul.f32 %v5311_v21, %v1405_v28  ;;  %v1406_v32 = vmul.f32 %v5309_v63, %v1404_v30  ;;  %v5071_v63 = vld [vmem:[#allocation21 + $0x54] ss:$8 sps:$4 sm:$0xff]   ;;  %v1445_v28 = vshrl.u32 %v342_v8, 7  ;;  %v1442_v30 = vld [vmem:[#allocation16] sm:$0x3] }
 0xb00   :  { %v1417_v34 = vsub.f32 1.0, %v1415_v31  ;;  %v1416_v38 = vmul.f32 %v5313_v33, %v1406_v32  ;;  %v6303_v21 = vsub.s32 0, %v1445_v28  ;;  %v6305_v31 = vsub.s32 1, %v1445_v28  ;;  %v5114_v28 = vld [vmem:[%s6592_s14 + $0x70] sm:$0xff]  }
 0xb02   :  { %v1419_v41 = vmul.f32 %v1417_v34, %v1377_v37  ;;  %v1418_v42 = vsub.f32 1.0, %v1416_v38  ;;  %v1447_v32 = vrot.slane %v1442_v30, %v6303_v21  ;;  %v1451_v33 = vrot.slane %v1442_v30, %v6305_v31  ;;  %v5115_v30 = vld [vmem:[%s6592_s14 + $0x30] sm:$0xff]  }
 0xb04   :  { %v1421_v44 = vadd.f32 1.0, %v1419_v41  ;;  %v1420_v45 = vmul.f32 %v1418_v42, %v1378_v43 }
 0xb06   :  { %v1422_v50 = vadd.f32 1.0, %v1420_v45  ;;  %v1423_v51 = vmul.f32 %v1421_v44, %v1371_v46 }
 0xb08   :  { %v1424_v54 = vmul.f32 %v1422_v50, %v1372_v47 }
 0xb0a   :  { %v1441_v17 = vpack.c.bf16 %v1424_v54, %v1423_v51 }
 0xb0c   :  { %1567 = vmatmul.mubr.bf16.vlgmr.msra.gmra.mrb[16].mxu1 %v1441_v17  ;;  %v5098_v17 = vld [vmem:[#allocation21 + $0xe4] ss:$8 sps:$4 sm:$0xff]  }
 0xb0d   :  { %2041 = vmatpush1.bf16.msra.mxu1 %v5054_v56  ;;  %v5103_v56 = vld [vmem:[%s6592_s14] sm:$0xff]  }
 0xb0e   :  { %2042 = vmatprep.subr.bf16.mxu1 %v5059_v25  ;;  %v5105_v25 = vld [vmem:[%s6592_s14 + $0x8] sm:$0xff]  }
 0xb11   :  { %2043 = vmatpush1.bf16.msra.mxu1 %v5057_v48  ;;  %v5106_v48 = vld [vmem:[%s6592_s14 + $0x50] sm:$0xff]  }
 0xb12   :  { %2044 = vmatprep.subr.bf16.mxu1 %v5062_v55  ;;  %v5107_v55 = vld [vmem:[%s6592_s14 + $0x10] sm:$0xff]  }
 0xb15   :  { %2045 = vmatpush1.bf16.msra.mxu1 %v5060_v40  ;;  %v5108_v40 = vld [vmem:[%s6592_s14 + $0x58] sm:$0xff]  }
 0xb16   :  { %2046 = vmatprep.subr.bf16.mxu1 %v5065_v59  ;;  %v5109_v59 = vld [vmem:[%s6592_s14 + $0x18] sm:$0xff]  }
 0xb19   :  { %2047 = vmatpush1.bf16.msra.mxu1 %v5063_v60  ;;  %v5110_v60 = vld [vmem:[%s6592_s14 + $0x60] sm:$0xff]  }
 0xb1a   :  { %2048 = vmatprep.subr.bf16.mxu1 %v5068_v61  ;;  %v5111_v61 = vld [vmem:[%s6592_s14 + $0x20] sm:$0xff]  }
 0xb1d   :  { %2049 = vmatpush1.bf16.msra.mxu1 %v5066_v62  ;;  %v5112_v62 = vld [vmem:[%s6592_s14 + $0x68] sm:$0xff]  }
 0xb1e   :  { %2050 = vmatprep.subr.bf16.mxu1 %v5071_v63  ;;  %v5113_v63 = vld [vmem:[%s6592_s14 + $0x28] sm:$0xff]  }
 0xb21   :  { %2051 = vmatpush1.bf16.msra.mxu1 %v5069_v29  ;;  %v1615_v29 = vld [vmem:[#allocation19] sm:$0x3] }
 0xb22   :  { %2052 = vmatprep.subr.bf16.mxu1 %v5074_v36  ;;  %v1620_v36 = vrot.slane %v1615_v29, %v6303_v21 }
 0xb25   :  { %2053 = vmatpush1.bf16.msra.mxu1 %v5072_v49  ;;  %v1624_v49 = vrot.slane %v1615_v29, %v6305_v31 }
 0xb26   :  { %2054 = vmatprep.subr.bf16.mxu1 %v5077_v2 }
 0xb29   :  { %2055 = vmatpush1.bf16.msra.mxu1 %v5075_v3 }
 0xb2a   :  { %2056 = vmatprep.subr.bf16.mxu1 %v5080_v7 }
 0xb2d   :  { %2057 = vmatpush1.bf16.msra.mxu1 %v5078_v10 }
 0xb2e   :  { %2058 = vmatprep.subr.bf16.mxu1 %v5083_v9 }
 0xb31   :  { %2059 = vmatpush1.bf16.msra.mxu1 %v5081_v12 }
 0xb32   :  { %2060 = vmatprep.subr.bf16.mxu1 %v5086_v14 }
 0xb35   :  { %2061 = vmatpush1.bf16.msra.mxu1 %v5084_v16 }
 0xb36   :  { %2062 = vmatprep.subr.bf16.mxu1 %v5089_v19 }
 0xb39   :  { %2063 = vmatpush1.bf16.msra.mxu1 %v5087_v22 }
 0xb3a   :  { %2064 = vmatprep.subr.bf16.mxu1 %v5092_v24 }
 0xb3d   :  { %2065 = vmatpush1.bf16.msra.mxu1 %v5090_v26 }
 0xb3e   :  { %2066 = vmatprep.subr.bf16.mxu1 %v5095_v18 }
 0xb41   :  { %2067 = vmatpush1.bf16.msra.mxu1 %v5093_v27 }
 0xb42   :  { %2068 = vmatprep.subr.bf16.mxu1 %v5098_v17  ;;  %v4357_v17 = vld [vmem:[#allocation24] ss:$0 sm:$0xff] }
 0xb45   :  { %2069 = vmatpush1.bf16.msra.mxu1 %v5096_v23 }
 0xb46   :  { %2070 = vmatprep.subr.bf16.mxu1 %v5101_v58 }
 0xb49   :  { %2071 = vmatpush1.bf16.msra.mxu1 %v5099_v57 }
 0xb4a   :  { %4790 = vmatprep.subr.bf16.mxu1 %v5790_v1 }
 0xbdf   :  { %v1568_v34 = vpop.f32.mrb[16].mxu1 }
 0xbe0   :  { %v1569_v37 = vadd.f32 %v1568_v34, %v1447_v32  ;;  %v1570_v38 = vpop.f32.mrb[17].mxu1  ;;  %v1868_v34 = vld [vmem:[#allocation22] sm:$0x3] }
 0xbe1   :  { %v1571_v41 = vadd.f32 %v1570_v38, %v1451_v33  ;;  %v1572_v42 = vpop.f32.mrb[18].mxu1 }
 0xbe2   :  { %v1573_v43 = vadd.f32 %v1572_v42, %v1447_v32  ;;  %v1574_v44 = vpop.f32.mrb[19].mxu1  ;;  %v1577_v46 = vmax.f32 %v1569_v37, 0.0  ;;  %v5116_v32 = vld [vmem:[%s6592_s14 + $0x78] sm:$0xff]   ;;  %v1873_v37 = vrot.slane %v1868_v34, %v6303_v21 }
 0xbe3   :  { %v1575_v45 = vadd.f32 %v1574_v44, %v1451_v33  ;;  %v1578_v47 = vmax.f32 %v1571_v41, 0.0  ;;  %v5117_v33 = vld [vmem:[%s6592_s14 + $0x38] sm:$0xff]   ;;  %v1877_v41 = vrot.slane %v1868_v34, %v6305_v31 }
 0xbe4   :  { %v1579_v8 = vmax.f32 %v1573_v43, 0.0 }
 0xbe5   :  { %v1580_v50 = vmax.f32 %v1575_v45, 0.0 }
 0xbe6   :  { %v1613_v51 = vpack.c.bf16 %v1579_v8, %v1577_v46 }
 0xbe7   :  { %v1614_v54 = vpack.c.bf16 %v1580_v50, %v1578_v47 }
 0xbe9   :  { %1819 = vmatprep.mubr.bf16.mxu0 %v1614_v54 }
 0xbea   :  { %1820 = vmatmul.mubr.bf16.vlgmr.msra.gmra.mrb[28].mxu0 %v1613_v51 }
 0xbeb   :  { %4613 = vmatpush3.bf16.msra.mxu0 %v5103_v56 }
 0xbec   :  { %4614 = vmatprep.subr.bf16.mxu0 %v5104_v20 }
 0xbef   :  { %4615 = vmatpush3.bf16.msra.mxu0 %v5105_v25 }
 0xbf0   :  { %4616 = vmatprep.subr.bf16.mxu0 %v5106_v48 }
 0xbf3   :  { %4617 = vmatpush3.bf16.msra.mxu0 %v5107_v55 }
 0xbf4   :  { %4618 = vmatprep.subr.bf16.mxu0 %v5108_v40 }
 0xbf7   :  { %4619 = vmatpush3.bf16.msra.mxu0 %v5109_v59 }
 0xbf8   :  { %4620 = vmatprep.subr.bf16.mxu0 %v5110_v60 }
 0xbfb   :  { %4621 = vmatpush3.bf16.msra.mxu0 %v5111_v61 }
 0xbfc   :  { %4622 = vmatprep.subr.bf16.mxu0 %v5112_v62 }
 0xbff   :  { %4623 = vmatpush3.bf16.msra.mxu0 %v5113_v63 }
 0xc00   :  { %4624 = vmatprep.subr.bf16.mxu0 %v5114_v28 }
 0xc03   :  { %4625 = vmatpush3.bf16.msra.mxu0 %v5115_v30 }
 0xc04   :  { %4626 = vmatprep.subr.bf16.mxu0 %v5116_v32 }
 0xc07   :  { %4627 = vmatpush3.bf16.msra.mxu0 %v5117_v33  ;;  %v4375_v33 = vld [vmem:[#allocation4 + $0x1] ss:$0 sm:$0xff] }
 0xc08   :  { %4798 = vmatprep.subr.bf16.mxu0 %v5790_v1 }
 0xcbd   :  { %v1821_v2 = vpop.f32.mrb[28].mxu0 }
 0xcbe   :  { %v1822_v3 = vadd.f32 %v1821_v2, %v1620_v36  ;;  %v1823_v7 = vpop.f32.mrb[29].mxu0 }
 0xcbf   :  { %v1824_v10 = vadd.f32 %v1823_v7, %v1624_v49  ;;  %v1825_v9 = vpop.f32.mrb[30].mxu0  ;;  %v5119_v7 = vld [vmem:[%s6587_s7 + $0x10] sm:$0xff]  }
 0xcc0   :  { %v1826_v12 = vadd.f32 %v1825_v9, %v1620_v36  ;;  %v1827_v14 = vpop.f32.mrb[31].mxu0  ;;  %v1830_v19 = vmax.f32 %v1822_v3, 0.0  ;;  %v5118_v3 = vld [vmem:[%s6585_s24 + $0x10] sm:$0xff]   ;;  %v5121_v9 = vld [vmem:[%s6587_s7 + $0x18] sm:$0xff]  }
 0xcc1   :  { %v1828_v16 = vadd.f32 %v1827_v14, %v1624_v49  ;;  %v1831_v24 = vmax.f32 %v1824_v10, 0.0  ;;  %v5120_v10 = vld [vmem:[%s6585_s24 + $0x18] sm:$0xff]  }
 0xcc2   :  { %v1832_v22 = vmax.f32 %v1826_v12, 0.0 }
 0xcc3   :  { %v1833_v26 = vmax.f32 %v1828_v16, 0.0 }
 0xcc4   :  { %v1866_v18 = vpack.c.bf16 %v1832_v22, %v1830_v19 }
 0xcc5   :  { %v1867_v27 = vpack.c.bf16 %v1833_v26, %v1831_v24 }
 0xcc7   :  { %2072 = vmatprep.mubr.bf16.mxu1 %v1867_v27 }
 0xcc8   :  { %2073 = vmatmul.mubr.bf16.vlgmr.msra.gmra.mrb[20].mxu1 %v1866_v18  ;;  %v4374_v18 = vld [vmem:[#allocation2 + $0x1] ss:$0 sm:$0xff] }
 0xcc9   :  { %4794 = vmatprep.mubr.msk.bf16.mxu1 %vm5791_vm0, %v5790_v1  ;;  %4791 = vmatpush3.bf16.msra.mxu1 %v5118_v3 }
 0xcca   :  { %4792 = vmatprep.subr.bf16.mxu1 %v5790_v1 }
 0xccd   :  { %4793 = vmatpush3.bf16.msra.mxu1 %v5120_v10 }
 0xcce   :  { %4806 = vmatprep.subr.bf16.mxu1 %v5790_v1 }
 0xd9b   :  { %v2074_v38 = vpop.f32.mrb[20].mxu1 }
 0xd9c   :  { %v2076_v42 = vpop.f32.mrb[21].mxu1  ;;  %v2075_v44 = vadd.f32 %v2074_v38, %v1873_v37 }
 0xd9d   :  { %v2078_v43 = vpop.f32.mrb[22].mxu1  ;;  %v2077_v8 = vadd.f32 %v2076_v42, %v1877_v41 }
 0xd9e   :  { %v2079_v45 = vadd.f32 %v2078_v43, %v1873_v37  ;;  %v2080_v46 = vpop.f32.mrb[23].mxu1  ;;  %v5123_v43 = vld [vmem:[%s6586_s2 + $0x18] sm:$0xff]  }
 0xd9f   :  { %v2081_v47 = vadd.f32 %v2080_v46, %v1877_v41  ;;  %v5122_v41 = vld [vmem:[%s6586_s2 + $0x10] sm:$0xff]  }
 0xda0   :  { %v2115_v50 = vpack.c.bf16 %v2079_v45, %v2075_v44  ;;  %v4380_v44 = vld [vmem:[#allocation6 + $0x1] ss:$0 sm:$0xff] }
 0xda1   :  { %v2116_v51 = vpack.c.bf16 %v2081_v47, %v2077_v8  ;;  %v4388_v47 = vld [vmem:[#allocation7 + $0x1] ss:$0 sm:$0xff] }
 0xda3   :  { %2252 = vmatprep.mubr.bf16.mxu0 %v2116_v51 }
 0xda4   :  { %2253 = vmatmul.mubr.bf16.vlgmr.msra.gmra.mrb[32].mxu0 %v2115_v50 }
 0xda5   :  { %4802 = vmatprep.mubr.msk.bf16.mxu0 %vm5791_vm0, %v5790_v1  ;;  %4799 = vmatpush3.bf16.msra.mxu0 %v5119_v7 }
 0xda6   :  { %4800 = vmatprep.subr.bf16.mxu0 %v5790_v1 }
 0xda9   :  { %4801 = vmatpush3.bf16.msra.mxu0 %v5121_v9 }
 0xdaa   :  { %4814 = vmatprep.subr.bf16.mxu0 %v5790_v1 }
 0xe77   :  { %v4628_v54 = vpop.f32.mrb[32].mxu0 }
 0xe78   :  { %v4629_v23 = vpop.f32.mrb[33].mxu0 }
 0xe79   :  { %v4630_v57 = vadd.f32 %v4629_v23, %v4628_v54  ;;  %v4631_v58 = vpop.f32.mrb[34].mxu0 }
 0xe7a   :  { %v4632_v39 = vpop.f32.mrb[35].mxu0 }
 0xe7b   :  { %v2255_v56 = vadd.f32 %v4630_v57, %v4357_v17  ;;  %v4633_v20 = vadd.f32 %v4632_v39, %v4631_v58 }
 0xe7d   :  { %v6336_v25 = vadd.f32 %v2255_v56, %v6267_v11  ;;  %v2258_v48 = vadd.f32 %v4633_v20, %v4357_v17 }
 0xe7f   :  { %v6339_v55 = vadd.f32 %v2258_v48, %v6270_v15  ;;  %v2267_v40 = vsel %vm462_vm4, %v6336_v25, 0.0 }
 0xe80   :  { %2268 = vadd.xlane.f32.xlu1 %v2267_v40 }
 0xe81   :  { %v2270_v59 = vsel %vm462_vm4, %v6339_v55, 0.0 }
 0xe82   :  { %2271 = vadd.xlane.f32.xlu0 %v2270_v59  ;;  %v4396_v59 = vld [vmem:[#allocation9 + $0x1] ss:$0 sm:$0xff] }
 0xf0d   :  { %v2269_v60 = vpop.xlane.xlu1 %2268 }
 0xf0e   :  { %v2273_v61 = vmul.f32 0.03125, %v2269_v60 }
 0xf0f   :  { %v2272_v11 = vpop.xlane.xlu0 %2271 }
 0xf10   :  { %v2275_v62 = vsub.f32 %v6336_v25, %v2273_v61  ;;  %v2274_v63 = vmul.f32 0.03125, %v2272_v11 }
 0xf12   :  { %v2276_v15 = vsub.f32 %v6339_v55, %v2274_v63  ;;  %v2277_v29 = vmul.f32 %v2275_v62, %v2275_v62 }
 0xf14   :  { %v2279_v36 = vsel %vm462_vm4, %v2277_v29, 0.0  ;;  %v2278_v49 = vmul.f32 %v2276_v15, %v2276_v15 }
 0xf15   :  { %2280 = vadd.xlane.f32.xlu1 %v2279_v36 }
 0xf16   :  { %v2282_v2 = vsel %vm462_vm4, %v2278_v49, 0.0 }
 0xf17   :  { %2283 = vadd.xlane.f32.xlu0 %v2282_v2 }
 0xfa2   :  { %v2281_v12 = vpop.xlane.xlu1 %2280 }
 0xfa3   :  { %v2285_v14 = vmul.f32 0.03125, %v2281_v12 }
 0xfa4   :  { %v2284_v16 = vpop.xlane.xlu0 %2283 }
 0xfa5   :  { %v2287_v19 = vadd.f32 1e-05, %v2285_v14  ;;  %v2286_v22 = vmul.f32 0.03125, %v2284_v16 }
 0xfa7   :  { %5314 = vrsqrt.f32 %v2287_v19  ;;  %v2288_v24 = vadd.f32 1e-05, %v2286_v22 }
 0xfa9   :  { %5316 = vrsqrt.f32 %v2288_v24 }
 0xfb1   :  { %v5315_v26 = vpop.eup %5314 }
 0xfb2   :  { %v2291_v27 = vmul.f32 %v5315_v26, %v2275_v62 }
 0xfb3   :  { %v5317_v28 = vpop.eup %5316 }
 0xfb4   :  { %v2299_v30 = vmul.f32 %v4374_v18, %v2291_v27  ;;  %v2292_v32 = vmul.f32 %v5317_v28, %v2276_v15 }
 0xfb6   :  { %v2300_v34 = vmul.f32 %v4374_v18, %v2292_v32  ;;  %v2307_v37 = vadd.f32 %v4375_v33, %v2299_v30 }
 0xfb8   :  { %v2308_v38 = vadd.f32 %v4375_v33, %v2300_v34 }
 0xfba   :  { %v2314_v42 = vpack.c.bf16 %v2308_v38, %v2307_v37 }
 0xfbc   :  { %4795 = vmatmul.mubr.msk.bf16.vlgmr.msra.gmra.mrb[24].mxu1 %vm462_vm4, %v2314_v42  ;;  %4803 = vmatmul.mubr.msk.bf16.vlgmr.msra.gmra.mrb[36].mxu0 %vm462_vm4, %v2314_v42 }
 0xfbd   :  { %4807 = vmatpush3.bf16.msra.mxu1 %v5122_v41  ;;  %4810 = vmatprep.mubr.msk.bf16.mxu1 %vm5791_vm0, %v5790_v1 }
 0xfbe   :  { %4808 = vmatprep.subr.bf16.mxu1 %v5790_v1  ;;  %4816 = vmatprep.mubr.msk.bf16.mxu0 %vm5791_vm0, %v5790_v1 }
 0xfc1   :  { %4809 = vmatpush3.bf16.msra.mxu1 %v5123_v43 }
 0xfc2   :  { %4820 = vmatprep.subr.bf16.mxu1 %v5790_v1 }
 0xfc4   :  { %4811 = vmatmul.mubr.msk.bf16.vlgmr.msra.gmra.mrb[28].mxu1 %vm462_vm4, %v2314_v42 }
 0xfc5   :  { %4822 = vmatprep.mubr.msk.bf16.mxu1 %vm5791_vm0, %v5790_v1 }
0x108f   :  { %v2372_v45 = vpop.f32.mrb[24].mxu1  ;;  %v2440_v46 = vpop.f32.mrb[36].mxu0 }
0x1090   :  { %v2373_v8 = vadd.f32 %v4380_v44, %v2372_v45  ;;  %v4796_v50 = vpop.f32.mrb[25].mxu1  ;;  %v4804_v51 = vpop.f32.mrb[37].mxu0  ;;  %v2441_v20 = vadd.f32 %v4388_v47, %v2440_v46 }
0x1091   :  { %v2375_v54 = vpop.f32.mrb[26].mxu1  ;;  %v2443_v17 = vpop.f32.mrb[38].mxu0 }
0x1092   :  { %v2379_v23 = vmul.f32 0.35355338, %v2373_v8  ;;  %v2376_v57 = vadd.f32 %v4380_v44, %v2375_v54  ;;  %v2444_v58 = vadd.f32 %v4388_v47, %v2443_v17  ;;  %v4797_v39 = vpop.f32.mrb[27].mxu1  ;;  %v4805_v56 = vpop.f32.mrb[39].mxu0 }
0x1094   :  { %v2380_v48 = vmul.f32 0.35355338, %v2376_v57  ;;  %v2513_v40 = vpack.c.bf16 %v2444_v58, %v2441_v20  ;;  %v2514_v60 = vmul.f32 %v6134_v4, %v2379_v23  ;;  %v2592_v61 = vmul.f32 %v6137_v5, %v2379_v23 }
0x1095   :  { %v2755_v11 = vmul.f32 %v6140_v6, %v2379_v23  ;;  %v2876_v62 = vmul.f32 %v6143_v13, %v2379_v23 }
0x1096   :  { %v2515_v63 = vmul.f32 %v6134_v4, %v2380_v48  ;;  %v2593_v15 = vmul.f32 %v6137_v5, %v2380_v48  ;;  %v2756_v29 = vmul.f32 %v6140_v6, %v2380_v48  ;;  %v2877_v36 = vmul.f32 %v6143_v13, %v2380_v48 }
0x1097   :  { %v2506_v49 = vpop.f32.mrb[28].mxu1  ;;  %v2521_v3 = vsel %vm462_vm4, %v2513_v40, 0 }
0x1098   :  { %v2507_v2 = vadd.f32 %v4396_v59, %v2506_v49  ;;  %v4812_v7 = vpop.f32.mrb[29].mxu1  ;;  %v2516_v10 = vpack.c.bf16 %v2515_v63, %v2514_v60  ;;  %v2594_v9 = vpack.c.bf16 %v2593_v15, %v2592_v61  ;;  %v2757_v12 = vpack.c.bf16 %v2756_v29, %v2755_v11  ;;  %4815 = vmatpush3.bf16.xpose.msra.mxu0 %v2521_v3 }
0x1099   :  { %v2878_v14 = vpack.c.bf16 %v2877_v36, %v2876_v62  ;;  %v2509_v16 = vpop.f32.mrb[30].mxu1  ;;  %4821 = vmatpush3.bf16.xpose.msra.mxu1 %v2521_v3  ;;  %4826 = vmatprep.subr.bf16.mxu0 %v5790_v1 }
0x109a   :  { %v4813_v19 = vpop.f32.mrb[31].mxu1  ;;  %v2510_v22 = vadd.f32 %v4396_v59, %v2509_v16  ;;  %4838 = vmatprep.subr.bf16.mxu1 %v5790_v1  ;;  %v6382_v24 = vmul.f32 %v6134_v4, %v2507_v2  ;;  %v2663_v26 = vmul.f32 %v6137_v5, %v2507_v2  ;;  %v6386_v18 = vmul.f32 %v6140_v6, %v2507_v2 }
0x109b   :  { %v6389_v27 = vmul.f32 %v6143_v13, %v2507_v2 }
0x109c   :  { %v6392_v28 = vmul.f32 %v6134_v4, %v2510_v22  ;;  %v2664_v30 = vmul.f32 %v6137_v5, %v2510_v22  ;;  %v6396_v32 = vmul.f32 %v6140_v6, %v2510_v22  ;;  %v6399_v33 = vmul.f32 %v6143_v13, %v2510_v22 }
0x109e   :  { %v2665_v34 = vpack.c.bf16 %v2664_v30, %v2663_v26  ;;  %v2590_v37 = vpack.c.bf16 %v6392_v28, %v6382_v24  ;;  %v2828_v38 = vpack.c.bf16 %v6396_v32, %v6386_v18  ;;  %v2949_v41 = vpack.c.bf16 %v6399_v33, %v6389_v27 }
0x109f   :  { %4817 = vmatmul.mubr.msk.bf16.vlgmr.msra.gmra.mrb[40].mxu0 %vm462_vm4, %v2516_v10 }
0x10a0   :  { %4823 = vmatmul.mubr.msk.bf16.vlgmr.msra.gmra.mrb[32].mxu1 %vm462_vm4, %v2594_v9  ;;  %4827 = vmatpush3.bf16.msra.mxu0 %v2665_v34 }
0x10a1   :  { %4839 = vmatpush3.bf16.xpose.msra.mxu1 %v2521_v3  ;;  %4840 = vmatprep.mubr.msk.bf16.mxu1 %vm5791_vm0, %v5790_v1 }
0x10a2   :  { %4850 = vmatprep.subr.bf16.mxu1 %v5790_v1  ;;  %4828 = vmatprep.mubr.msk.bf16.mxu0 %vm5791_vm0, %v5790_v1 }
0x10a3   :  { %4832 = vmatprep.subr.bf16.mxu0 %v5790_v1 }
0x10a8   :  { %4841 = vmatmul.mubr.msk.bf16.vlgmr.msra.gmra.mrb[36].mxu1 %vm462_vm4, %v2757_v12 }
0x10a9   :  { %4851 = vmatpush3.bf16.xpose.msra.mxu1 %v2521_v3  ;;  %4852 = vmatprep.mubr.msk.bf16.mxu1 %vm5791_vm0, %v5790_v1 }
0x10aa   :  { %4862 = vmatprep.subr.bf16.mxu1 %v5790_v1 }
0x10b0   :  { %4853 = vmatmul.mubr.msk.bf16.vlgmr.msra.gmra.mrb[40].mxu1 %vm462_vm4, %v2878_v14 }
0x10b1   :  { %4866 = vmatprep.mubr.msk.bf16.mxu1 %vm5791_vm0, %v5790_v1 }
0x1172   :  { %v2557_v4 = vpop.f32.mrb[40].mxu0 }
0x1173   :  { %v2632_v5 = vpop.f32.mrb[32].mxu1  ;;  %v4818_v6 = vpop.f32.mrb[41].mxu0  ;;  %v2564_v8 = vsel %vm438_vm15, %v2557_v4, -1e+30 }
0x1174   :  { %v2639_v13 = vsel %vm438_vm15, %v2632_v5, -1e+30  ;;  %v4824_v42 = vpop.f32.mrb[33].mxu1  ;;  %v2560_v43 = vpop.f32.mrb[42].mxu0  ;;  %v2566_v17 = vsel %vm757_vm1, %v2564_v8, -inf }
0x1175   :  { %v2635_v44 = vpop.f32.mrb[34].mxu1  ;;  %v4819_v45 = vpop.f32.mrb[43].mxu0  ;;  %v2641_v46 = vsel %vm757_vm1, %v2639_v13, -inf  ;;  %v2565_v54 = vsel %vm439_vm2, %v2560_v43, -1e+30 }
0x1176   :  { %v2640_v47 = vsel %vm439_vm2, %v2635_v44, -1e+30  ;;  %2642 = vmax.xlane.f32.xlu1 %v2641_v46  ;;  %v4825_v50 = vpop.f32.mrb[35].mxu1  ;;  %v2569_v57 = vsel %vm757_vm1, %v2565_v54, -inf }
0x1177   :  { %v2644_v51 = vsel %vm757_vm1, %v2640_v47, -inf }
0x1178   :  { %2645 = vmax.xlane.f32.xlu0 %v2644_v51 }
0x117a   :  { %2567 = vmax.xlane.f32.xlu1 %v2566_v17 }
0x117b   :  { %v2795_v23 = vpop.f32.mrb[36].mxu1 }
0x117c   :  { %v2802_v58 = vsel %vm438_vm15, %v2795_v23, -1e+30  ;;  %2570 = vmax.xlane.f32.xlu0 %v2569_v57  ;;  %v4842_v39 = vpop.f32.mrb[37].mxu1 }
0x117d   :  { %v2798_v56 = vpop.f32.mrb[38].mxu1  ;;  %v2804_v20 = vsel %vm757_vm1, %v2802_v58, -inf }
0x117e   :  { %v2803_v48 = vsel %vm439_vm2, %v2798_v56, -1e+30  ;;  %2805 = vmax.xlane.f32.xlu1 %v2804_v20  ;;  %v4843_v40 = vpop.f32.mrb[39].mxu1 }
0x117f   :  { %v2807_v59 = vsel %vm757_vm1, %v2803_v48, -inf }
0x1180   :  { %2808 = vmax.xlane.f32.xlu0 %v2807_v59 }
0x1183   :  { %v2916_v60 = vpop.f32.mrb[40].mxu1 }
0x1184   :  { %v2923_v61 = vsel %vm438_vm15, %v2916_v60, -1e+30  ;;  %v4854_v11 = vpop.f32.mrb[41].mxu1  ;;  %v5124_v60 = vld [vmem:[%s6589_s10 + $0x10] sm:$0xff]  }
0x1185   :  { %v2919_v62 = vpop.f32.mrb[42].mxu1  ;;  %v2925_v63 = vsel %vm757_vm1, %v2923_v61, -inf  ;;  %4863 = vmatpush3.bf16.msra.mxu1 %v5124_v60 }
0x1186   :  { %v2924_v15 = vsel %vm439_vm2, %v2919_v62, -1e+30  ;;  %2926 = vmax.xlane.f32.xlu1 %v2925_v63  ;;  %v4855_v29 = vpop.f32.mrb[43].mxu1  ;;  %4864 = vmatprep.subr.bf16.mxu1 %v5790_v1 }
0x1187   :  { %v2928_v36 = vsel %vm757_vm1, %v2924_v15, -inf }
0x1188   :  { %2929 = vmax.xlane.f32.xlu0 %v2928_v36 }
0x1203   :  { %v2643_v49 = vpop.xlane.xlu1 %2642 }
0x1204   :  { %v2647_v2 = vsub.f32 %v2639_v13, %v2643_v49 }
0x1205   :  { %v2646_v3 = vpop.xlane.xlu0 %2645 }
0x1206   :  { %v2649_v7 = vmul.f32 1.442695, %v2647_v2  ;;  %v2648_v10 = vsub.f32 %v2640_v47, %v2646_v3 }
0x1207   :  { %v2568_v9 = vpop.xlane.xlu1 %2567 }
0x1208   :  { %5318 = vpow2.f32 %v2649_v7  ;;  %v2651_v52 = vmul.f32 1.442695, %v2648_v10  ;;  %v2572_v12 = vsub.f32 %v2564_v8, %v2568_v9 }
0x1209   :  { %v2571_v14 = vpop.xlane.xlu0 %2570 }
0x120a   :  { %5320 = vpow2.f32 %v2651_v52  ;;  %v2574_v16 = vmul.f32 1.442695, %v2572_v12  ;;  %v2573_v19 = vsub.f32 %v2565_v54, %v2571_v14 }
0x120b   :  { %v2806_v53 = vpop.xlane.xlu1 %2805 }
0x120c   :  { %5322 = vpow2.f32 %v2574_v16  ;;  %v2576_v22 = vmul.f32 1.442695, %v2573_v19  ;;  %v2810_v26 = vsub.f32 %v2802_v58, %v2806_v53 }
0x120d   :  { %v2809_v30 = vpop.xlane.xlu0 %2808 }
0x120e   :  { %5324 = vpow2.f32 %v2576_v22  ;;  %v2812_v34 = vmul.f32 1.442695, %v2810_v26  ;;  %v2811_v4 = vsub.f32 %v2803_v48, %v2809_v30 }
0x1210   :  { %5326 = vpow2.f32 %v2812_v34  ;;  %v2814_v5 = vmul.f32 1.442695, %v2811_v4  ;;  %v5125_v34 = vld [vmem:[%s6589_s10 + $0x18] sm:$0xff]  }
0x1211   :  { %4865 = vmatpush3.bf16.msra.mxu1 %v5125_v34  ;;  %v5151_v34 = vld [vmem:[%s6591_s12 + $0xf4] ss:$8 sps:$4 sm:$0xff]  }
0x1212   :  { %v5319_v6 = vpop.eup %5318  ;;  %5328 = vpow2.f32 %v2814_v5  ;;  %4870 = vmatprep.subr.bf16.mxu1 %v5790_v1 }
0x1213   :  { %v2927_v13 = vpop.xlane.xlu1 %2926  ;;  %v2653_v42 = vsel %vm757_vm1, %v5319_v6, 0.0 }
0x1214   :  { %v5321_v43 = vpop.eup %5320  ;;  %v2931_v44 = vsub.f32 %v2923_v61, %v2927_v13  ;;  %2654 = vadd.xlane.f32.xlu1 %v2653_v42 }
0x1215   :  { %v2930_v45 = vpop.xlane.xlu0 %2929  ;;  %v2656_v46 = vsel %vm757_vm1, %v5321_v43, 0.0 }
0x1216   :  { %v5323_v8 = vpop.eup %5322  ;;  %v2933_v47 = vmul.f32 1.442695, %v2931_v44  ;;  %v2932_v50 = vsub.f32 %v2924_v15, %v2930_v45  ;;  %2657 = vadd.xlane.f32.xlu0 %v2656_v46 }
0x1217   :  { %v2578_v51 = vsel %vm757_vm1, %v5323_v8, 0.0 }
0x1218   :  { %v5325_v54 = vpop.eup %5324  ;;  %5330 = vpow2.f32 %v2933_v47  ;;  %v2935_v17 = vmul.f32 1.442695, %v2932_v50  ;;  %2579 = vadd.xlane.f32.xlu1 %v2578_v51 }
0x1219   :  { %v2581_v23 = vsel %vm757_vm1, %v5325_v54, 0.0 }
0x121a   :  { %v5327_v57 = vpop.eup %5326  ;;  %5332 = vpow2.f32 %v2935_v17  ;;  %2582 = vadd.xlane.f32.xlu0 %v2581_v23 }
0x121b   :  { %v2816_v58 = vsel %vm757_vm1, %v5327_v57, 0.0 }
0x121c   :  { %v5329_v39 = vpop.eup %5328  ;;  %2817 = vadd.xlane.f32.xlu1 %v2816_v58 }
0x121d   :  { %v2819_v56 = vsel %vm757_vm1, %v5329_v39, 0.0 }
0x121e   :  { %2820 = vadd.xlane.f32.xlu0 %v2819_v56 }
0x1222   :  { %v5331_v20 = vpop.eup %5330 }
0x1223   :  { %v2937_v48 = vsel %vm757_vm1, %v5331_v20, 0.0 }
0x1224   :  { %v5333_v40 = vpop.eup %5332  ;;  %2938 = vadd.xlane.f32.xlu1 %v2937_v48  ;;  %v5127_v48 = vld [vmem:[%s6590_s8 + $0x18] sm:$0xff]  }
0x1225   :  { %v2940_v59 = vsel %vm757_vm1, %v5333_v40, 0.0 }
0x1226   :  { %2941 = vadd.xlane.f32.xlu0 %v2940_v59 }
0x12a1   :  { %v2655_v61 = vpop.xlane.xlu1 %2654 }
0x12a2   :  { %5334 = vrcp.f32 %v2655_v61 }
0x12a3   :  { %v2658_v11 = vpop.xlane.xlu0 %2657 }
0x12a4   :  { %5336 = vrcp.f32 %v2658_v11 }
0x12a5   :  { %v2580_v63 = vpop.xlane.xlu1 %2579 }
0x12a7   :  { %v2583_v62 = vpop.xlane.xlu0 %2582 }
0x12a8   :  { %5338 = vrcp.f32 %v2583_v62 }
0x12a9   :  { %5340 = vrcp.f32 %v2580_v63  ;;  %v2818_v10 = vpop.xlane.xlu1 %2817 }
0x12ab   :  { %v2821_v3 = vpop.xlane.xlu0 %2820 }
0x12ac   :  { %v5335_v15 = vpop.eup %5334  ;;  %5342 = vrcp.f32 %v2821_v3  ;;  %v4417_v3 = vld [vmem:[#allocation13 + $0x1] ss:$0 sm:$0xff] }
0x12ad   :  { %v2661_v36 = vmul.f32 %v5335_v15, %v5319_v6  ;;  %5344 = vrcp.f32 %v2818_v10  ;;  %v4412_v6 = vld [vmem:[#allocation10 + $0x1] ss:$0 sm:$0xff]  ;;  %v4416_v15 = vld [vmem:[#allocation12 + $0x1] ss:$0 sm:$0xff] }
0x12ae   :  { %v5337_v29 = vpop.eup %5336 }
0x12af   :  { %v2662_v49 = vmul.f32 %v5337_v29, %v5321_v43 }
0x12b1   :  { %v2666_v2 = vpack.c.bf16 %v2662_v49, %v2661_v36 }
0x12b2   :  { %v5339_v7 = vpop.eup %5338 }
0x12b3   :  { %4829 = vmatmul.mubr.msk.bf16.vlgmr.msra.gmra.mrb[44].mxu0 %vm757_vm1, %v2666_v2  ;;  %v5341_v9 = vpop.eup %5340  ;;  %v2587_v52 = vmul.f32 %v5339_v7, %v5325_v54  ;;  %v2942_v24 = vpop.xlane.xlu0 %2941 }
0x12b4   :  { %4833 = vmatpush3.bf16.msra.mxu0 %v2590_v37  ;;  %4834 = vmatprep.mubr.msk.bf16.mxu0 %vm5791_vm0, %v5790_v1  ;;  %v2586_v12 = vmul.f32 %v5341_v9, %v5323_v8  ;;  %v2939_v37 = vpop.xlane.xlu1 %2938  ;;  %5346 = vrcp.f32 %v2942_v24  ;;  %v5133_v24 = vld [vmem:[%s6591_s12 + $0x94] ss:$8 sps:$4 sm:$0xff]  }
0x12b5   :  { %4844 = vmatprep.subr.bf16.mxu0 %v5790_v1  ;;  %5348 = vrcp.f32 %v2939_v37  ;;  %v5136_v37 = vld [vmem:[%s6591_s12 + $0xa4] ss:$8 sps:$4 sm:$0xff]  }
0x12b6   :  { %v2591_v14 = vpack.c.bf16 %v2587_v52, %v2586_v12  ;;  %v5343_v28 = vpop.eup %5342  ;;  %v5130_v12 = vld [vmem:[%s6591_s12 + $0x84] ss:$8 sps:$4 sm:$0xff]  }
0x12b7   :  { %v5345_v16 = vpop.eup %5344  ;;  %v2825_v19 = vmul.f32 %v5343_v28, %v5329_v39  ;;  %v5131_v28 = vld [vmem:[%s6591_s12 + $0x90] ss:$8 sps:$4 sm:$0xff]  }
0x12b8   :  { %v2824_v53 = vmul.f32 %v5345_v16, %v5327_v57  ;;  %v5134_v16 = vld [vmem:[%s6591_s12 + $0xa0] ss:$8 sps:$4 sm:$0xff]  }
0x12ba   :  { %v2829_v22 = vpack.c.bf16 %v2825_v19, %v2824_v53  ;;  %v5139_v19 = vld [vmem:[%s6591_s12 + $0xb4] ss:$8 sps:$4 sm:$0xff]   ;;  %v5137_v53 = vld [vmem:[%s6591_s12 + $0xb0] ss:$8 sps:$4 sm:$0xff]  }
0x12be   :  { %v5347_v18 = vpop.eup %5346 }
0x12bf   :  { %4835 = vmatmul.mubr.msk.bf16.vlgmr.msra.gmra.mrb[44].mxu0 %vm757_vm1, %v2591_v14  ;;  %v5349_v32 = vpop.eup %5348  ;;  %v5128_v14 = vld [vmem:[%s6591_s12 + $0x80] ss:$8 sps:$4 sm:$0xff]  }
0x12c0   :  { %4845 = vmatpush3.bf16.msra.mxu0 %v2828_v38  ;;  %4846 = vmatprep.mubr.msk.bf16.mxu0 %vm5791_vm0, %v5790_v1  ;;  %v2946_v38 = vmul.f32 %v5347_v18, %v5333_v40  ;;  %v2945_v26 = vmul.f32 %v5349_v32, %v5331_v20  ;;  %v5126_v20 = vld [vmem:[%s6590_s8 + $0x10] sm:$0xff]   ;;  %v5140_v18 = vld [vmem:[%s6591_s12 + $0xc0] ss:$8 sps:$4 sm:$0xff]  }
0x12c1   :  { %4856 = vmatprep.subr.bf16.mxu0 %v5790_v1  ;;  %v5145_v32 = vld [vmem:[%s6591_s12 + $0xd4] ss:$8 sps:$4 sm:$0xff]  }
0x12c2   :  { %v2950_v30 = vpack.c.bf16 %v2946_v38, %v2945_v26  ;;  %v5143_v38 = vld [vmem:[%s6591_s12 + $0xd0] ss:$8 sps:$4 sm:$0xff]   ;;  %v5148_v26 = vld [vmem:[%s6591_s12 + $0xe4] ss:$8 sps:$4 sm:$0xff]  }
0x12cb   :  { %4847 = vmatmul.mubr.msk.bf16.vlgmr.msra.gmra.mrb[44].mxu0 %vm757_vm1, %v2829_v22  ;;  %v5142_v22 = vld [vmem:[%s6591_s12 + $0xc4] ss:$8 sps:$4 sm:$0xff]  }
0x12cc   :  { %4857 = vmatpush3.bf16.msra.mxu0 %v2949_v41  ;;  %4858 = vmatprep.mubr.msk.bf16.mxu0 %vm5791_vm0, %v5790_v1 }
0x12cd   :  { %3350 = vmatprep.subr.bf16.mxu0 %v5130_v12 }
0x12d7   :  { %4859 = vmatmul.mubr.msk.bf16.vlgmr.msra.gmra.mrb[44].mxu0 %vm757_vm1, %v2950_v30  ;;  %v5146_v30 = vld [vmem:[%s6591_s12 + $0xe0] ss:$8 sps:$4 sm:$0xff]  }
0x12d8   :  { %3382 = vmatprep.mubr.bf16.mxu0 %v5789_v0  ;;  %3351 = vmatpush1.bf16.msra.mxu0 %v5128_v14 }
0x12d9   :  { %3352 = vmatprep.subr.bf16.mxu0 %v5133_v24 }
0x12dc   :  { %3353 = vmatpush1.bf16.msra.mxu0 %v5131_v28 }
0x12dd   :  { %3354 = vmatprep.subr.bf16.mxu0 %v5136_v37 }
0x12e0   :  { %3355 = vmatpush1.bf16.msra.mxu0 %v5134_v16 }
0x12e1   :  { %3356 = vmatprep.subr.bf16.mxu0 %v5139_v19 }
0x12e4   :  { %3357 = vmatpush1.bf16.msra.mxu0 %v5137_v53 }
0x12e5   :  { %3358 = vmatprep.subr.bf16.mxu0 %v5142_v22 }
0x12e8   :  { %3359 = vmatpush1.bf16.msra.mxu0 %v5140_v18 }
0x12e9   :  { %3360 = vmatprep.subr.bf16.mxu0 %v5145_v32 }
0x12ec   :  { %3361 = vmatpush1.bf16.msra.mxu0 %v5143_v38 }
0x12ed   :  { %3362 = vmatprep.subr.bf16.mxu0 %v5148_v26 }
0x12f0   :  { %3363 = vmatpush1.bf16.msra.mxu0 %v5146_v30 }
0x12f1   :  { %3364 = vmatprep.subr.bf16.mxu0 %v5151_v34 }
0x13aa   :  { %v2988_v4 = vpop.f32.mrb[44].mxu0 }
0x13ab   :  { %v4860_v5 = vpop.f32.mrb[45].mxu0 }
0x13ac   :  { %v2991_v27 = vpop.f32.mrb[46].mxu0  ;;  %v5152_v5 = vld [vmem:[#allocation18 + $0x100] ss:$8 sps:$4 sm:$0xff]  }
0x13ad   :  { %v3002_v33 = vpack.c.bf16 %v2991_v27, %v2988_v4  ;;  %v4861_v41 = vpop.f32.mrb[47].mxu0  ;;  %v5149_v4 = vld [vmem:[%s6591_s12 + $0xf0] ss:$8 sps:$4 sm:$0xff]  }
0x13ae   :  { %3365 = vmatpush1.bf16.msra.mxu0 %v5149_v4  ;;  %v5154_v27 = vld [vmem:[#allocation18 + $0x104] ss:$8 sps:$4 sm:$0xff]   ;;  %v5155_v41 = vld [vmem:[#allocation18 + $0x110] ss:$8 sps:$4 sm:$0xff]  }
0x13af   :  { %4867 = vmatmul.mubr.msk.bf16.vlgmr.msra.gmra.mrb[44].mxu1 %vm462_vm4, %v3002_v33  ;;  %v5157_v33 = vld [vmem:[#allocation18 + $0x114] ss:$8 sps:$4 sm:$0xff]  }
0x13b0   :  { %4874 = vmatprep.mubr.msk.bf16.mxu1 %vm5791_vm0, %v5790_v1  ;;  %4871 = vmatpush3.bf16.msra.mxu1 %v5126_v20  ;;  %v5185_v20 = vld [vmem:[#allocation18 + $0x1b0] ss:$8 sps:$4 sm:$0xff]  }
0x13b1   :  { %4872 = vmatprep.subr.bf16.mxu1 %v5790_v1 }
0x13b4   :  { %4873 = vmatpush3.bf16.msra.mxu1 %v5127_v48  ;;  %v5190_v48 = vld [vmem:[#allocation18 + $0x1c4] ss:$8 sps:$4 sm:$0xff]  }
0x13b5   :  { %3605 = vmatprep.subr.bf16.mxu1 %v5154_v27 }
0x1482   :  { %v3060_v13 = vpop.f32.mrb[44].mxu1 }
0x1483   :  { %v3061_v42 = vadd.f32 %v4412_v6, %v3060_v13  ;;  %v4868_v43 = vpop.f32.mrb[45].mxu1  ;;  %v5158_v13 = vld [vmem:[#allocation18 + $0x120] ss:$8 sps:$4 sm:$0xff]  }
0x1484   :  { %v3063_v44 = vpop.f32.mrb[46].mxu1  ;;  %v5161_v43 = vld [vmem:[#allocation18 + $0x130] ss:$8 sps:$4 sm:$0xff]  }
0x1485   :  { %v6484_v0 = vadd.f32 %v3061_v42, %v6336_v25  ;;  %v3064_v45 = vadd.f32 %v4412_v6, %v3063_v44  ;;  %v4869_v46 = vpop.f32.mrb[47].mxu1  ;;  %v5160_v6 = vld [vmem:[#allocation18 + $0x124] ss:$8 sps:$4 sm:$0xff]   ;;  %v5163_v42 = vld [vmem:[#allocation18 + $0x134] ss:$8 sps:$4 sm:$0xff]  }
0x1486   :  { %v5166_v44 = vld [vmem:[#allocation18 + $0x144] ss:$8 sps:$4 sm:$0xff]   ;;  %v5169_v46 = vld [vmem:[#allocation18 + $0x154] ss:$8 sps:$4 sm:$0xff]  }
0x1487   :  { %v6487_v8 = vadd.f32 %v3064_v45, %v6339_v55  ;;  %v3073_v47 = vsel %vm462_vm4, %v6484_v0, 0.0  ;;  %v5164_v45 = vld [vmem:[#allocation18 + $0x140] ss:$8 sps:$4 sm:$0xff]  }
0x1488   :  { %3074 = vadd.xlane.f32.xlu1 %v3073_v47  ;;  %v5167_v47 = vld [vmem:[#allocation18 + $0x150] ss:$8 sps:$4 sm:$0xff]  }
0x1489   :  { %v3076_v50 = vsel %vm462_vm4, %v6487_v8, 0.0 }
0x148a   :  { %3077 = vadd.xlane.f32.xlu0 %v3076_v50  ;;  %v5172_v50 = vld [vmem:[#allocation18 + $0x164] ss:$8 sps:$4 sm:$0xff]  }
0x1515   :  { %v3075_v51 = vpop.xlane.xlu1 %3074 }
0x1516   :  { %v3079_v54 = vmul.f32 0.03125, %v3075_v51  ;;  %v5170_v51 = vld [vmem:[#allocation18 + $0x160] ss:$8 sps:$4 sm:$0xff]  }
0x1517   :  { %v3078_v17 = vpop.xlane.xlu0 %3077 }
0x1518   :  { %v3081_v25 = vsub.f32 %v6484_v0, %v3079_v54  ;;  %v3080_v23 = vmul.f32 0.03125, %v3078_v17  ;;  %v5175_v54 = vld [vmem:[#allocation18 + $0x174] ss:$8 sps:$4 sm:$0xff]   ;;  %v5173_v17 = vld [vmem:[#allocation18 + $0x170] ss:$8 sps:$4 sm:$0xff]  }
0x151a   :  { %v3082_v57 = vsub.f32 %v6487_v8, %v3080_v23  ;;  %v3083_v55 = vmul.f32 %v3081_v25, %v3081_v25  ;;  %v5176_v23 = vld [vmem:[#allocation18 + $0x180] ss:$8 sps:$4 sm:$0xff]  }
0x151c   :  { %v3085_v58 = vsel %vm462_vm4, %v3083_v55, 0.0  ;;  %v3084_v39 = vmul.f32 %v3082_v57, %v3082_v57  ;;  %v5179_v55 = vld [vmem:[#allocation18 + $0x190] ss:$8 sps:$4 sm:$0xff]  }
0x151d   :  { %3086 = vadd.xlane.f32.xlu1 %v3085_v58  ;;  %v5184_v58 = vld [vmem:[#allocation18 + $0x1a4] ss:$8 sps:$4 sm:$0xff]  }
0x151e   :  { %v3088_v56 = vsel %vm462_vm4, %v3084_v39, 0.0  ;;  %v5182_v39 = vld [vmem:[#allocation18 + $0x1a0] ss:$8 sps:$4 sm:$0xff]  }
0x151f   :  { %3089 = vadd.xlane.f32.xlu0 %v3088_v56  ;;  %v5187_v56 = vld [vmem:[#allocation18 + $0x1b4] ss:$8 sps:$4 sm:$0xff]  }
0x15aa   :  { %v3087_v40 = vpop.xlane.xlu1 %3086 }
0x15ab   :  { %v3091_v59 = vmul.f32 0.03125, %v3087_v40  ;;  %v5188_v40 = vld [vmem:[#allocation18 + $0x1c0] ss:$8 sps:$4 sm:$0xff]  }
0x15ac   :  { %v3090_v60 = vpop.xlane.xlu0 %3089 }
0x15ad   :  { %v3093_v61 = vadd.f32 1e-05, %v3091_v59  ;;  %v3092_v11 = vmul.f32 0.03125, %v3090_v60  ;;  %v5193_v59 = vld [vmem:[#allocation18 + $0x1d4] ss:$8 sps:$4 sm:$0xff]  }
0x15ae   :  { %v5191_v60 = vld [vmem:[#allocation18 + $0x1d0] ss:$8 sps:$4 sm:$0xff]  }
0x15af   :  { %5350 = vrsqrt.f32 %v3093_v61  ;;  %v3094_v62 = vadd.f32 1e-05, %v3092_v11  ;;  %v4422_v61 = vld [vmem:[#allocation15 + $0x1] ss:$0 sm:$0xff] }
0x15b1   :  { %5352 = vrsqrt.f32 %v3094_v62 }
0x15b9   :  { %v5351_v63 = vpop.eup %5350 }
0x15ba   :  { %v3097_v29 = vmul.f32 %v5351_v63, %v3081_v25  ;;  %v5178_v25 = vld [vmem:[#allocation18 + $0x184] ss:$8 sps:$4 sm:$0xff]  }
0x15bb   :  { %v5353_v36 = vpop.eup %5352 }
0x15bc   :  { %v3105_v49 = vmul.f32 %v4416_v15, %v3097_v29  ;;  %v3098_v2 = vmul.f32 %v5353_v36, %v3082_v57  ;;  %v5181_v57 = vld [vmem:[#allocation18 + $0x194] ss:$8 sps:$4 sm:$0xff]  }
0x15be   :  { %v3106_v7 = vmul.f32 %v4416_v15, %v3098_v2  ;;  %v3113_v10 = vadd.f32 %v4417_v3, %v3105_v49 }
0x15c0   :  { %v3114_v9 = vadd.f32 %v4417_v3, %v3106_v7 }
0x15c2   :  { %v3120_v52 = vpack.c.bf16 %v3114_v9, %v3113_v10 }
0x15c4   :  { %4875 = vmatmul.mubr.msk.bf16.vlgmr.msra.gmra.mrb[48].mxu1 %vm462_vm4, %v3120_v52 }
0x15c5   :  { %3606 = vmatpush1.bf16.msra.mxu1 %v5152_v5 }
0x15c6   :  { %3607 = vmatprep.subr.bf16.mxu1 %v5157_v33 }
0x15c9   :  { %3608 = vmatpush1.bf16.msra.mxu1 %v5155_v41 }
0x15ca   :  { %3609 = vmatprep.subr.bf16.mxu1 %v5160_v6 }
0x15cd   :  { %3610 = vmatpush1.bf16.msra.mxu1 %v5158_v13 }
0x15ce   :  { %3611 = vmatprep.subr.bf16.mxu1 %v5163_v42 }
0x15d1   :  { %3612 = vmatpush1.bf16.msra.mxu1 %v5161_v43 }
0x15d2   :  { %3613 = vmatprep.subr.bf16.mxu1 %v5166_v44 }
0x15d5   :  { %3614 = vmatpush1.bf16.msra.mxu1 %v5164_v45 }
0x15d6   :  { %3615 = vmatprep.subr.bf16.mxu1 %v5169_v46 }
0x15d9   :  { %3616 = vmatpush1.bf16.msra.mxu1 %v5167_v47 }
0x15da   :  { %3617 = vmatprep.subr.bf16.mxu1 %v5172_v50 }
0x15dd   :  { %3618 = vmatpush1.bf16.msra.mxu1 %v5170_v51 }
0x15de   :  { %3619 = vmatprep.subr.bf16.mxu1 %v5175_v54 }
0x15e1   :  { %3620 = vmatpush1.bf16.msra.mxu1 %v5173_v17 }
0x15e2   :  { %3621 = vmatprep.subr.bf16.mxu1 %v5178_v25 }
0x15e5   :  { %3622 = vmatpush1.bf16.msra.mxu1 %v5176_v23 }
0x15e6   :  { %3623 = vmatprep.subr.bf16.mxu1 %v5181_v57 }
0x15e9   :  { %3624 = vmatpush1.bf16.msra.mxu1 %v5179_v55 }
0x15ea   :  { %3625 = vmatprep.subr.bf16.mxu1 %v5184_v58 }
0x15ed   :  { %3626 = vmatpush1.bf16.msra.mxu1 %v5182_v39 }
0x15ee   :  { %3627 = vmatprep.subr.bf16.mxu1 %v5187_v56 }
0x15f1   :  { %3628 = vmatpush1.bf16.msra.mxu1 %v5185_v20 }
0x15f2   :  { %3629 = vmatprep.subr.bf16.mxu1 %v5190_v48 }
0x15f5   :  { %3630 = vmatpush1.bf16.msra.mxu1 %v5188_v40 }
0x15f6   :  { %3631 = vmatprep.subr.bf16.mxu1 %v5193_v59 }
0x15f9   :  { %3632 = vmatpush1.bf16.msra.mxu1 %v5191_v60 }
0x1697   :  { %v3178_v11 = vpop.f32.mrb[48].mxu1 }
0x1698   :  { %v3179_v62 = vadd.f32 %v4422_v61, %v3178_v11  ;;  %v4876_v63 = vpop.f32.mrb[49].mxu1  ;;  %v5194_v11 = vld [vmem:[#allocation18 + $0x1e0] ss:$8 sps:$4 sm:$0xff]  }
0x1699   :  { %v3181_v15 = vpop.f32.mrb[50].mxu1  ;;  %v5199_v63 = vld [vmem:[#allocation18 + $0x1f4] ss:$8 sps:$4 sm:$0xff]  }
0x169a   :  { %v3187_v29 = vmul.f32 0.70710677, %v3179_v62  ;;  %v3182_v36 = vadd.f32 %v4422_v61, %v3181_v15  ;;  %v4877_v49 = vpop.f32.mrb[51].mxu1  ;;  %v3185_v56 = vmul.f32 0.5, %v3179_v62  ;;  %v5196_v61 = vld [vmem:[#allocation18 + $0x1e4] ss:$8 sps:$4 sm:$0xff]  }
0x169b   :  { %3633 = vmatprep.subr.bf16.mxu1 %v5196_v61  ;;  %v5197_v15 = vld [vmem:[#allocation18 + $0x1f0] ss:$8 sps:$4 sm:$0xff]   ;;  %v5203_v62 = vld [vmem:[#allocation21 + $0x110] ss:$8 sps:$4 sm:$0xff]   ;;  %v5254_v61 = vld [vmem:[%s6592_s14 + $0xd8] sm:$0xff]  }
0x169c   :  { %v3193_v2 = vand.u32 2147483647, %v3187_v29  ;;  %v3188_v3 = vmul.f32 0.70710677, %v3182_v36  ;;  %vm3189_vm6 = vcmp.ge.f32.partialorder %v3187_v29, 0.0  ;;  %v3186_v20 = vmul.f32 0.5, %v3182_v36  ;;  %3634 = vmatpush1.bf16.msra.mxu1 %v5194_v11 }
0x169d   :  { %v3191_v17 = vsel %vm3189_vm6, 1.0, %v5792_v35  ;;  %3635 = vmatprep.subr.bf16.mxu1 %v5199_v63  ;;  %v5200_v29 = vld [vmem:[#allocation21 + $0x100] ss:$8 sps:$4 sm:$0xff]   ;;  %v5202_v49 = vld [vmem:[#allocation21 + $0x104] ss:$8 sps:$4 sm:$0xff]  }
0x169e   :  { %v3195_v7 = vmul.f32 0.3275911, %v3193_v2  ;;  %v3194_v10 = vand.u32 2147483647, %v3188_v3  ;;  %v3221_v14 = vsub.f32 0.0, %v3193_v2  ;;  %vm3190_vm7 = vcmp.ge.f32.partialorder %v3188_v3, 0.0  ;;  %3860 = vmatprep.subr.bf16.mxu0 %v5202_v49 }
0x169f   :  { %v3192_v55 = vsel %vm3190_vm7, 1.0, %v5792_v35  ;;  %v5205_v35 = vld [vmem:[#allocation21 + $0x114] ss:$8 sps:$4 sm:$0xff]   ;;  %v5208_v36 = vld [vmem:[#allocation21 + $0x124] ss:$8 sps:$4 sm:$0xff]  }
0x16a0   :  { %v3197_v9 = vadd.f32 1.0, %v3195_v7  ;;  %v3196_v52 = vmul.f32 0.3275911, %v3194_v10  ;;  %v3222_v24 = vsub.f32 0.0, %v3194_v10  ;;  %v3223_v37 = vmul.f32 %v3221_v14, %v3193_v2  ;;  %3636 = vmatpush1.bf16.msra.mxu1 %v5197_v15  ;;  %v5206_v2 = vld [vmem:[#allocation21 + $0x120] ss:$8 sps:$4 sm:$0xff]  }
0x16a1   :  { %v5211_v3 = vld [vmem:[#allocation21 + $0x134] ss:$8 sps:$4 sm:$0xff]   ;;  %v5209_v7 = vld [vmem:[#allocation21 + $0x130] ss:$8 sps:$4 sm:$0xff]   ;;  %v5220_v14 = vld [vmem:[#allocation21 + $0x164] ss:$8 sps:$4 sm:$0xff]  }
0x16a2   :  { %5354 = vrcp.f32 %v3197_v9  ;;  %v3198_v12 = vadd.f32 1.0, %v3196_v52  ;;  %v3224_v22 = vmul.f32 %v3222_v24, %v3194_v10  ;;  %v3225_v18 = vmul.f32 1.442695, %v3223_v37  ;;  %v5214_v10 = vld [vmem:[#allocation21 + $0x144] ss:$8 sps:$4 sm:$0xff]  }
0x16a3   :  { %v5212_v9 = vld [vmem:[#allocation21 + $0x140] ss:$8 sps:$4 sm:$0xff]   ;;  %v5217_v52 = vld [vmem:[#allocation21 + $0x154] ss:$8 sps:$4 sm:$0xff]   ;;  %v5221_v37 = vld [vmem:[#allocation21 + $0x170] ss:$8 sps:$4 sm:$0xff]  }
0x16a4   :  { %5356 = vrcp.f32 %v3198_v12  ;;  %v3227_v34 = vmul.f32 1.442695, %v3224_v22  ;;  %v5215_v12 = vld [vmem:[#allocation21 + $0x150] ss:$8 sps:$4 sm:$0xff]   ;;  %v5218_v24 = vld [vmem:[#allocation21 + $0x160] ss:$8 sps:$4 sm:$0xff]  }
0x16a5   :  { %5358 = vpow2.f32 %v3225_v18  ;;  %v5227_v22 = vld [vmem:[#allocation21 + $0x190] ss:$8 sps:$4 sm:$0xff]   ;;  %v5232_v18 = vld [vmem:[#allocation21 + $0x1a4] ss:$8 sps:$4 sm:$0xff]  }
0x16a6   :  { %5360 = vpow2.f32 %v3227_v34  ;;  %v5236_v34 = vld [vmem:[#allocation21 + $0x1c0] ss:$8 sps:$4 sm:$0xff]   ;;  %v5259_v49 = vld [vmem:[%s6592_s14 + $0xa8] sm:$0xff]  }
0x16a7   :  { %v5255_v11 = vld [vmem:[%s6592_s14 + $0x98] sm:$0xff]   ;;  %v5256_v63 = vld [vmem:[%s6592_s14 + $0xe0] sm:$0xff]  }
0x16a8   :  { %v5257_v15 = vld [vmem:[%s6592_s14 + $0xa0] sm:$0xff]  }
0x16ac   :  { %v5355_v28 = vpop.eup %5354 }
0x16ad   :  { %v3203_v16 = vmul.f32 1.0614054, %v5355_v28 }
0x16ae   :  { %v5357_v19 = vpop.eup %5356 }
0x16af   :  { %v3205_v53 = vadd.f32 -1.4531521, %v3203_v16  ;;  %v3204_v32 = vmul.f32 1.0614054, %v5357_v19  ;;  %v5359_v45 = vpop.eup %5358  ;;  %v5226_v16 = vld [vmem:[#allocation21 + $0x184] ss:$8 sps:$4 sm:$0xff]  }
0x16b0   :  { %v5361_v51 = vpop.eup %5360 }
0x16b1   :  { %v3207_v38 = vmul.f32 %v5355_v28, %v3205_v53  ;;  %v3206_v26 = vadd.f32 -1.4531521, %v3204_v32  ;;  %v5229_v53 = vld [vmem:[#allocation21 + $0x194] ss:$8 sps:$4 sm:$0xff]   ;;  %v5230_v32 = vld [vmem:[#allocation21 + $0x1a0] ss:$8 sps:$4 sm:$0xff]  }
0x16b3   :  { %v3209_v30 = vadd.f32 1.4214138, %v3207_v38  ;;  %v3208_v4 = vmul.f32 %v5357_v19, %v3206_v26  ;;  %v5235_v38 = vld [vmem:[#allocation21 + $0x1b4] ss:$8 sps:$4 sm:$0xff]   ;;  %v5233_v26 = vld [vmem:[#allocation21 + $0x1b0] ss:$8 sps:$4 sm:$0xff]  }
0x16b5   :  { %v3211_v5 = vmul.f32 %v5355_v28, %v3209_v30  ;;  %v3210_v27 = vadd.f32 1.4214138, %v3208_v4  ;;  %v5238_v30 = vld [vmem:[#allocation21 + $0x1c4] ss:$8 sps:$4 sm:$0xff]   ;;  %v5241_v4 = vld [vmem:[#allocation21 + $0x1d4] ss:$8 sps:$4 sm:$0xff]  }
0x16b7   :  { %v3213_v33 = vadd.f32 -0.28449672, %v3211_v5  ;;  %v3212_v41 = vmul.f32 %v5357_v19, %v3210_v27  ;;  %v5239_v5 = vld [vmem:[#allocation21 + $0x1d0] ss:$8 sps:$4 sm:$0xff]  }
0x16b8   :  { %v3258_v27 = vld [vmem:[#allocation16 + $0x2] sm:$0x3] }
0x16b9   :  { %v3215_v6 = vmul.f32 %v5355_v28, %v3213_v33  ;;  %v3214_v13 = vadd.f32 -0.28449672, %v3212_v41  ;;  %v3263_v33 = vrot.slane %v3258_v27, %v6303_v21  ;;  %v3267_v41 = vrot.slane %v3258_v27, %v6305_v31 }
0x16bb   :  { %v3217_v42 = vadd.f32 0.2548296, %v3215_v6  ;;  %v3216_v43 = vmul.f32 %v5357_v19, %v3214_v13 }
0x16bd   :  { %v3219_v44 = vmul.f32 %v5355_v28, %v3217_v42  ;;  %v3218_v46 = vadd.f32 0.2548296, %v3216_v43  ;;  %v5223_v28 = vld [vmem:[#allocation21 + $0x174] ss:$8 sps:$4 sm:$0xff]  }
0x16bf   :  { %v3229_v47 = vmul.f32 %v5359_v45, %v3219_v44  ;;  %v3220_v50 = vmul.f32 %v5357_v19, %v3218_v46  ;;  %v5224_v19 = vld [vmem:[#allocation21 + $0x180] ss:$8 sps:$4 sm:$0xff]  }
0x16c1   :  { %v3231_v54 = vsub.f32 1.0, %v3229_v47  ;;  %v3230_v25 = vmul.f32 %v5361_v51, %v3220_v50 }
0x16c3   :  { %v3233_v23 = vmul.f32 %v3231_v54, %v3191_v17  ;;  %v3232_v57 = vsub.f32 1.0, %v3230_v25 }
0x16c5   :  { %v3235_v58 = vadd.f32 1.0, %v3233_v23  ;;  %v3234_v39 = vmul.f32 %v3232_v57, %v3192_v55  ;;  %v5244_v57 = vld [vmem:[#allocation21 + $0x1e4] ss:$8 sps:$4 sm:$0xff]   ;;  %v5242_v55 = vld [vmem:[#allocation21 + $0x1e0] ss:$8 sps:$4 sm:$0xff]  }
0x16c7   :  { %v3236_v48 = vadd.f32 1.0, %v3234_v39  ;;  %v3237_v40 = vmul.f32 %v3235_v58, %v3185_v56  ;;  %v5247_v58 = vld [vmem:[#allocation21 + $0x1f4] ss:$8 sps:$4 sm:$0xff]   ;;  %v5245_v39 = vld [vmem:[#allocation21 + $0x1f0] ss:$8 sps:$4 sm:$0xff]   ;;  %v5248_v56 = vld [vmem:[%s6592_s14 + $0xc0] sm:$0xff]  }
0x16c8   :  { %4665 = vmatprep.subr.bf16.mxu1 %v5248_v56 }
0x16c9   :  { %v3238_v59 = vmul.f32 %v3236_v48, %v3186_v20  ;;  %v5249_v20 = vld [vmem:[%s6592_s14 + $0x80] sm:$0xff]   ;;  %v5250_v48 = vld [vmem:[%s6592_s14 + $0xc8] sm:$0xff]  }
0x16cb   :  { %v3256_v60 = vpack.c.bf16 %v3238_v59, %v3237_v40  ;;  %v5251_v40 = vld [vmem:[%s6592_s14 + $0x88] sm:$0xff]   ;;  %v5252_v59 = vld [vmem:[%s6592_s14 + $0xd0] sm:$0xff]  }
0x16cd   :  { %3383 = vmatmul.mubr.bf16.vlgmr.msra.gmra.mrb[48].mxu0 %v3256_v60  ;;  %v5253_v60 = vld [vmem:[%s6592_s14 + $0x90] sm:$0xff]  }
0x16ce   :  { %3861 = vmatpush1.bf16.msra.mxu0 %v5200_v29  ;;  %v5258_v29 = vld [vmem:[%s6592_s14 + $0xe8] sm:$0xff]  }
0x16cf   :  { %3862 = vmatprep.subr.bf16.mxu0 %v5205_v35  ;;  %v3433_v35 = vld [vmem:[#allocation19 + $0x2] sm:$0x3] }
0x16d2   :  { %3863 = vmatpush1.bf16.msra.mxu0 %v5203_v62  ;;  %v3438_v62 = vrot.slane %v3433_v35, %v6303_v21 }
0x16d3   :  { %3864 = vmatprep.subr.bf16.mxu0 %v5208_v36  ;;  %v3442_v36 = vrot.slane %v3433_v35, %v6305_v31 }
0x16d6   :  { %3865 = vmatpush1.bf16.msra.mxu0 %v5206_v2 }
0x16d7   :  { %3866 = vmatprep.subr.bf16.mxu0 %v5211_v3 }
0x16da   :  { %3867 = vmatpush1.bf16.msra.mxu0 %v5209_v7 }
0x16db   :  { %3868 = vmatprep.subr.bf16.mxu0 %v5214_v10 }
0x16de   :  { %3869 = vmatpush1.bf16.msra.mxu0 %v5212_v9 }
0x16df   :  { %3870 = vmatprep.subr.bf16.mxu0 %v5217_v52 }
0x16e2   :  { %3871 = vmatpush1.bf16.msra.mxu0 %v5215_v12 }
0x16e3   :  { %3872 = vmatprep.subr.bf16.mxu0 %v5220_v14 }
0x16e6   :  { %3873 = vmatpush1.bf16.msra.mxu0 %v5218_v24 }
0x16e7   :  { %3874 = vmatprep.subr.bf16.mxu0 %v5223_v28 }
0x16ea   :  { %3875 = vmatpush1.bf16.msra.mxu0 %v5221_v37 }
0x16eb   :  { %3876 = vmatprep.subr.bf16.mxu0 %v5226_v16 }
0x16ee   :  { %3877 = vmatpush1.bf16.msra.mxu0 %v5224_v19 }
0x16ef   :  { %3878 = vmatprep.subr.bf16.mxu0 %v5229_v53 }
0x16f2   :  { %3879 = vmatpush1.bf16.msra.mxu0 %v5227_v22  ;;  %v5260_v22 = vld [vmem:[%s6592_s14 + $0xf0] sm:$0xff]  }
0x16f3   :  { %3880 = vmatprep.subr.bf16.mxu0 %v5232_v18  ;;  %v5261_v18 = vld [vmem:[%s6592_s14 + $0xb0] sm:$0xff]  }
0x16f6   :  { %3881 = vmatpush1.bf16.msra.mxu0 %v5230_v32  ;;  %v5262_v32 = vld [vmem:[%s6592_s14 + $0xf8] sm:$0xff]  }
0x16f7   :  { %3882 = vmatprep.subr.bf16.mxu0 %v5235_v38  ;;  %v5263_v38 = vld [vmem:[%s6592_s14 + $0xb8] sm:$0xff]  }
0x16fa   :  { %3883 = vmatpush1.bf16.msra.mxu0 %v5233_v26  ;;  %v3688_v26 = vld [vmem:[#allocation22 + $0x2] sm:$0x3] }
0x16fb   :  { %3884 = vmatprep.subr.bf16.mxu0 %v5238_v30  ;;  %v3693_v30 = vrot.slane %v3688_v26, %v6303_v21 }
0x16fe   :  { %3885 = vmatpush1.bf16.msra.mxu0 %v5236_v34 }
0x16ff   :  { %3886 = vmatprep.subr.bf16.mxu0 %v5241_v4  ;;  %v3697_v4 = vrot.slane %v3688_v26, %v6305_v31 }
0x1702   :  { %3887 = vmatpush1.bf16.msra.mxu0 %v5239_v5 }
0x1703   :  { %3888 = vmatprep.subr.bf16.mxu0 %v5244_v57 }
0x1706   :  { %3889 = vmatpush1.bf16.msra.mxu0 %v5242_v55 }
0x1707   :  { %3890 = vmatprep.subr.bf16.mxu0 %v5247_v58 }
0x170a   :  { %3891 = vmatpush1.bf16.msra.mxu0 %v5245_v39 }
0x170b   :  { %4878 = vmatprep.subr.bf16.mxu0 %v5790_v1 }
0x17a0   :  { %v3384_v6 = vpop.f32.mrb[48].mxu0 }
0x17a1   :  { %v3385_v13 = vadd.f32 %v3384_v6, %v3263_v33  ;;  %v3386_v42 = vpop.f32.mrb[49].mxu0 }
0x17a2   :  { %v3387_v43 = vadd.f32 %v3386_v42, %v3267_v41  ;;  %v3388_v44 = vpop.f32.mrb[50].mxu0 }
0x17a3   :  { %v3389_v45 = vadd.f32 %v3388_v44, %v3263_v33  ;;  %v3390_v46 = vpop.f32.mrb[51].mxu0  ;;  %v3393_v50 = vmax.f32 %v3385_v13, 0.0 }
0x17a4   :  { %v3391_v47 = vadd.f32 %v3390_v46, %v3267_v41  ;;  %v3394_v54 = vmax.f32 %v3387_v43, 0.0  ;;  %v4554_v46 = vld [vmem:[#allocation24 + $0x1] ss:$0 sm:$0xff] }
0x17a5   :  { %v3395_v51 = vmax.f32 %v3389_v45, 0.0 }
0x17a6   :  { %v3396_v17 = vmax.f32 %v3391_v47, 0.0 }
0x17a7   :  { %v3430_v25 = vpack.c.bf16 %v3395_v51, %v3393_v50 }
0x17a8   :  { %v3431_v23 = vpack.c.bf16 %v3396_v17, %v3394_v54 }
0x17aa   :  { %3637 = vmatprep.mubr.bf16.mxu1 %v3431_v23 }
0x17ab   :  { %3638 = vmatmul.mubr.bf16.vlgmr.msra.gmra.mrb[52].mxu1 %v3430_v25 }
0x17ac   :  { %4666 = vmatpush3.bf16.msra.mxu1 %v5249_v20 }
0x17ad   :  { %4667 = vmatprep.subr.bf16.mxu1 %v5250_v48 }
0x17b0   :  { %4668 = vmatpush3.bf16.msra.mxu1 %v5251_v40 }
0x17b1   :  { %4669 = vmatprep.subr.bf16.mxu1 %v5252_v59 }
0x17b4   :  { %4670 = vmatpush3.bf16.msra.mxu1 %v5253_v60 }
0x17b5   :  { %4671 = vmatprep.subr.bf16.mxu1 %v5254_v61 }
0x17b8   :  { %4672 = vmatpush3.bf16.msra.mxu1 %v5255_v11  ;;  %v5265_v11 = vld [vmem:[#allocation25 + $0x8] sm:$0xff]  }
0x17b9   :  { %4673 = vmatprep.subr.bf16.mxu1 %v5256_v63 }
0x17bc   :  { %4674 = vmatpush3.bf16.msra.mxu1 %v5257_v15 }
0x17bd   :  { %4675 = vmatprep.subr.bf16.mxu1 %v5258_v29 }
0x17c0   :  { %4676 = vmatpush3.bf16.msra.mxu1 %v5259_v49 }
0x17c1   :  { %4677 = vmatprep.subr.bf16.mxu1 %v5260_v22 }
0x17c4   :  { %4678 = vmatpush3.bf16.msra.mxu1 %v5261_v18 }
0x17c5   :  { %4679 = vmatprep.subr.bf16.mxu1 %v5262_v32 }
0x17c8   :  { %4680 = vmatpush3.bf16.msra.mxu1 %v5263_v38 }
0x187e   :  { %v3639_v2 = vpop.f32.mrb[52].mxu1 }
0x187f   :  { %v3640_v3 = vadd.f32 %v3639_v2, %v3438_v62  ;;  %v3641_v7 = vpop.f32.mrb[53].mxu1  ;;  %v4571_v2 = vld [vmem:[%s5931_s17] ss:$0 sm:$0xff] }
0x1880   :  { %v3642_v10 = vadd.f32 %v3641_v7, %v3442_v36  ;;  %v3643_v9 = vpop.f32.mrb[54].mxu1 }
0x1881   :  { %v3644_v52 = vadd.f32 %v3643_v9, %v3438_v62  ;;  %v3645_v12 = vpop.f32.mrb[55].mxu1  ;;  %v3648_v24 = vmax.f32 %v3640_v3, 0.0 }
0x1882   :  { %v3646_v14 = vadd.f32 %v3645_v12, %v3442_v36  ;;  %v3649_v37 = vmax.f32 %v3642_v10, 0.0 }
0x1883   :  { %v3650_v28 = vmax.f32 %v3644_v52, 0.0 }
0x1884   :  { %v3651_v16 = vmax.f32 %v3646_v14, 0.0 }
0x1885   :  { %v3685_v19 = vpack.c.bf16 %v3650_v28, %v3648_v24 }
0x1886   :  { %v3686_v53 = vpack.c.bf16 %v3651_v16, %v3649_v37 }
0x1888   :  { %3892 = vmatprep.mubr.bf16.mxu0 %v3686_v53 }
0x1889   :  { %3893 = vmatmul.mubr.bf16.vlgmr.msra.gmra.mrb[52].mxu0 %v3685_v19 }
0x188a   :  { %4882 = vmatprep.mubr.msk.bf16.mxu0 %vm5791_vm0, %v5790_v1 }
0x195c   :  { %v3894_v34 = vpop.f32.mrb[52].mxu0 }
0x195d   :  { %v3896_v5 = vpop.f32.mrb[53].mxu0  ;;  %v3895_v33 = vadd.f32 %v3894_v34, %v3693_v30 }
0x195e   :  { %v3898_v27 = vpop.f32.mrb[54].mxu0  ;;  %v3897_v13 = vadd.f32 %v3896_v5, %v3697_v4 }
0x195f   :  { %v3899_v41 = vadd.f32 %v3898_v27, %v3693_v30  ;;  %v3900_v6 = vpop.f32.mrb[55].mxu0 }
0x1960   :  { %v3901_v42 = vadd.f32 %v3900_v6, %v3697_v4 }
0x1961   :  { %v3936_v43 = vpack.c.bf16 %v3899_v41, %v3895_v33 }
0x1962   :  { %v3937_v44 = vpack.c.bf16 %v3901_v42, %v3897_v13 }
0x1964   :  { %4074 = vmatprep.mubr.bf16.mxu1 %v3937_v44 }
0x1965   :  { %4075 = vmatmul.mubr.bf16.vlgmr.msra.gmra.mrb[56].mxu1 %v3936_v43 }
0x1a38   :  { %v4681_v45 = vpop.f32.mrb[56].mxu1 }
0x1a39   :  { %v4682_v47 = vpop.f32.mrb[57].mxu1 }
0x1a3a   :  { %v4683_v50 = vadd.f32 %v4682_v47, %v4681_v45  ;;  %v4684_v51 = vpop.f32.mrb[58].mxu1 }
0x1a3b   :  { %v4685_v21 = vpop.f32.mrb[59].mxu1 }
0x1a3c   :  { %v4077_v54 = vadd.f32 %v4683_v50, %v4554_v46  ;;  %v4686_v17 = vadd.f32 %v4685_v21, %v4684_v51 }
0x1a3e   :  { %v4080_v31 = vadd.f32 %v4686_v17, %v4554_v46  ;;  %v4083_v25 = vadd.f32 %v4077_v54, %v6484_v0 }
0x1a40   :  { %v4087_v23 = vsel %vm462_vm4, %v4083_v25, 0.0  ;;  %v4084_v57 = vadd.f32 %v4080_v31, %v6487_v8  ;;  %v5264_v8 = vld [vmem:[#allocation25] sm:$0xff]  }
0x1a41   :  { %4088 = vadd.xlane.f32.xlu1 %v4087_v23  ;;  %4879 = vmatpush3.bf16.msra.mxu0 %v5264_v8 }
0x1a42   :  { %v4090_v55 = vsel %vm462_vm4, %v4084_v57, 0.0  ;;  %4880 = vmatprep.subr.bf16.mxu0 %v5790_v1  ;;  %v4572_v1 = vld [vmem:[%s5936_s5] ss:$0 sm:$0xff] }
0x1a43   :  { %4091 = vadd.xlane.f32.xlu0 %v4090_v55 }
0x1a45   :  { %4881 = vmatpush3.bf16.msra.mxu0 %v5265_v11 }
0x1ace   :  { %v4089_v58 = vpop.xlane.xlu1 %4088 }
0x1acf   :  { %v4093_v39 = vmul.f32 0.03125, %v4089_v58 }
0x1ad0   :  { %v4092_v56 = vpop.xlane.xlu0 %4091 }
0x1ad1   :  { %v4095_v20 = vsub.f32 %v4083_v25, %v4093_v39  ;;  %v4094_v48 = vmul.f32 0.03125, %v4092_v56 }
0x1ad3   :  { %v4096_v40 = vsub.f32 %v4084_v57, %v4094_v48  ;;  %v4097_v59 = vmul.f32 %v4095_v20, %v4095_v20 }
0x1ad5   :  { %v4099_v60 = vsel %vm462_vm4, %v4097_v59, 0.0  ;;  %v4098_v61 = vmul.f32 %v4096_v40, %v4096_v40 }
0x1ad6   :  { %4100 = vadd.xlane.f32.xlu1 %v4099_v60 }
0x1ad7   :  { %v4102_v0 = vsel %vm462_vm4, %v4098_v61, 0.0 }
0x1ad8   :  { %4103 = vadd.xlane.f32.xlu0 %v4102_v0 }
0x1b63   :  { %v4101_v63 = vpop.xlane.xlu1 %4100 }
0x1b64   :  { %v4105_v15 = vmul.f32 0.03125, %v4101_v63 }
0x1b65   :  { %v4104_v29 = vpop.xlane.xlu0 %4103 }
0x1b66   :  { %v4107_v49 = vadd.f32 1e-05, %v4105_v15  ;;  %v4106_v35 = vmul.f32 0.03125, %v4104_v29 }
0x1b68   :  { %5362 = vrsqrt.f32 %v4107_v49  ;;  %v4108_v62 = vadd.f32 1e-05, %v4106_v35 }
0x1b6a   :  { %5364 = vrsqrt.f32 %v4108_v62 }
0x1b72   :  { %v5363_v36 = vpop.eup %5362 }
0x1b73   :  { %v4111_v3 = vmul.f32 %v5363_v36, %v4095_v20 }
0x1b74   :  { %v5365_v7 = vpop.eup %5364 }
0x1b75   :  { %v4119_v10 = vmul.f32 %v4571_v2, %v4111_v3  ;;  %v4112_v9 = vmul.f32 %v5365_v7, %v4096_v40 }
0x1b77   :  { %v4120_v52 = vmul.f32 %v4571_v2, %v4112_v9  ;;  %v4127_v12 = vadd.f32 %v4572_v1, %v4119_v10 }
0x1b79   :  { %v4128_v14 = vadd.f32 %v4572_v1, %v4120_v52 }
0x1b7b   :  { %v4133_v24 = vpack.c.bf16 %v4128_v14, %v4127_v12 }
0x1b7d   :  { %4883 = vmatmul.mubr.msk.bf16.vlgmr.msra.gmra.mrb[56].mxu0 %vm462_vm4, %v4133_v24 }
0x1c50   :  { %v4183_v28 = vpop.f32.mrb[56].mxu0 }
0x1c51   :  { %4190 = vst [vmem:[%s5946_s9] sm:$0xff] %v4183_v28  ;;  %v4884_v37 = vpop.f32.mrb[57].mxu0 }
0x1c52   :  { %v4186_v16 = vpop.f32.mrb[58].mxu0 }
0x1c53   :  { %4191 = vst [vmem:[%s5946_s9 + $0x8] sm:$0xff] %v4186_v16  ;;  %v4885_v19 = vpop.f32.mrb[59].mxu0 }
0x1c54   :  { %4196 = vsyncpa [#allocation3], 1 }
0x1c55   :  { %4197 = vsyncpa [#allocation5], 1 }
0x1c56   :  { %4198 = vsyncpa [#allocation8], 1 }
0x1c57   :  { %4199 = vsyncpa [#allocation11], 1 }
0x1c58   :  { %4200 = vsyncpa [#allocation14], 1 }
0x1c59   :  { %4201 = vsyncpa [#allocation17], 1 }
0x1c5a   :  { %4202 = vsyncpa [#allocation20], 1 }
0x1c5b   :  { %4203 = vsyncpa [#allocation23], 1 }
0x1c5c   :  { %4204 = vsyncpa [#allocation26], 1 }

</bundles_post_ra>
